<compile_context>
chip_gen: v7x
topology: tpu7x:2x2x1
jax: 0.10.0
libtpu: 0.0.40
codegen_flags: <defaults>
</compile_context>

<pallas_src>
import numpy as np

import jax
import jax.numpy as jnp
from jax.experimental import pallas as pl
from jax.experimental.pallas import tpu as pltpu


TILE_B = 8   # batch tile per grid step (multiple of 8 -> aligned, unmasked stores)
_K = 5       # LeNet conv kernel size


# --------------------------------------------------------------------------
# Fused kernel: conv1+ReLU+pool -> conv2+ReLU+pool -> fc1 -> fc2 -> fc3
# --------------------------------------------------------------------------
def _lenet_kernel(x_ref, c1w_ref, c1b_ref, c2w_ref, c2b_ref,
                  f1w_ref, f1b_ref, f2w_ref, f2b_ref, f3w_ref, f3b_ref,
                  out_ref):
    f32 = jnp.float32
    tb = x_ref.shape[0]

    def conv_relu_pool(x, w_ref, b_ref):
        # x:     (tb, H, W*Cin)                      lane axis carries (w, cin)
        # w_ref: (5, 2, W*Cin, (W-4)//2 * Cout)      band per vertical tap i and
        #                                            per even/odd output column
        # b_ref: (1, (W-4)//2 * Cout)
        _, h, wc = x.shape
        oh = h - (_K - 1)
        n = w_ref.shape[-1]
        m = tb * oh
        ye = jnp.zeros((m, n), f32)
        yo = jnp.zeros((m, n), f32)
        for i in range(_K):                                   # 5 vertical taps
            xi = x[:, i:i + oh, :].reshape(m, wc)
            ye = ye + jnp.dot(xi, w_ref[i, 0, :, :], preferred_element_type=f32)
            yo = yo + jnp.dot(xi, w_ref[i, 1, :, :], preferred_element_type=f32)
        bias = b_ref[...]
        # ReLU + horizontal 2x1 max-pool (even vs. odd output columns).
        p = jnp.maximum(jnp.maximum(ye + bias, yo + bias), 0.0)
        # Vertical 2x1 max-pool over adjacent output rows.
        p = p.reshape(m // 2, 2, n)
        p = jnp.maximum(p[:, 0, :], p[:, 1, :])
        return p.reshape(tb, oh // 2, n)

    p1 = conv_relu_pool(x_ref[...], c1w_ref, c1b_ref)   # (tb, 14, 14*C1out)
    p2 = conv_relu_pool(p1, c2w_ref, c2b_ref)           # (tb, 5, 5*16)

    # fc1 as 5 row-wise matmuls: avoids an in-kernel CHW flatten; the
    # (h, w, c) -> PyTorch (c, h, w) permutation is baked into f1w on the host.
    acc = jnp.zeros((tb, f1w_ref.shape[-1]), f32)
    for hrow in range(5):
        acc = acc + jnp.dot(p2[:, hrow, :], f1w_ref[hrow, :, :],
                            preferred_element_type=f32)
    h1 = jnp.maximum(acc + f1b_ref[...], 0.0)                          # (tb,128)
    h2 = jnp.maximum(jnp.dot(h1, f2w_ref[...],
                             preferred_element_type=f32) + f2b_ref[...], 0.0)
    out = jnp.dot(h2, f3w_ref[...], preferred_element_type=f32) + f3b_ref[...]
    out_ref[...] = out.astype(out_ref.dtype)


# --------------------------------------------------------------------------
# One-time host-side weight packing (hoisted out of the per-forward path)
# --------------------------------------------------------------------------
def _conv_band_weights(w, b, in_w):
    """Pack a 5x5 conv (PyTorch OIHW weight) + the horizontal half of the 2x2
    max-pool into per-tap band matrices.

    Returns bands (5, 2, in_w*Cin, (in_w-4)//2 * Cout) and a tiled bias
    (1, (in_w-4)//2 * Cout).  bands[i, parity] maps an input row laid out as
    lanes (w*Cin + cin) to conv outputs at output columns ow = 2*owp + parity,
    laid out as lanes (owp*Cout + cout).
    """
    w = np.asarray(w, np.float32)                      # (Cout, Cin, 5, 5)
    b = np.asarray(b, np.float32)
    cout, cin, kh, kw = w.shape
    ow = in_w - kw + 1
    owp = ow // 2
    bands = np.zeros((kh, 2, in_w * cin, owp * cout), np.float32)
    for i in range(kh):
        for parity in range(2):
            for op in range(owp):
                o = 2 * op + parity                    # pre-pool output column
                for j in range(kw):
                    col = o + j                        # input column it reads
                    bands[i, parity,
                          col * cin:(col + 1) * cin,
                          op * cout:(op + 1) * cout] = w[:, :, i, j].T
    bias = np.tile(b, owp)[None, :]
    return jnp.asarray(bands), jnp.asarray(bias)


def _fc1_band_weights(w, b, n_pad=128):
    """fc1 weights reordered from PyTorch's (c,h,w) flatten to the kernel's
    (h, w*16 + c) pooled layout, split per pooled row h, zero-padded to 128."""
    w = np.asarray(w, np.float32).reshape(120, 16, 5, 5)   # (n, c, h, w)
    bands = np.zeros((5, 5 * 16, n_pad), np.float32)
    for h in range(5):
        blk = w[:, :, h, :].transpose(2, 1, 0).reshape(5 * 16, 120)  # (w*16+c, n)
        bands[h, :, :120] = blk
    bias = np.zeros((1, n_pad), np.float32)
    bias[0, :120] = np.asarray(b, np.float32)
    return jnp.asarray(bands), jnp.asarray(bias)


def _fc_pad(w, b, k_pad=128, n_pad=128):
    """PyTorch Linear weight (N, K) -> zero-padded (k_pad, n_pad) matmul weight."""
    w = np.asarray(w, np.float32)
    n, k = w.shape
    wp = np.zeros((k_pad, n_pad), np.float32)
    wp[:k, :n] = w.T
    bp = np.zeros((1, n_pad), np.float32)
    bp[0, :n] = np.asarray(b, np.float32)
    return jnp.asarray(wp), jnp.asarray(bp)


def prepare_params(params):
    """Pack PyTorch-layout LeNet weights into the layouts the kernel consumes."""
    c1w, c1b = _conv_band_weights(params["conv1_w"], params["conv1_b"], in_w=32)
    c2w, c2b = _conv_band_weights(params["conv2_w"], params["conv2_b"], in_w=14)
    f1w, f1b = _fc1_band_weights(params["fc1_w"], params["fc1_b"])
    f2w, f2b = _fc_pad(params["fc2_w"], params["fc2_b"])
    f3w, f3b = _fc_pad(params["fc3_w"], params["fc3_b"])
    return dict(c1w=c1w, c1b=c1b, c2w=c2w, c2b=c2b,
                f1w=f1w, f1b=f1b, f2w=f2w, f2b=f2b, f3w=f3w, f3b=f3b)


# --------------------------------------------------------------------------
# Forward wrapper: one pallas_call, grid over batch tiles
# --------------------------------------------------------------------------
def lenet_forward(x_nchw, prep):
    """x_nchw: (B, Cin, 32, 32) float32; prep: output of prepare_params()."""
    bsz, cin, hh, ww = x_nchw.shape
    x = jnp.transpose(x_nchw, (0, 2, 3, 1)).reshape(bsz, hh, ww * cin)
    x = x.astype(jnp.float32)
    bpad = ((bsz + TILE_B - 1) // TILE_B) * TILE_B
    if bpad != bsz:
        x = jnp.pad(x, ((0, bpad - bsz), (0, 0), (0, 0)))

    def full_spec(arr):
        nd = arr.ndim
        return pl.BlockSpec(arr.shape, lambda i: (0,) * nd)

    out = pl.pallas_call(
        _lenet_kernel,
        out_shape=jax.ShapeDtypeStruct((bpad, 128), jnp.float32),
        grid=(bpad // TILE_B,),
        in_specs=[pl.BlockSpec((TILE_B, hh, ww * cin), lambda i: (i, 0, 0)),
                  full_spec(prep["c1w"]), full_spec(prep["c1b"]),
                  full_spec(prep["c2w"]), full_spec(prep["c2b"]),
                  full_spec(prep["f1w"]), full_spec(prep["f1b"]),
                  full_spec(prep["f2w"]), full_spec(prep["f2b"]),
                  full_spec(prep["f3w"]), full_spec(prep["f3b"])],
        out_specs=pl.BlockSpec((TILE_B, 128), lambda i: (i, 0)),
        compiler_params=pltpu.CompilerParams(
            dimension_semantics=("parallel",)),
    )(x, prep["c1w"], prep["c1b"], prep["c2w"], prep["c2b"],
      prep["f1w"], prep["f1b"], prep["f2w"], prep["f2b"],
      prep["f3w"], prep["f3b"])
    return out[:bsz, :10]


# --------------------------------------------------------------------------
# Deterministic parameter init (shapes per LeNet.__init__, PyTorch-style uniform)
# --------------------------------------------------------------------------
def init_params(key, in_ch=1, out_ch=6):
    def uniform(k, shape, fan_in):
        bound = 1.0 / jnp.sqrt(float(fan_in))
        return jax.random.uniform(k, shape, jnp.float32, -bound, bound)

    ks = jax.random.split(key, 10)
    return {
        "conv1_w": uniform(ks[0], (out_ch, in_ch, 5, 5), in_ch * 25),
        "conv1_b": uniform(ks[1], (out_ch,), in_ch * 25),
        "conv2_w": uniform(ks[2], (16, out_ch, 5, 5), out_ch * 25),
        "conv2_b": uniform(ks[3], (16,), out_ch * 25),
        "fc1_w": uniform(ks[4], (120, 16 * 5 * 5), 16 * 5 * 5),
        "fc1_b": uniform(ks[5], (120,), 16 * 5 * 5),
        "fc2_w": uniform(ks[6], (84, 120), 120),
        "fc2_b": uniform(ks[7], (84,), 120),
        "fc3_w": uniform(ks[8], (10, 84), 84),
        "fc3_b": uniform(ks[9], (10,), 84),
    }


# --------------------------------------------------------------------------
# Pure-NumPy float64 reference (exact PyTorch semantics) for validation
# --------------------------------------------------------------------------
def lenet_reference(x_nchw, params):
    x = np.asarray(x_nchw, np.float64)

    def conv(x, w, b):
        w = np.asarray(w, np.float64)
        b = np.asarray(b, np.float64)
        bb, c, h, ww = x.shape
        oh, ow = h - 4, ww - 4
        y = np.zeros((bb, w.shape[0], oh, ow), np.float64)
        for i in range(5):
            for j in range(5):
                y += np.einsum("bchw,oc->bohw",
                               x[:, :, i:i + oh, j:j + ow], w[:, :, i, j])
        return y + b[None, :, None, None]

    def pool(x):
        bb, c, h, ww = x.shape
        return x.reshape(bb, c, h // 2, 2, ww // 2, 2).max(axis=(3, 5))

    relu = lambda v: np.maximum(v, 0.0)
    y = pool(relu(conv(x, params["conv1_w"], params["conv1_b"])))
    y = pool(relu(conv(y, params["conv2_w"], params["conv2_b"])))
    y = y.reshape(y.shape[0], -1)                                  # (c, h, w) order
    y = relu(y @ np.asarray(params["fc1_w"], np.float64).T
             + np.asarray(params["fc1_b"], np.float64))
    y = relu(y @ np.asarray(params["fc2_w"], np.float64).T
             + np.asarray(params["fc2_b"], np.float64))
    y = (y @ np.asarray(params["fc3_w"], np.float64).T
         + np.asarray(params["fc3_b"], np.float64))
    return y


if __name__ == "__main__":
    key = jax.random.PRNGKey(0)
    k_x, k_p = jax.random.split(key)
    # 32x32 spatial is required so the flattened conv features are 16*5*5 = 400.
    x = jax.random.normal(k_x, (2, 1, 32, 32), dtype=jnp.float32)
    params = init_params(k_p)
    prep = prepare_params(params)       # one-time host-side weight packing

    fwd = jax.jit(lenet_forward)
    out = jax.block_until_ready(fwd(x, prep))
    assert out.shape == (2, 10) and out.dtype == jnp.float32

    # Validate against an exact float64 reference (MXU default precision runs
    # bf16 passes, hence the modest tolerance).
    ref = lenet_reference(x, params)
    diff = float(np.max(np.abs(np.asarray(out, np.float64) - ref)))
    assert np.allclose(np.asarray(out, np.float64), ref, rtol=3e-2, atol=3e-2), diff
    print("KERNEL_OK")
</pallas_src>

<mosaic_0001>
module attributes {stable_mosaic.version = 11 : i64} {
  func.func @_lenet_kernel(%arg0: i32, %arg1: memref<8x32x32xf32, #tpu.memory_space<vmem>>, %arg2: memref<5x2x32x84xf32, #tpu.memory_space<vmem>>, %arg3: memref<1x84xf32, #tpu.memory_space<vmem>>, %arg4: memref<5x2x84x80xf32, #tpu.memory_space<vmem>>, %arg5: memref<1x80xf32, #tpu.memory_space<vmem>>, %arg6: memref<5x80x128xf32, #tpu.memory_space<vmem>>, %arg7: memref<1x128xf32, #tpu.memory_space<vmem>>, %arg8: memref<128x128xf32, #tpu.memory_space<vmem>>, %arg9: memref<1x128xf32, #tpu.memory_space<vmem>>, %arg10: memref<128x128xf32, #tpu.memory_space<vmem>>, %arg11: memref<1x128xf32, #tpu.memory_space<vmem>>, %arg12: memref<8x128xf32, #tpu.memory_space<vmem>>) attributes {dimension_semantics = [#tpu.dimension_semantics<parallel>], iteration_bounds = array<i64: 1>, scalar_prefetch = 0 : i64, scratch_operands = 0 : i64, tpu.core_type = #tpu.core_type<tc>, window_params = [{transform_indices = @transform_0, window_bounds = array<i64: 8, 32, 32>}, {pipeline_mode = #tpu.pipeline_mode<synchronous>, transform_indices = @transform_1, window_bounds = array<i64: 5, 2, 32, 84>}, {pipeline_mode = #tpu.pipeline_mode<synchronous>, transform_indices = @transform_2, window_bounds = array<i64: 1, 84>}, {pipeline_mode = #tpu.pipeline_mode<synchronous>, transform_indices = @transform_3, window_bounds = array<i64: 5, 2, 84, 80>}, {pipeline_mode = #tpu.pipeline_mode<synchronous>, transform_indices = @transform_4, window_bounds = array<i64: 1, 80>}, {pipeline_mode = #tpu.pipeline_mode<synchronous>, transform_indices = @transform_5, window_bounds = array<i64: 5, 80, 128>}, {pipeline_mode = #tpu.pipeline_mode<synchronous>, transform_indices = @transform_6, window_bounds = array<i64: 1, 128>}, {pipeline_mode = #tpu.pipeline_mode<synchronous>, transform_indices = @transform_7, window_bounds = array<i64: 128, 128>}, {pipeline_mode = #tpu.pipeline_mode<synchronous>, transform_indices = @transform_8, window_bounds = array<i64: 1, 128>}, {pipeline_mode = #tpu.pipeline_mode<synchronous>, transform_indices = @transform_9, window_bounds = array<i64: 128, 128>}, {pipeline_mode = #tpu.pipeline_mode<synchronous>, transform_indices = @transform_10, window_bounds = array<i64: 1, 128>}, {transform_indices = @transform_11, window_bounds = array<i64: 8, 128>}]} {
    %c0 = arith.constant 0 : index
    %c0_0 = arith.constant 0 : index
    %c0_1 = arith.constant 0 : index
    %0 = vector.load %arg1[%c0, %c0_0, %c0_1] : memref<8x32x32xf32, #tpu.memory_space<vmem>>, vector<8x32x32xf32>
    %cst = arith.constant 0.000000e+00 : f32
    %1 = vector.broadcast %cst : f32 to vector<224x84xf32>
    %cst_2 = arith.constant 0.000000e+00 : f32
    %2 = vector.broadcast %cst_2 : f32 to vector<224x84xf32>
    %3 = vector.extract_strided_slice %0 {offsets = [0, 0, 0], sizes = [8, 28, 32], strides = [1, 1, 1]} : vector<8x32x32xf32> to vector<8x28x32xf32>
    %4 = vector.shape_cast %3 : vector<8x28x32xf32> to vector<224x32xf32>
    %c0_3 = arith.constant 0 : index
    %c0_4 = arith.constant 0 : index
    %c0_5 = arith.constant 0 : index
    %c0_6 = arith.constant 0 : index
    %5 = vector.load %arg2[%c0_3, %c0_4, %c0_5, %c0_6] : memref<5x2x32x84xf32, #tpu.memory_space<vmem>>, vector<1x1x32x84xf32>
    %6 = vector.shape_cast %5 : vector<1x1x32x84xf32> to vector<32x84xf32>
    %cst_7 = arith.constant dense<0.000000e+00> : vector<224x84xf32>
    %7 = tpu.matmul %4, %6, %cst_7 {dimension_numbers = #tpu.dot_dimension_numbers<[1], [0], [0], [1], [0, 0, 1, 1], [], []>} : vector<224x32xf32>, vector<32x84xf32>, vector<224x84xf32> -> vector<224x84xf32>
    %8 = arith.addf %1, %7 : vector<224x84xf32>
    %c0_8 = arith.constant 0 : index
    %c1 = arith.constant 1 : index
    %c0_9 = arith.constant 0 : index
    %c0_10 = arith.constant 0 : index
    %9 = vector.load %arg2[%c0_8, %c1, %c0_9, %c0_10] : memref<5x2x32x84xf32, #tpu.memory_space<vmem>>, vector<1x1x32x84xf32>
    %10 = vector.shape_cast %9 : vector<1x1x32x84xf32> to vector<32x84xf32>
    %cst_11 = arith.constant dense<0.000000e+00> : vector<224x84xf32>
    %11 = tpu.matmul %4, %10, %cst_11 {dimension_numbers = #tpu.dot_dimension_numbers<[1], [0], [0], [1], [0, 0, 1, 1], [], []>} : vector<224x32xf32>, vector<32x84xf32>, vector<224x84xf32> -> vector<224x84xf32>
    %12 = arith.addf %2, %11 : vector<224x84xf32>
    %13 = vector.extract_strided_slice %0 {offsets = [0, 1, 0], sizes = [8, 28, 32], strides = [1, 1, 1]} : vector<8x32x32xf32> to vector<8x28x32xf32>
    %14 = vector.shape_cast %13 : vector<8x28x32xf32> to vector<224x32xf32>
    %c1_12 = arith.constant 1 : index
    %c0_13 = arith.constant 0 : index
    %c0_14 = arith.constant 0 : index
    %c0_15 = arith.constant 0 : index
    %15 = vector.load %arg2[%c1_12, %c0_13, %c0_14, %c0_15] : memref<5x2x32x84xf32, #tpu.memory_space<vmem>>, vector<1x1x32x84xf32>
    %16 = vector.shape_cast %15 : vector<1x1x32x84xf32> to vector<32x84xf32>
    %cst_16 = arith.constant dense<0.000000e+00> : vector<224x84xf32>
    %17 = tpu.matmul %14, %16, %cst_16 {dimension_numbers = #tpu.dot_dimension_numbers<[1], [0], [0], [1], [0, 0, 1, 1], [], []>} : vector<224x32xf32>, vector<32x84xf32>, vector<224x84xf32> -> vector<224x84xf32>
    %18 = arith.addf %8, %17 : vector<224x84xf32>
    %c1_17 = arith.constant 1 : index
    %c1_18 = arith.constant 1 : index
    %c0_19 = arith.constant 0 : index
    %c0_20 = arith.constant 0 : index
    %19 = vector.load %arg2[%c1_17, %c1_18, %c0_19, %c0_20] : memref<5x2x32x84xf32, #tpu.memory_space<vmem>>, vector<1x1x32x84xf32>
    %20 = vector.shape_cast %19 : vector<1x1x32x84xf32> to vector<32x84xf32>
    %cst_21 = arith.constant dense<0.000000e+00> : vector<224x84xf32>
    %21 = tpu.matmul %14, %20, %cst_21 {dimension_numbers = #tpu.dot_dimension_numbers<[1], [0], [0], [1], [0, 0, 1, 1], [], []>} : vector<224x32xf32>, vector<32x84xf32>, vector<224x84xf32> -> vector<224x84xf32>
    %22 = arith.addf %12, %21 : vector<224x84xf32>
    %23 = vector.extract_strided_slice %0 {offsets = [0, 2, 0], sizes = [8, 28, 32], strides = [1, 1, 1]} : vector<8x32x32xf32> to vector<8x28x32xf32>
    %24 = vector.shape_cast %23 : vector<8x28x32xf32> to vector<224x32xf32>
    %c2 = arith.constant 2 : index
    %c0_22 = arith.constant 0 : index
    %c0_23 = arith.constant 0 : index
    %c0_24 = arith.constant 0 : index
    %25 = vector.load %arg2[%c2, %c0_22, %c0_23, %c0_24] : memref<5x2x32x84xf32, #tpu.memory_space<vmem>>, vector<1x1x32x84xf32>
    %26 = vector.shape_cast %25 : vector<1x1x32x84xf32> to vector<32x84xf32>
    %cst_25 = arith.constant dense<0.000000e+00> : vector<224x84xf32>
    %27 = tpu.matmul %24, %26, %cst_25 {dimension_numbers = #tpu.dot_dimension_numbers<[1], [0], [0], [1], [0, 0, 1, 1], [], []>} : vector<224x32xf32>, vector<32x84xf32>, vector<224x84xf32> -> vector<224x84xf32>
    %28 = arith.addf %18, %27 : vector<224x84xf32>
    %c2_26 = arith.constant 2 : index
    %c1_27 = arith.constant 1 : index
    %c0_28 = arith.constant 0 : index
    %c0_29 = arith.constant 0 : index
    %29 = vector.load %arg2[%c2_26, %c1_27, %c0_28, %c0_29] : memref<5x2x32x84xf32, #tpu.memory_space<vmem>>, vector<1x1x32x84xf32>
    %30 = vector.shape_cast %29 : vector<1x1x32x84xf32> to vector<32x84xf32>
    %cst_30 = arith.constant dense<0.000000e+00> : vector<224x84xf32>
    %31 = tpu.matmul %24, %30, %cst_30 {dimension_numbers = #tpu.dot_dimension_numbers<[1], [0], [0], [1], [0, 0, 1, 1], [], []>} : vector<224x32xf32>, vector<32x84xf32>, vector<224x84xf32> -> vector<224x84xf32>
    %32 = arith.addf %22, %31 : vector<224x84xf32>
    %33 = vector.extract_strided_slice %0 {offsets = [0, 3, 0], sizes = [8, 28, 32], strides = [1, 1, 1]} : vector<8x32x32xf32> to vector<8x28x32xf32>
    %34 = vector.shape_cast %33 : vector<8x28x32xf32> to vector<224x32xf32>
    %c3 = arith.constant 3 : index
    %c0_31 = arith.constant 0 : index
    %c0_32 = arith.constant 0 : index
    %c0_33 = arith.constant 0 : index
    %35 = vector.load %arg2[%c3, %c0_31, %c0_32, %c0_33] : memref<5x2x32x84xf32, #tpu.memory_space<vmem>>, vector<1x1x32x84xf32>
    %36 = vector.shape_cast %35 : vector<1x1x32x84xf32> to vector<32x84xf32>
    %cst_34 = arith.constant dense<0.000000e+00> : vector<224x84xf32>
    %37 = tpu.matmul %34, %36, %cst_34 {dimension_numbers = #tpu.dot_dimension_numbers<[1], [0], [0], [1], [0, 0, 1, 1], [], []>} : vector<224x32xf32>, vector<32x84xf32>, vector<224x84xf32> -> vector<224x84xf32>
    %38 = arith.addf %28, %37 : vector<224x84xf32>
    %c3_35 = arith.constant 3 : index
    %c1_36 = arith.constant 1 : index
    %c0_37 = arith.constant 0 : index
    %c0_38 = arith.constant 0 : index
    %39 = vector.load %arg2[%c3_35, %c1_36, %c0_37, %c0_38] : memref<5x2x32x84xf32, #tpu.memory_space<vmem>>, vector<1x1x32x84xf32>
    %40 = vector.shape_cast %39 : vector<1x1x32x84xf32> to vector<32x84xf32>
    %cst_39 = arith.constant dense<0.000000e+00> : vector<224x84xf32>
    %41 = tpu.matmul %34, %40, %cst_39 {dimension_numbers = #tpu.dot_dimension_numbers<[1], [0], [0], [1], [0, 0, 1, 1], [], []>} : vector<224x32xf32>, vector<32x84xf32>, vector<224x84xf32> -> vector<224x84xf32>
    %42 = arith.addf %32, %41 : vector<224x84xf32>
    %43 = vector.extract_strided_slice %0 {offsets = [0, 4, 0], sizes = [8, 28, 32], strides = [1, 1, 1]} : vector<8x32x32xf32> to vector<8x28x32xf32>
    %44 = vector.shape_cast %43 : vector<8x28x32xf32> to vector<224x32xf32>
    %c4 = arith.constant 4 : index
    %c0_40 = arith.constant 0 : index
    %c0_41 = arith.constant 0 : index
    %c0_42 = arith.constant 0 : index
    %45 = vector.load %arg2[%c4, %c0_40, %c0_41, %c0_42] : memref<5x2x32x84xf32, #tpu.memory_space<vmem>>, vector<1x1x32x84xf32>
    %46 = vector.shape_cast %45 : vector<1x1x32x84xf32> to vector<32x84xf32>
    %cst_43 = arith.constant dense<0.000000e+00> : vector<224x84xf32>
    %47 = tpu.matmul %44, %46, %cst_43 {dimension_numbers = #tpu.dot_dimension_numbers<[1], [0], [0], [1], [0, 0, 1, 1], [], []>} : vector<224x32xf32>, vector<32x84xf32>, vector<224x84xf32> -> vector<224x84xf32>
    %48 = arith.addf %38, %47 : vector<224x84xf32>
    %c4_44 = arith.constant 4 : index
    %c1_45 = arith.constant 1 : index
    %c0_46 = arith.constant 0 : index
    %c0_47 = arith.constant 0 : index
    %49 = vector.load %arg2[%c4_44, %c1_45, %c0_46, %c0_47] : memref<5x2x32x84xf32, #tpu.memory_space<vmem>>, vector<1x1x32x84xf32>
    %50 = vector.shape_cast %49 : vector<1x1x32x84xf32> to vector<32x84xf32>
    %cst_48 = arith.constant dense<0.000000e+00> : vector<224x84xf32>
    %51 = tpu.matmul %44, %50, %cst_48 {dimension_numbers = #tpu.dot_dimension_numbers<[1], [0], [0], [1], [0, 0, 1, 1], [], []>} : vector<224x32xf32>, vector<32x84xf32>, vector<224x84xf32> -> vector<224x84xf32>
    %52 = arith.addf %42, %51 : vector<224x84xf32>
    %c0_49 = arith.constant 0 : index
    %c0_50 = arith.constant 0 : index
    %53 = vector.load %arg3[%c0_49, %c0_50] : memref<1x84xf32, #tpu.memory_space<vmem>>, vector<1x84xf32>
    %54 = vector.broadcast %53 : vector<1x84xf32> to vector<224x84xf32>
    %55 = arith.addf %48, %54 : vector<224x84xf32>
    %56 = vector.broadcast %53 : vector<1x84xf32> to vector<224x84xf32>
    %57 = arith.addf %52, %56 : vector<224x84xf32>
    %58 = arith.maximumf %55, %57 : vector<224x84xf32>
    %cst_51 = arith.constant 0.000000e+00 : f32
    %59 = vector.broadcast %cst_51 : f32 to vector<224x84xf32>
    %60 = arith.maximumf %58, %59 : vector<224x84xf32>
    %61 = vector.shape_cast %60 : vector<224x84xf32> to vector<112x2x84xf32>
    %62 = vector.extract_strided_slice %61 {offsets = [0, 0, 0], sizes = [112, 1, 84], strides = [1, 1, 1]} : vector<112x2x84xf32> to vector<112x1x84xf32>
    %63 = vector.shape_cast %62 : vector<112x1x84xf32> to vector<112x84xf32>
    %64 = vector.extract_strided_slice %61 {offsets = [0, 1, 0], sizes = [112, 1, 84], strides = [1, 1, 1]} : vector<112x2x84xf32> to vector<112x1x84xf32>
    %65 = vector.shape_cast %64 : vector<112x1x84xf32> to vector<112x84xf32>
    %66 = arith.maximumf %63, %65 : vector<112x84xf32>
    %67 = vector.shape_cast %66 : vector<112x84xf32> to vector<8x14x84xf32>
    %cst_52 = arith.constant 0.000000e+00 : f32
    %68 = vector.broadcast %cst_52 : f32 to vector<80x80xf32>
    %cst_53 = arith.constant 0.000000e+00 : f32
    %69 = vector.broadcast %cst_53 : f32 to vector<80x80xf32>
    %70 = vector.extract_strided_slice %67 {offsets = [0, 0, 0], sizes = [8, 10, 84], strides = [1, 1, 1]} : vector<8x14x84xf32> to vector<8x10x84xf32>
    %71 = vector.shape_cast %70 : vector<8x10x84xf32> to vector<80x84xf32>
    %c0_54 = arith.constant 0 : index
    %c0_55 = arith.constant 0 : index
    %c0_56 = arith.constant 0 : index
    %c0_57 = arith.constant 0 : index
    %72 = vector.load %arg4[%c0_54, %c0_55, %c0_56, %c0_57] : memref<5x2x84x80xf32, #tpu.memory_space<vmem>>, vector<1x1x84x80xf32>
    %73 = vector.shape_cast %72 : vector<1x1x84x80xf32> to vector<84x80xf32>
    %cst_58 = arith.constant dense<0.000000e+00> : vector<80x80xf32>
    %74 = tpu.matmul %71, %73, %cst_58 {dimension_numbers = #tpu.dot_dimension_numbers<[1], [0], [0], [1], [0, 0, 1, 1], [], []>} : vector<80x84xf32>, vector<84x80xf32>, vector<80x80xf32> -> vector<80x80xf32>
    %75 = arith.addf %68, %74 : vector<80x80xf32>
    %c0_59 = arith.constant 0 : index
    %c1_60 = arith.constant 1 : index
    %c0_61 = arith.constant 0 : index
    %c0_62 = arith.constant 0 : index
    %76 = vector.load %arg4[%c0_59, %c1_60, %c0_61, %c0_62] : memref<5x2x84x80xf32, #tpu.memory_space<vmem>>, vector<1x1x84x80xf32>
    %77 = vector.shape_cast %76 : vector<1x1x84x80xf32> to vector<84x80xf32>
    %cst_63 = arith.constant dense<0.000000e+00> : vector<80x80xf32>
    %78 = tpu.matmul %71, %77, %cst_63 {dimension_numbers = #tpu.dot_dimension_numbers<[1], [0], [0], [1], [0, 0, 1, 1], [], []>} : vector<80x84xf32>, vector<84x80xf32>, vector<80x80xf32> -> vector<80x80xf32>
    %79 = arith.addf %69, %78 : vector<80x80xf32>
    %80 = vector.extract_strided_slice %67 {offsets = [0, 1, 0], sizes = [8, 10, 84], strides = [1, 1, 1]} : vector<8x14x84xf32> to vector<8x10x84xf32>
    %81 = vector.shape_cast %80 : vector<8x10x84xf32> to vector<80x84xf32>
    %c1_64 = arith.constant 1 : index
    %c0_65 = arith.constant 0 : index
    %c0_66 = arith.constant 0 : index
    %c0_67 = arith.constant 0 : index
    %82 = vector.load %arg4[%c1_64, %c0_65, %c0_66, %c0_67] : memref<5x2x84x80xf32, #tpu.memory_space<vmem>>, vector<1x1x84x80xf32>
    %83 = vector.shape_cast %82 : vector<1x1x84x80xf32> to vector<84x80xf32>
    %cst_68 = arith.constant dense<0.000000e+00> : vector<80x80xf32>
    %84 = tpu.matmul %81, %83, %cst_68 {dimension_numbers = #tpu.dot_dimension_numbers<[1], [0], [0], [1], [0, 0, 1, 1], [], []>} : vector<80x84xf32>, vector<84x80xf32>, vector<80x80xf32> -> vector<80x80xf32>
    %85 = arith.addf %75, %84 : vector<80x80xf32>
    %c1_69 = arith.constant 1 : index
    %c1_70 = arith.constant 1 : index
    %c0_71 = arith.constant 0 : index
    %c0_72 = arith.constant 0 : index
    %86 = vector.load %arg4[%c1_69, %c1_70, %c0_71, %c0_72] : memref<5x2x84x80xf32, #tpu.memory_space<vmem>>, vector<1x1x84x80xf32>
    %87 = vector.shape_cast %86 : vector<1x1x84x80xf32> to vector<84x80xf32>
    %cst_73 = arith.constant dense<0.000000e+00> : vector<80x80xf32>
    %88 = tpu.matmul %81, %87, %cst_73 {dimension_numbers = #tpu.dot_dimension_numbers<[1], [0], [0], [1], [0, 0, 1, 1], [], []>} : vector<80x84xf32>, vector<84x80xf32>, vector<80x80xf32> -> vector<80x80xf32>
    %89 = arith.addf %79, %88 : vector<80x80xf32>
    %90 = vector.extract_strided_slice %67 {offsets = [0, 2, 0], sizes = [8, 10, 84], strides = [1, 1, 1]} : vector<8x14x84xf32> to vector<8x10x84xf32>
    %91 = vector.shape_cast %90 : vector<8x10x84xf32> to vector<80x84xf32>
    %c2_74 = arith.constant 2 : index
    %c0_75 = arith.constant 0 : index
    %c0_76 = arith.constant 0 : index
    %c0_77 = arith.constant 0 : index
    %92 = vector.load %arg4[%c2_74, %c0_75, %c0_76, %c0_77] : memref<5x2x84x80xf32, #tpu.memory_space<vmem>>, vector<1x1x84x80xf32>
    %93 = vector.shape_cast %92 : vector<1x1x84x80xf32> to vector<84x80xf32>
    %cst_78 = arith.constant dense<0.000000e+00> : vector<80x80xf32>
    %94 = tpu.matmul %91, %93, %cst_78 {dimension_numbers = #tpu.dot_dimension_numbers<[1], [0], [0], [1], [0, 0, 1, 1], [], []>} : vector<80x84xf32>, vector<84x80xf32>, vector<80x80xf32> -> vector<80x80xf32>
    %95 = arith.addf %85, %94 : vector<80x80xf32>
    %c2_79 = arith.constant 2 : index
    %c1_80 = arith.constant 1 : index
    %c0_81 = arith.constant 0 : index
    %c0_82 = arith.constant 0 : index
    %96 = vector.load %arg4[%c2_79, %c1_80, %c0_81, %c0_82] : memref<5x2x84x80xf32, #tpu.memory_space<vmem>>, vector<1x1x84x80xf32>
    %97 = vector.shape_cast %96 : vector<1x1x84x80xf32> to vector<84x80xf32>
    %cst_83 = arith.constant dense<0.000000e+00> : vector<80x80xf32>
    %98 = tpu.matmul %91, %97, %cst_83 {dimension_numbers = #tpu.dot_dimension_numbers<[1], [0], [0], [1], [0, 0, 1, 1], [], []>} : vector<80x84xf32>, vector<84x80xf32>, vector<80x80xf32> -> vector<80x80xf32>
    %99 = arith.addf %89, %98 : vector<80x80xf32>
    %100 = vector.extract_strided_slice %67 {offsets = [0, 3, 0], sizes = [8, 10, 84], strides = [1, 1, 1]} : vector<8x14x84xf32> to vector<8x10x84xf32>
    %101 = vector.shape_cast %100 : vector<8x10x84xf32> to vector<80x84xf32>
    %c3_84 = arith.constant 3 : index
    %c0_85 = arith.constant 0 : index
    %c0_86 = arith.constant 0 : index
    %c0_87 = arith.constant 0 : index
    %102 = vector.load %arg4[%c3_84, %c0_85, %c0_86, %c0_87] : memref<5x2x84x80xf32, #tpu.memory_space<vmem>>, vector<1x1x84x80xf32>
    %103 = vector.shape_cast %102 : vector<1x1x84x80xf32> to vector<84x80xf32>
    %cst_88 = arith.constant dense<0.000000e+00> : vector<80x80xf32>
    %104 = tpu.matmul %101, %103, %cst_88 {dimension_numbers = #tpu.dot_dimension_numbers<[1], [0], [0], [1], [0, 0, 1, 1], [], []>} : vector<80x84xf32>, vector<84x80xf32>, vector<80x80xf32> -> vector<80x80xf32>
    %105 = arith.addf %95, %104 : vector<80x80xf32>
    %c3_89 = arith.constant 3 : index
    %c1_90 = arith.constant 1 : index
    %c0_91 = arith.constant 0 : index
    %c0_92 = arith.constant 0 : index
    %106 = vector.load %arg4[%c3_89, %c1_90, %c0_91, %c0_92] : memref<5x2x84x80xf32, #tpu.memory_space<vmem>>, vector<1x1x84x80xf32>
    %107 = vector.shape_cast %106 : vector<1x1x84x80xf32> to vector<84x80xf32>
    %cst_93 = arith.constant dense<0.000000e+00> : vector<80x80xf32>
    %108 = tpu.matmul %101, %107, %cst_93 {dimension_numbers = #tpu.dot_dimension_numbers<[1], [0], [0], [1], [0, 0, 1, 1], [], []>} : vector<80x84xf32>, vector<84x80xf32>, vector<80x80xf32> -> vector<80x80xf32>
    %109 = arith.addf %99, %108 : vector<80x80xf32>
    %110 = vector.extract_strided_slice %67 {offsets = [0, 4, 0], sizes = [8, 10, 84], strides = [1, 1, 1]} : vector<8x14x84xf32> to vector<8x10x84xf32>
    %111 = vector.shape_cast %110 : vector<8x10x84xf32> to vector<80x84xf32>
    %c4_94 = arith.constant 4 : index
    %c0_95 = arith.constant 0 : index
    %c0_96 = arith.constant 0 : index
    %c0_97 = arith.constant 0 : index
    %112 = vector.load %arg4[%c4_94, %c0_95, %c0_96, %c0_97] : memref<5x2x84x80xf32, #tpu.memory_space<vmem>>, vector<1x1x84x80xf32>
    %113 = vector.shape_cast %112 : vector<1x1x84x80xf32> to vector<84x80xf32>
    %cst_98 = arith.constant dense<0.000000e+00> : vector<80x80xf32>
    %114 = tpu.matmul %111, %113, %cst_98 {dimension_numbers = #tpu.dot_dimension_numbers<[1], [0], [0], [1], [0, 0, 1, 1], [], []>} : vector<80x84xf32>, vector<84x80xf32>, vector<80x80xf32> -> vector<80x80xf32>
    %115 = arith.addf %105, %114 : vector<80x80xf32>
    %c4_99 = arith.constant 4 : index
    %c1_100 = arith.constant 1 : index
    %c0_101 = arith.constant 0 : index
    %c0_102 = arith.constant 0 : index
    %116 = vector.load %arg4[%c4_99, %c1_100, %c0_101, %c0_102] : memref<5x2x84x80xf32, #tpu.memory_space<vmem>>, vector<1x1x84x80xf32>
    %117 = vector.shape_cast %116 : vector<1x1x84x80xf32> to vector<84x80xf32>
    %cst_103 = arith.constant dense<0.000000e+00> : vector<80x80xf32>
    %118 = tpu.matmul %111, %117, %cst_103 {dimension_numbers = #tpu.dot_dimension_numbers<[1], [0], [0], [1], [0, 0, 1, 1], [], []>} : vector<80x84xf32>, vector<84x80xf32>, vector<80x80xf32> -> vector<80x80xf32>
    %119 = arith.addf %109, %118 : vector<80x80xf32>
    %c0_104 = arith.constant 0 : index
    %c0_105 = arith.constant 0 : index
    %120 = vector.load %arg5[%c0_104, %c0_105] : memref<1x80xf32, #tpu.memory_space<vmem>>, vector<1x80xf32>
    %121 = vector.broadcast %120 : vector<1x80xf32> to vector<80x80xf32>
    %122 = arith.addf %115, %121 : vector<80x80xf32>
    %123 = vector.broadcast %120 : vector<1x80xf32> to vector<80x80xf32>
    %124 = arith.addf %119, %123 : vector<80x80xf32>
    %125 = arith.maximumf %122, %124 : vector<80x80xf32>
    %cst_106 = arith.constant 0.000000e+00 : f32
    %126 = vector.broadcast %cst_106 : f32 to vector<80x80xf32>
    %127 = arith.maximumf %125, %126 : vector<80x80xf32>
    %128 = vector.shape_cast %127 : vector<80x80xf32> to vector<40x2x80xf32>
    %129 = vector.extract_strided_slice %128 {offsets = [0, 0, 0], sizes = [40, 1, 80], strides = [1, 1, 1]} : vector<40x2x80xf32> to vector<40x1x80xf32>
    %130 = vector.shape_cast %129 : vector<40x1x80xf32> to vector<40x80xf32>
    %131 = vector.extract_strided_slice %128 {offsets = [0, 1, 0], sizes = [40, 1, 80], strides = [1, 1, 1]} : vector<40x2x80xf32> to vector<40x1x80xf32>
    %132 = vector.shape_cast %131 : vector<40x1x80xf32> to vector<40x80xf32>
    %133 = arith.maximumf %130, %132 : vector<40x80xf32>
    %134 = vector.shape_cast %133 : vector<40x80xf32> to vector<8x5x80xf32>
    %cst_107 = arith.constant 0.000000e+00 : f32
    %135 = vector.broadcast %cst_107 : f32 to vector<8x128xf32>
    %136 = vector.extract_strided_slice %134 {offsets = [0, 0, 0], sizes = [8, 1, 80], strides = [1, 1, 1]} : vector<8x5x80xf32> to vector<8x1x80xf32>
    %137 = vector.shape_cast %136 : vector<8x1x80xf32> to vector<8x80xf32>
    %c0_108 = arith.constant 0 : index
    %c0_109 = arith.constant 0 : index
    %c0_110 = arith.constant 0 : index
    %138 = vector.load %arg6[%c0_108, %c0_109, %c0_110] : memref<5x80x128xf32, #tpu.memory_space<vmem>>, vector<1x80x128xf32>
    %139 = vector.shape_cast %138 : vector<1x80x128xf32> to vector<80x128xf32>
    %cst_111 = arith.constant dense<0.000000e+00> : vector<8x128xf32>
    %140 = tpu.matmul %137, %139, %cst_111 {dimension_numbers = #tpu.dot_dimension_numbers<[1], [0], [0], [1], [0, 0, 1, 1], [], []>} : vector<8x80xf32>, vector<80x128xf32>, vector<8x128xf32> -> vector<8x128xf32>
    %141 = arith.addf %135, %140 : vector<8x128xf32>
    %142 = vector.extract_strided_slice %134 {offsets = [0, 1, 0], sizes = [8, 1, 80], strides = [1, 1, 1]} : vector<8x5x80xf32> to vector<8x1x80xf32>
    %143 = vector.shape_cast %142 : vector<8x1x80xf32> to vector<8x80xf32>
    %c1_112 = arith.constant 1 : index
    %c0_113 = arith.constant 0 : index
    %c0_114 = arith.constant 0 : index
    %144 = vector.load %arg6[%c1_112, %c0_113, %c0_114] : memref<5x80x128xf32, #tpu.memory_space<vmem>>, vector<1x80x128xf32>
    %145 = vector.shape_cast %144 : vector<1x80x128xf32> to vector<80x128xf32>
    %cst_115 = arith.constant dense<0.000000e+00> : vector<8x128xf32>
    %146 = tpu.matmul %143, %145, %cst_115 {dimension_numbers = #tpu.dot_dimension_numbers<[1], [0], [0], [1], [0, 0, 1, 1], [], []>} : vector<8x80xf32>, vector<80x128xf32>, vector<8x128xf32> -> vector<8x128xf32>
    %147 = arith.addf %141, %146 : vector<8x128xf32>
    %148 = vector.extract_strided_slice %134 {offsets = [0, 2, 0], sizes = [8, 1, 80], strides = [1, 1, 1]} : vector<8x5x80xf32> to vector<8x1x80xf32>
    %149 = vector.shape_cast %148 : vector<8x1x80xf32> to vector<8x80xf32>
    %c2_116 = arith.constant 2 : index
    %c0_117 = arith.constant 0 : index
    %c0_118 = arith.constant 0 : index
    %150 = vector.load %arg6[%c2_116, %c0_117, %c0_118] : memref<5x80x128xf32, #tpu.memory_space<vmem>>, vector<1x80x128xf32>
    %151 = vector.shape_cast %150 : vector<1x80x128xf32> to vector<80x128xf32>
    %cst_119 = arith.constant dense<0.000000e+00> : vector<8x128xf32>
    %152 = tpu.matmul %149, %151, %cst_119 {dimension_numbers = #tpu.dot_dimension_numbers<[1], [0], [0], [1], [0, 0, 1, 1], [], []>} : vector<8x80xf32>, vector<80x128xf32>, vector<8x128xf32> -> vector<8x128xf32>
    %153 = arith.addf %147, %152 : vector<8x128xf32>
    %154 = vector.extract_strided_slice %134 {offsets = [0, 3, 0], sizes = [8, 1, 80], strides = [1, 1, 1]} : vector<8x5x80xf32> to vector<8x1x80xf32>
    %155 = vector.shape_cast %154 : vector<8x1x80xf32> to vector<8x80xf32>
    %c3_120 = arith.constant 3 : index
    %c0_121 = arith.constant 0 : index
    %c0_122 = arith.constant 0 : index
    %156 = vector.load %arg6[%c3_120, %c0_121, %c0_122] : memref<5x80x128xf32, #tpu.memory_space<vmem>>, vector<1x80x128xf32>
    %157 = vector.shape_cast %156 : vector<1x80x128xf32> to vector<80x128xf32>
    %cst_123 = arith.constant dense<0.000000e+00> : vector<8x128xf32>
    %158 = tpu.matmul %155, %157, %cst_123 {dimension_numbers = #tpu.dot_dimension_numbers<[1], [0], [0], [1], [0, 0, 1, 1], [], []>} : vector<8x80xf32>, vector<80x128xf32>, vector<8x128xf32> -> vector<8x128xf32>
    %159 = arith.addf %153, %158 : vector<8x128xf32>
    %160 = vector.extract_strided_slice %134 {offsets = [0, 4, 0], sizes = [8, 1, 80], strides = [1, 1, 1]} : vector<8x5x80xf32> to vector<8x1x80xf32>
    %161 = vector.shape_cast %160 : vector<8x1x80xf32> to vector<8x80xf32>
    %c4_124 = arith.constant 4 : index
    %c0_125 = arith.constant 0 : index
    %c0_126 = arith.constant 0 : index
    %162 = vector.load %arg6[%c4_124, %c0_125, %c0_126] : memref<5x80x128xf32, #tpu.memory_space<vmem>>, vector<1x80x128xf32>
    %163 = vector.shape_cast %162 : vector<1x80x128xf32> to vector<80x128xf32>
    %cst_127 = arith.constant dense<0.000000e+00> : vector<8x128xf32>
    %164 = tpu.matmul %161, %163, %cst_127 {dimension_numbers = #tpu.dot_dimension_numbers<[1], [0], [0], [1], [0, 0, 1, 1], [], []>} : vector<8x80xf32>, vector<80x128xf32>, vector<8x128xf32> -> vector<8x128xf32>
    %165 = arith.addf %159, %164 : vector<8x128xf32>
    %c0_128 = arith.constant 0 : index
    %c0_129 = arith.constant 0 : index
    %166 = vector.load %arg7[%c0_128, %c0_129] : memref<1x128xf32, #tpu.memory_space<vmem>>, vector<1x128xf32>
    %167 = vector.broadcast %166 : vector<1x128xf32> to vector<8x128xf32>
    %168 = arith.addf %165, %167 : vector<8x128xf32>
    %cst_130 = arith.constant 0.000000e+00 : f32
    %169 = vector.broadcast %cst_130 : f32 to vector<8x128xf32>
    %170 = arith.maximumf %168, %169 : vector<8x128xf32>
    %c0_131 = arith.constant 0 : index
    %c0_132 = arith.constant 0 : index
    %171 = vector.load %arg8[%c0_131, %c0_132] : memref<128x128xf32, #tpu.memory_space<vmem>>, vector<128x128xf32>
    %cst_133 = arith.constant dense<0.000000e+00> : vector<8x128xf32>
    %172 = tpu.matmul %170, %171, %cst_133 {dimension_numbers = #tpu.dot_dimension_numbers<[1], [0], [0], [1], [0, 0, 1, 1], [], []>} : vector<8x128xf32>, vector<128x128xf32>, vector<8x128xf32> -> vector<8x128xf32>
    %c0_134 = arith.constant 0 : index
    %c0_135 = arith.constant 0 : index
    %173 = vector.load %arg9[%c0_134, %c0_135] : memref<1x128xf32, #tpu.memory_space<vmem>>, vector<1x128xf32>
    %174 = vector.broadcast %173 : vector<1x128xf32> to vector<8x128xf32>
    %175 = arith.addf %172, %174 : vector<8x128xf32>
    %cst_136 = arith.constant 0.000000e+00 : f32
    %176 = vector.broadcast %cst_136 : f32 to vector<8x128xf32>
    %177 = arith.maximumf %175, %176 : vector<8x128xf32>
    %c0_137 = arith.constant 0 : index
    %c0_138 = arith.constant 0 : index
    %178 = vector.load %arg10[%c0_137, %c0_138] : memref<128x128xf32, #tpu.memory_space<vmem>>, vector<128x128xf32>
    %cst_139 = arith.constant dense<0.000000e+00> : vector<8x128xf32>
    %179 = tpu.matmul %177, %178, %cst_139 {dimension_numbers = #tpu.dot_dimension_numbers<[1], [0], [0], [1], [0, 0, 1, 1], [], []>} : vector<8x128xf32>, vector<128x128xf32>, vector<8x128xf32> -> vector<8x128xf32>
    %c0_140 = arith.constant 0 : index
    %c0_141 = arith.constant 0 : index
    %180 = vector.load %arg11[%c0_140, %c0_141] : memref<1x128xf32, #tpu.memory_space<vmem>>, vector<1x128xf32>
    %181 = vector.broadcast %180 : vector<1x128xf32> to vector<8x128xf32>
    %182 = arith.addf %179, %181 : vector<8x128xf32>
    %c0_142 = arith.constant 0 : index
    %c0_143 = arith.constant 0 : index
    %183 = vector.load %arg12[%c0_142, %c0_143] : memref<8x128xf32, #tpu.memory_space<vmem>>, vector<8x128xf32>
    tpu.vector_store %arg12[%c0_142, %c0_143], %182 {strides = array<i32>} : memref<8x128xf32, #tpu.memory_space<vmem>>, vector<8x128xf32>,
    return
  }
  func.func @transform_0(%arg0: i32) -> (i32, i32, i32) {
    %c0_i32 = arith.constant 0 : i32
    %c0_i32_0 = arith.constant 0 : i32
    %c0_i32_1 = arith.constant 0 : i32
    return %arg0, %c0_i32, %c0_i32_0 : i32, i32, i32
  }
  func.func @transform_1(%arg0: i32) -> (i32, i32, i32, i32) {
    %c0_i32 = arith.constant 0 : i32
    %c0_i32_0 = arith.constant 0 : i32
    %c0_i32_1 = arith.constant 0 : i32
    %c0_i32_2 = arith.constant 0 : i32
    %c0_i32_3 = arith.constant 0 : i32
    return %c0_i32, %c0_i32_0, %c0_i32_1, %c0_i32_2 : i32, i32, i32, i32
  }
  func.func @transform_2(%arg0: i32) -> (i32, i32) {
    %c0_i32 = arith.constant 0 : i32
    %c0_i32_0 = arith.constant 0 : i32
    %c0_i32_1 = arith.constant 0 : i32
    return %c0_i32, %c0_i32_0 : i32, i32
  }
  func.func @transform_3(%arg0: i32) -> (i32, i32, i32, i32) {
    %c0_i32 = arith.constant 0 : i32
    %c0_i32_0 = arith.constant 0 : i32
    %c0_i32_1 = arith.constant 0 : i32
    %c0_i32_2 = arith.constant 0 : i32
    %c0_i32_3 = arith.constant 0 : i32
    return %c0_i32, %c0_i32_0, %c0_i32_1, %c0_i32_2 : i32, i32, i32, i32
  }
  func.func @transform_4(%arg0: i32) -> (i32, i32) {
    %c0_i32 = arith.constant 0 : i32
    %c0_i32_0 = arith.constant 0 : i32
    %c0_i32_1 = arith.constant 0 : i32
    return %c0_i32, %c0_i32_0 : i32, i32
  }
  func.func @transform_5(%arg0: i32) -> (i32, i32, i32) {
    %c0_i32 = arith.constant 0 : i32
    %c0_i32_0 = arith.constant 0 : i32
    %c0_i32_1 = arith.constant 0 : i32
    %c0_i32_2 = arith.constant 0 : i32
    return %c0_i32, %c0_i32_0, %c0_i32_1 : i32, i32, i32
  }
  func.func @transform_6(%arg0: i32) -> (i32, i32) {
    %c0_i32 = arith.constant 0 : i32
    %c0_i32_0 = arith.constant 0 : i32
    %c0_i32_1 = arith.constant 0 : i32
    return %c0_i32, %c0_i32_0 : i32, i32
  }
  func.func @transform_7(%arg0: i32) -> (i32, i32) {
    %c0_i32 = arith.constant 0 : i32
    %c0_i32_0 = arith.constant 0 : i32
    %c0_i32_1 = arith.constant 0 : i32
    return %c0_i32, %c0_i32_0 : i32, i32
  }
  func.func @transform_8(%arg0: i32) -> (i32, i32) {
    %c0_i32 = arith.constant 0 : i32
    %c0_i32_0 = arith.constant 0 : i32
    %c0_i32_1 = arith.constant 0 : i32
    return %c0_i32, %c0_i32_0 : i32, i32
  }
  func.func @transform_9(%arg0: i32) -> (i32, i32) {
    %c0_i32 = arith.constant 0 : i32
    %c0_i32_0 = arith.constant 0 : i32
    %c0_i32_1 = arith.constant 0 : i32
    return %c0_i32, %c0_i32_0 : i32, i32
  }
  func.func @transform_10(%arg0: i32) -> (i32, i32) {
    %c0_i32 = arith.constant 0 : i32
    %c0_i32_0 = arith.constant 0 : i32
    %c0_i32_1 = arith.constant 0 : i32
    return %c0_i32, %c0_i32_0 : i32, i32
  }
  func.func @transform_11(%arg0: i32) -> (i32, i32) {
    %c0_i32 = arith.constant 0 : i32
    %c0_i32_0 = arith.constant 0 : i32
    return %arg0, %c0_i32 : i32, i32
  }
}

</mosaic_0001>

<bundles_post_ra>
// kernel: lenet_forward.1
= control target key start
LH: loop header
LB: loop body
LE: loop exit
PB: predicated region body
PF: predicated region fallthrough
CT: control target
= control target key end

     0   :  { %vm143_vm0 = vcmask 1042432   ;;  %vm144_vm1 = vcmask 1046532   ;;  %vm355_vm2 = vcmask 261120   ;;  %vm1321_vm4 = vcmask 1041408   ;;  %s15773_s1 = inlined_call_operand.vmem [shape: f32[5,2,32,84], index: 1, kind: input, shape index: {}]   ;;  %s15774_s0 = inlined_call_operand.vmem [shape: f32[8,32,32], index: 0, kind: input, shape index: {}]   ;;  %s15775_s3 = inlined_call_operand.vmem [shape: f32[5,2,84,80], index: 3, kind: input, shape index: {}]   ;;  %s15776_s2 = inlined_call_operand.vmem [shape: f32[1,84], index: 2, kind: input, shape index: {}]   ;;  %s15777_s5 = inlined_call_operand.vmem [shape: f32[5,80,128], index: 5, kind: input, shape index: {}]   ;;  %s15778_s4 = inlined_call_operand.vmem [shape: f32[1,80], index: 4, kind: input, shape index: {}]   ;;  %s15779_s7 = inlined_call_operand.vmem [shape: f32[128,128], index: 7, kind: input, shape index: {}]   ;;  %s15780_s9 = inlined_call_operand.vmem [shape: f32[128,128], index: 9, kind: input, shape index: {}]   ;;  %s15781_s6 = inlined_call_operand.vmem [shape: f32[1,128], index: 6, kind: input, shape index: {}]   ;;  %s15782_s8 = inlined_call_operand.vmem [shape: f32[1,128], index: 8, kind: input, shape index: {}]   ;;  %s15783_s10 = inlined_call_operand.vmem [shape: f32[1,128], index: 10, kind: input, shape index: {}]   ;;  %s15784_s11 = inlined_call_operand.vmem [shape: f32[8,128], index: 11, kind: output, shape index: {}]  }
   0x1   :  { %v8212_v0 = vld [vmem:[%s15773_s1 + $0x40] sm:$0xff]  ;;  %v8213_v1 = vld [vmem:[%s15773_s1 + $0x48] sm:$0xff]  ;;  %v8214_v2 = vld [vmem:[%s15773_s1 + $0x50] sm:$0xff]  ;;  %vm1322_vm5 = vcmask 1045508   ;;  %vm2060_vm7 = vcmask 1040384   ;;  %vm2061_vm8 = vcmask 1044484  }
   0x2   :  { %v10629_v3 = vpack.c.bf16 %v8213_v1, %v8212_v0  ;;  %v8215_v4 = vld [vmem:[%s15773_s1 + $0x58] sm:$0xff]  ;;  %v11496_v5 = vld [vmem:[%s15774_s0] sm:$0xff]  ;;  %v11501_v6 = vld [vmem:[%s15774_s0 + $0x8] sm:$0xff]  ;;  %vm5074_vm10 = vcmask 1043456   ;;  %vm4977_vm11 = vcmask 1041409   ;;  %vm4979_vm12 = vcmask 1042434  }
   0x3   :  { %v10633_v7 = vpack.c.bf16 %v8215_v4, %v8214_v2  ;;  %v11505_v8 = vcombine.high %v11496_v5, %v11496_v5  ;;  %v11509_v9 = vcombine.high %v11501_v6, %v11501_v6  ;;  %v8204_v10 = vrot.slane %v11496_v5, 9  ;;  %v11515_v11 = vld [vmem:[%s15774_s0 + $0xd8] sm:$0xff]  ;;  %v11520_v12 = vld [vmem:[%s15774_s0 + $0xe0] sm:$0xff]  ;;  %vm11523_vm3 = vmor %vm143_vm0, %vm144_vm1 }
   0x4   :  { %16009 = vst [vmem:[#allocation4_spill] sm:$0xff] %v11520_v12  ;;  %10630 = vmatprep.subr.bf16.mxu0 %v10629_v3  ;;  %11032 = vmatprep.subr.bf16.mxu1 %v10629_v3  ;;  %v151_v14 = vrot.slane %v11501_v6, 5  ;;  %v11530_v15 = vcombine.high %v11520_v12, %v11520_v12  ;;  %v11534_v16 = vcombine.high %v11515_v11, %v11515_v11  ;;  %v15785_v17 = vrot.slane %v11515_v11, 5  ;;  %v11540_v18 = vld [vmem:[%s15774_s0 + $0x10] sm:$0xff]  ;;  %v11545_v19 = vld [vmem:[%s15774_s0 + $0xe8] sm:$0xff]  ;;  %v8272_v32 = vld [vmem:[%s15773_s1 + $0x60] sm:$0xff] }
   0x5   :  { %16007 = vst [vmem:[#allocation2_spill] sm:$0xff] %v11505_v8  ;;  %16008 = vst [vmem:[#allocation3_spill] sm:$0xff] %v11509_v9  ;;  %10632 = vmatpush3.bf16.msra.mxu0 %v10629_v3  ;;  %11034 = vmatpush3.bf16.msra.mxu1 %v10629_v3  ;;  %v148_v20 = vrot.slane %v11505_v8, 5  ;;  %v8211_v21 = vrot.slane %v11520_v12, 9  ;;  %v154_v22 = vrot.slane %v11509_v9, 5  ;;  %v157_v23 = vrot.slane %v11540_v18, 5 }
   0x6   :  { %16012 = vst [vmem:[#allocation5_spill] sm:$0xff] %v11530_v15  ;;  %16013 = vst [vmem:[#allocation6_spill] sm:$0xff] %v11534_v16  ;;  %10634 = vmatprep.subr.bf16.mxu0 %v10633_v7  ;;  %11033 = vmatprep.subr.bf16.mxu1 %v10633_v7  ;;  %v153_v24 = vrot.slane %v151_v14, 4  ;;  %v297_v25 = vrot.slane %v15785_v17, 4  ;;  %v298_v26 = vrot.slane %v11534_v16, 5  ;;  %v302_v27 = vrot.slane %v11530_v15, 5 }
   0x7   :  { %16014 = vst [vmem:[#allocation7_spill] sm:$0xff] %v11545_v19  ;;  %v149_v28 = vsel %vm11523_vm3, %v8204_v10, %v148_v20  ;;  %v150_v29 = vrot.slane %v148_v20, 4  ;;  %v156_v30 = vrot.slane %v154_v22, 4  ;;  %v11559_v31 = vcombine.high %v11545_v19, %v11545_v19  ;;  %v8273_v33 = vld [vmem:[%s15773_s1 + $0x68] sm:$0xff]  ;;  %v11583_v42 = vld [vmem:[%s15774_s0 + $0x18] sm:$0xff]  ;;  %v11588_v43 = vld [vmem:[%s15774_s0 + $0xf0] sm:$0xff] }
   0x8   :  { %v299_v34 = vsel %vm11523_vm3, %v297_v25, %v298_v26  ;;  %v303_v35 = vsel %vm11523_vm3, %v8211_v21, %v302_v27  ;;  %v304_v36 = vrot.slane %v302_v27, 4  ;;  %v155_v37 = vsel %vm11523_vm3, %v153_v24, %v154_v22  ;;  %16016 = vst [vmem:[#allocation9_spill] sm:$0xff] %v11588_v43  ;;  %v11598_v48 = vld [vmem:[%s15774_s0 + $0x20] sm:$0xff]  ;;  %v11632_v61 = vld [vmem:[%s15774_s0 + $0xf8] sm:$0xff]  ;;  %v8274_v22 = vld [vmem:[%s15773_s1 + $0x70] sm:$0xff] }
   0x9   :  { %16015 = vst [vmem:[#allocation8_spill] sm:$0xff] %v11559_v31  ;;  %10636 = vmatpush3.bf16.msra.mxu0 %v10633_v7  ;;  %11035 = vmatpush3.bf16.msra.mxu1 %v10633_v7  ;;  %v152_v38 = vsel %vm11523_vm3, %v150_v29, %v151_v14  ;;  %v11575_v39 = vcombine.low %v299_v34, %v303_v35  ;;  %v305_v41 = vrot.slane %v11545_v19, 5  ;;  %v308_v46 = vrot.slane %v11559_v31, 5  ;;  %v11661_v24 = vld [vmem:[%s15774_s0 + $0x28] sm:$0xff]  ;;  %v11672_v29 = vld [vmem:[%s15774_s0 + $0x30] sm:$0xff]  ;;  %v8200_v35 = vld [vmem:[%s15773_s1 + $0x20] sm:$0xff] }
   0xa   :  { %v158_v40 = vsel %vm11523_vm3, %v156_v30, %v157_v23  ;;  %v11590_v44 = vcombine.low %v149_v28, %v152_v38  ;;  %v10645_v47 = vpack.c.bf16 %v8273_v33, %v8272_v32  ;;  %v11606_v51 = vcombine.high %v11540_v18, %v11540_v18  ;;  %16020 = vst [vmem:[#allocation13_spill] sm:$0xff] %v11632_v61  ;;  %v8202_v12 = vld [vmem:[%s15773_s1 + $0x30] sm:$0xff]  ;;  %vm12241_vm6 = vmor %vm1321_vm4, %vm1322_vm5 }
   0xb   :  { %v11592_v45 = vcombine.low %v155_v37, %v158_v40  ;;  %9618 = vmatprep.mubr.msk.f32.mxu1 %vm355_vm2, %v11575_v39  ;;  %v306_v49 = vsel %vm11523_vm3, %v304_v36, %v305_v41  ;;  %v307_v50 = vrot.slane %v305_v41, 4  ;;  %v159_v52 = vrot.slane %v157_v23, 4  ;;  %v8275_v23 = vld [vmem:[%s15773_s1 + $0x78] sm:$0xff]  ;;  %v8201_v36 = vld [vmem:[%s15773_s1 + $0x28] sm:$0xff]  ;;  %v8342_v13 = vld [vmem:[%s15773_s1 + $0x90] sm:$0xff] }
   0xc   :  { %16017 = vst [vmem:[#allocation10_spill] sm:$0xff] %v11606_v51  ;;  %9582 = vmatprep.mubr.msk.f32.mxu0 %vm355_vm2, %v11590_v44  ;;  %10646 = vmatprep.subr.bf16.mxu1 %v10645_v47  ;;  %v163_v53 = vrot.slane %v11583_v42, 5  ;;  %v11613_v54 = vcombine.high %v11588_v43, %v11588_v43  ;;  %v310_v55 = vrot.slane %v308_v46, 4  ;;  %v311_v56 = vrot.slane %v11588_v43, 5  ;;  %v11689_v37 = vld [vmem:[%s15774_s0 + $0x38] sm:$0xff]  ;;  %vm12663_vm9 = vmor %vm2060_vm7, %vm2061_vm8 }
   0xd   :  { %9583 = vmatmul.mubr.msk.f32.vlgmr.msra.gmra.mrb[0].mxu0 %vm355_vm2, %v11592_v45  ;;  %v309_v57 = vsel %vm11523_vm3, %v307_v50, %v308_v46  ;;  %v160_v58 = vrot.slane %v11606_v51, 5  ;;  %v11623_v59 = vcombine.high %v11598_v48, %v11598_v48  ;;  %v11627_v60 = vcombine.high %v11583_v42, %v11583_v42 }
   0xe   :  { %16018 = vst [vmem:[#allocation11_spill] sm:$0xff] %v11613_v54  ;;  %v11634_v62 = vcombine.low %v306_v49, %v309_v57  ;;  %v312_v63 = vsel %vm11523_vm3, %v310_v55, %v311_v56  ;;  %v313_v0 = vrot.slane %v311_v56, 4  ;;  %v314_v1 = vrot.slane %v11613_v54, 5 }
   0xf   :  { %16019 = vst [vmem:[#allocation12_spill] sm:$0xff] %v11627_v60  ;;  %v161_v2 = vsel %vm11523_vm3, %v159_v52, %v160_v58  ;;  %v162_v3 = vrot.slane %v160_v58, 4  ;;  %v165_v4 = vrot.slane %v163_v53, 4  ;;  %v166_v7 = vrot.slane %v11627_v60, 5  ;;  %v11719_v58 = vld [vmem:[%s15774_s0 + $0x40] sm:$0xff] }
  0x10   :  { %9619 = vmatmul.mubr.msk.f32.vlgmr.msra.gmra.mrb[0].mxu1 %vm355_vm2, %v11634_v62  ;;  %v315_v10 = vsel %vm11523_vm3, %v313_v0, %v314_v1  ;;  %v8205_v14 = vrot.slane %v11598_v48, 9  ;;  %v170_v20 = vrot.slane %v11623_v59, 5  ;;  %v11650_v21 = vcombine.high %v11632_v61, %v11632_v61 }
  0x11   :  { %10648 = vmatpush3.bf16.msra.mxu1 %v10645_v47  ;;  %v164_v25 = vsel %vm11523_vm3, %v162_v3, %v163_v53  ;;  %v11665_v26 = vcombine.low %v312_v63, %v315_v10  ;;  %v167_v27 = vsel %vm11523_vm3, %v165_v4, %v166_v7  ;;  %v316_v28 = vrot.slane %v314_v1, 4 }
  0x12   :  { %16021 = vst [vmem:[#allocation14_spill] sm:$0xff] %v11650_v21  ;;  %v11674_v30 = vcombine.low %v161_v2, %v164_v25  ;;  %v171_v32 = vsel %vm11523_vm3, %v8205_v14, %v170_v20  ;;  %v317_v33 = vrot.slane %v11632_v61, 5  ;;  %v320_v34 = vrot.slane %v11650_v21, 5 }
  0x13   :  { %9621 = vmatprep.mubr.msk.f32.mxu1 %vm355_vm2, %v11665_v26  ;;  %v11693_v38 = vcombine.low %v167_v27, %v171_v32  ;;  %v10649_v40 = vpack.c.bf16 %v8275_v23, %v8274_v22  ;;  %v11697_v41 = vcombine.high %v11661_v24, %v11661_v24  ;;  %v172_v46 = vrot.slane %v170_v20, 4  ;;  %v11735_v23 = vld [vmem:[%s15774_s0 + $0x48] sm:$0xff] }
  0x14   :  { %9585 = vmatprep.mubr.msk.f32.mxu0 %vm355_vm2, %v11674_v30  ;;  %v318_v47 = vsel %vm11523_vm3, %v316_v28, %v317_v33  ;;  %v319_v49 = vrot.slane %v317_v33, 4  ;;  %v173_v50 = vrot.slane %v11661_v24, 5  ;;  %v11706_v52 = vcombine.high %v11672_v29, %v11672_v29 }
  0x15   :  { %16022 = vst [vmem:[#allocation15_spill] sm:$0xff] %v11697_v41  ;;  %9586 = vmatmul.mubr.msk.f32.gmra.mrb[2].mxu0 %vm355_vm2, %v11693_v38  ;;  %10650 = vmatprep.subr.bf16.mxu1 %v10649_v40  ;;  %v176_v53 = vrot.slane %v11697_v41, 5  ;;  %v179_v55 = vrot.slane %v11672_v29, 5  ;;  %v10653_v56 = vpack.c.bf16 %v8201_v36, %v8200_v35  ;;  %v11714_v57 = vcombine.high %v11689_v37, %v11689_v37  ;;  %v127_v35 = vld [vmem:[%s15773_s1 + $0x8] sm:$0xff] }
  0x16   :  { %16023 = vst [vmem:[#allocation16_spill] sm:$0xff] %v11706_v52  ;;  %v321_v63 = vsel %vm11523_vm3, %v319_v49, %v320_v34  ;;  %10652 = vmatpush3.bf16.msra.mxu1 %v10649_v40  ;;  %v174_v0 = vsel %vm11523_vm3, %v172_v46, %v173_v50  ;;  %v175_v1 = vrot.slane %v173_v50, 4  ;;  %v182_v2 = vrot.slane %v11706_v52, 5  ;;  %v126_v34 = vld [vmem:[%s15773_s1] sm:$0xff]  ;;  %v11764_v49 = vld [vmem:[%s15774_s0 + $0x50] sm:$0xff] }
  0x17   :  { %16024 = vst [vmem:[#allocation17_spill] sm:$0xff] %v11714_v57  ;;  %v11726_v3 = vcombine.low %v318_v47, %v321_v63  ;;  %v178_v4 = vrot.slane %v176_v53, 4  ;;  %v181_v7 = vrot.slane %v179_v55, 4  ;;  %10654 = vmatprep.subr.bf16.mxu1 %v10653_v56  ;;  %v185_v10 = vrot.slane %v11689_v37, 5  ;;  %v11778_v63 = vld [vmem:[%s15774_s0 + $0x58] sm:$0xff] }
  0x18   :  { %v177_v14 = vsel %vm11523_vm3, %v175_v1, %v176_v53  ;;  %v184_v20 = vrot.slane %v182_v2, 4  ;;  %v188_v22 = vrot.slane %v11714_v57, 5  ;;  %v11739_v25 = vcombine.high %v11719_v58, %v11719_v58 }
  0x19   :  { %9622 = vmatmul.mubr.msk.f32.gmra.mrb[2].mxu1 %vm355_vm2, %v11726_v3  ;;  %v331_v27 = vcombine.low %v174_v0, %v177_v14  ;;  %v180_v28 = vsel %vm11523_vm3, %v178_v4, %v179_v55  ;;  %v183_v32 = vsel %vm11523_vm3, %v181_v7, %v182_v2  ;;  %v187_v33 = vrot.slane %v185_v10, 4  ;;  %v11783_v0 = vld [vmem:[%s15774_s0 + $0x60] sm:$0xff] }
  0x1a   :  { %16025 = vst [vmem:[#allocation18_spill] sm:$0xff] %v11739_v25  ;;  %9682 = vmatprep.mubr.msk.f32.mxu1 %vm355_vm2, %v11590_v44  ;;  %v11755_v36 = vcombine.low %v180_v28, %v183_v32  ;;  %v186_v40 = vsel %vm11523_vm3, %v184_v20, %v185_v10  ;;  %v8206_v46 = vrot.slane %v11719_v58, 9  ;;  %v192_v47 = vrot.slane %v11739_v25, 5 }
  0x1b   :  { %9588 = vmatprep.mubr.msk.f32.mxu0 %vm355_vm2, %v331_v27  ;;  %v189_v50 = vsel %vm11523_vm3, %v187_v33, %v188_v22  ;;  %v195_v44 = vrot.slane %v11735_v23, 5  ;;  %v11772_v53 = vcombine.high %v11735_v23, %v11735_v23  ;;  %v201_v55 = vrot.slane %v11764_v49, 5 }
  0x1c   :  { %9589 = vmatmul.mubr.msk.f32.gmra.mrb[4].mxu0 %vm355_vm2, %v11755_v36  ;;  %v333_v1 = vcombine.low %v186_v40, %v189_v50  ;;  %v193_v2 = vsel %vm11523_vm3, %v8206_v46, %v192_v47  ;;  %v194_v4 = vrot.slane %v192_v47, 4  ;;  %v10637_v7 = vpack.c.bf16 %v127_v35, %v126_v34  ;;  %v11811_v34 = vld [vmem:[%s15774_s0 + $0x68] sm:$0xff] }
  0x1d   :  { %16026 = vst [vmem:[#allocation19_spill] sm:$0xff] %v11772_v53  ;;  %9683 = vmatmul.mubr.msk.f32.vlgmr.msra.gmra.mrb[4].mxu1 %vm355_vm2, %v11592_v45  ;;  %v197_v10 = vrot.slane %v195_v44, 4  ;;  %v198_v14 = vrot.slane %v11772_v53, 5  ;;  %v11794_v20 = vcombine.high %v11764_v49, %v11764_v49  ;;  %v203_v22 = vrot.slane %v201_v55, 4 }
  0x1e   :  { %10656 = vmatpush3.bf16.msra.mxu1 %v10653_v56  ;;  %9591 = vmatprep.mubr.msk.f32.mxu0 %vm355_vm2, %v333_v1  ;;  %v196_v28 = vsel %vm11523_vm3, %v194_v4, %v195_v44  ;;  %v207_v32 = vrot.slane %v11778_v63, 5  ;;  %v11802_v33 = vcombine.high %v11783_v0, %v11783_v0  ;;  %v11806_v45 = vcombine.high %v11778_v63, %v11778_v63 }
  0x1f   :  { %16027 = vst [vmem:[#allocation20_spill] sm:$0xff] %v11794_v20  ;;  %9685 = vmatprep.mubr.msk.f32.mxu1 %vm355_vm2, %v11674_v30  ;;  %v334_v56 = vcombine.low %v193_v2, %v196_v28  ;;  %v199_v35 = vsel %vm11523_vm3, %v197_v10, %v198_v14  ;;  %v200_v40 = vrot.slane %v198_v14, 4  ;;  %10638 = vmatprep.subr.bf16.mxu0 %v10637_v7  ;;  %v204_v46 = vrot.slane %v11794_v20, 5  ;;  %v11835_v14 = vld [vmem:[%s15774_s0 + $0x70] sm:$0xff] }
  0x20   :  { %16028 = vst [vmem:[#allocation21_spill] sm:$0xff] %v11806_v45  ;;  %10640 = vmatpush3.bf16.msra.mxu0 %v10637_v7  ;;  %v209_v47 = vrot.slane %v207_v32, 4  ;;  %v210_v50 = vrot.slane %v11806_v45, 5  ;;  %v8207_v44 = vrot.slane %v11783_v0, 9  ;;  %v214_v4 = vrot.slane %v11802_v33, 5  ;;  %v11893_v45 = vld [vmem:[%s15774_s0 + $0x90] sm:$0xff] }
  0x21   :  { %9592 = vmatmul.mubr.msk.f32.gmra.mrb[6].mxu0 %vm355_vm2, %v334_v56  ;;  %9686 = vmatmul.mubr.msk.f32.gmra.mrb[6].mxu1 %vm355_vm2, %v11693_v38  ;;  %v202_v30 = vsel %vm11523_vm3, %v200_v40, %v201_v55  ;;  %v205_v2 = vsel %vm11523_vm3, %v203_v22, %v204_v46  ;;  %v206_v10 = vrot.slane %v204_v46, 4  ;;  %v11830_v7 = vcombine.high %v11811_v34, %v11811_v34  ;;  %v11840_v38 = vld [vmem:[%s15774_s0 + $0x78] sm:$0xff] }
  0x22   :  { %v335_v28 = vcombine.low %v199_v35, %v202_v30  ;;  %9688 = vmatprep.mubr.msk.f32.mxu1 %vm355_vm2, %v331_v27  ;;  %v211_v55 = vsel %vm11523_vm3, %v209_v47, %v210_v50  ;;  %v215_v22 = vsel %vm11523_vm3, %v8207_v44, %v214_v4  ;;  %v216_v40 = vrot.slane %v214_v4, 4  ;;  %v11854_v35 = vld [vmem:[%s15774_s0 + $0x80] sm:$0xff]  ;;  %16030 = vst [vmem:[#allocation23_spill] sm:$0xff] %v11893_v45 }
  0x23   :  { %v208_v46 = vsel %vm11523_vm3, %v206_v10, %v207_v32  ;;  %v337_v17 = vcombine.low %v211_v55, %v215_v22  ;;  %v217_v21 = vrot.slane %v11811_v34, 5  ;;  %v220_v16 = vrot.slane %v11830_v7, 5 }
  0x24   :  { %9594 = vmatprep.mubr.msk.f32.mxu0 %vm355_vm2, %v335_v28  ;;  %v336_v27 = vcombine.low %v205_v2, %v208_v46  ;;  %v11859_v47 = vcombine.high %v11835_v14, %v11835_v14  ;;  %v223_v50 = vrot.slane %v11835_v14, 5  ;;  %v11864_v32 = vcombine.high %v11840_v38, %v11840_v38 }
  0x25   :  { %9689 = vmatmul.mubr.msk.f32.gmra.mrb[8].mxu1 %vm355_vm2, %v11755_v36  ;;  %v218_v44 = vsel %vm11523_vm3, %v216_v40, %v217_v21  ;;  %v219_v4 = vrot.slane %v217_v21, 4  ;;  %v222_v30 = vrot.slane %v220_v16, 4  ;;  %v229_v2 = vrot.slane %v11840_v38, 5  ;;  %v11878_v36 = vld [vmem:[%s15774_s0 + $0x88] sm:$0xff] }
  0x26   :  { %16029 = vst [vmem:[#allocation22_spill] sm:$0xff] %v11864_v32  ;;  %9595 = vmatmul.mubr.msk.f32.gmra.mrb[8].mxu0 %vm355_vm2, %v336_v27  ;;  %9691 = vmatprep.mubr.msk.f32.mxu1 %vm355_vm2, %v333_v1  ;;  %v225_v10 = vrot.slane %v223_v50, 4  ;;  %v226_v55 = vrot.slane %v11859_v47, 5  ;;  %v232_v22 = vrot.slane %v11864_v32, 5  ;;  %v11882_v21 = vcombine.high %v11854_v35, %v11854_v35 }
  0x27   :  { %9597 = vmatprep.mubr.msk.f32.mxu0 %vm355_vm2, %v337_v17  ;;  %v221_v40 = vsel %vm11523_vm3, %v219_v4, %v220_v16  ;;  %v224_v1 = vsel %vm11523_vm3, %v222_v30, %v223_v50  ;;  %v231_v46 = vrot.slane %v229_v2, 4  ;;  %v8208_v32 = vrot.slane %v11854_v35, 9 }
  0x28   :  { %v338_v57 = vcombine.low %v218_v44, %v221_v40  ;;  %v227_v54 = vsel %vm11523_vm3, %v225_v10, %v226_v55  ;;  %v228_v61 = vrot.slane %v226_v55, 4  ;;  %v236_v60 = vrot.slane %v11882_v21, 5  ;;  %v11909_v44 = vld [vmem:[%s15774_s0 + $0x98] sm:$0xff]  ;;  %v11914_v10 = vld [vmem:[%s15774_s0 + $0xa0] sm:$0xff] }
  0x29   :  { %9692 = vmatmul.mubr.msk.f32.gmra.mrb[10].mxu1 %vm355_vm2, %v334_v56  ;;  %v339_v16 = vcombine.low %v224_v1, %v227_v54  ;;  %v233_v50 = vsel %vm11523_vm3, %v231_v46, %v232_v22  ;;  %v239_v4 = vrot.slane %v11878_v36, 5  ;;  %v11904_v30 = vcombine.high %v11878_v36, %v11878_v36  ;;  %16031 = vst [vmem:[#allocation24_spill] sm:$0xff] %v11909_v44 }
  0x2a   :  { %16032 = vst [vmem:[#allocation25_spill] sm:$0xff] %v11914_v10  ;;  %9598 = vmatmul.mubr.msk.f32.gmra.mrb[10].mxu0 %vm355_vm2, %v338_v57  ;;  %9694 = vmatprep.mubr.msk.f32.mxu1 %vm355_vm2, %v335_v28  ;;  %v230_v54 = vsel %vm11523_vm3, %v228_v61, %v229_v2  ;;  %v237_v56 = vsel %vm11523_vm3, %v8208_v32, %v236_v60  ;;  %v238_v55 = vrot.slane %v236_v60, 4  ;;  %v245_v22 = vrot.slane %v11893_v45, 5  ;;  %v11939_v32 = vld [vmem:[%s15774_s0 + $0xa8] sm:$0xff] }
  0x2b   :  { %9600 = vmatprep.mubr.msk.f32.mxu0 %vm355_vm2, %v339_v16  ;;  %v340_v40 = vcombine.low %v230_v54, %v233_v50  ;;  %v241_v1 = vrot.slane %v239_v4, 4  ;;  %v242_v46 = vrot.slane %v11904_v30, 5  ;;  %v11927_v31 = vcombine.high %v11893_v45, %v11893_v45 }
  0x2c   :  { %v240_v28 = vsel %vm11523_vm3, %v238_v55, %v239_v4  ;;  %v247_v61 = vrot.slane %v245_v22, 4  ;;  %v251_v2 = vrot.slane %v11909_v44, 5  ;;  %v11934_v60 = vcombine.high %v11914_v10, %v11914_v10 }
  0x2d   :  { %16033 = vst [vmem:[#allocation26_spill] sm:$0xff] %v11927_v31  ;;  %9695 = vmatmul.mubr.msk.f32.gmra.mrb[12].mxu1 %vm355_vm2, %v336_v27  ;;  %v341_v50 = vcombine.low %v237_v56, %v240_v28  ;;  %v243_v54 = vsel %vm11523_vm3, %v241_v1, %v242_v46  ;;  %v244_v43 = vrot.slane %v242_v46, 4  ;;  %v248_v4 = vrot.slane %v11927_v31, 5  ;;  %v11956_v56 = vld [vmem:[%s15774_s0 + $0xb0] sm:$0xff] }
  0x2e   :  { %16034 = vst [vmem:[#allocation27_spill] sm:$0xff] %v11934_v60  ;;  %9601 = vmatmul.mubr.msk.f32.gmra.mrb[12].mxu0 %vm355_vm2, %v340_v40  ;;  %9697 = vmatprep.mubr.msk.f32.mxu1 %vm355_vm2, %v337_v17  ;;  %v11949_v55 = vcombine.high %v11909_v44, %v11909_v44  ;;  %v253_v15 = vrot.slane %v251_v2, 4  ;;  %v8209_v19 = vrot.slane %v11914_v10, 9  ;;  %v258_v27 = vrot.slane %v11934_v60, 5  ;;  %16036 = vst [vmem:[#allocation29_spill] sm:$0xff] %v11956_v56  ;;  %v8203_v60 = vld [vmem:[%s15773_s1 + $0x38] sm:$0xff] }
  0x2f   :  { %9603 = vmatprep.mubr.msk.f32.mxu0 %vm355_vm2, %v341_v50  ;;  %v246_v1 = vsel %vm11523_vm3, %v244_v43, %v245_v22  ;;  %v249_v17 = vsel %vm11523_vm3, %v247_v61, %v248_v4  ;;  %v250_v46 = vrot.slane %v248_v4, 4  ;;  %v11965_v28 = vcombine.high %v11939_v32, %v11939_v32 }
  0x30   :  { %16035 = vst [vmem:[#allocation28_spill] sm:$0xff] %v11949_v55  ;;  %v342_v44 = vcombine.low %v243_v54, %v246_v1  ;;  %v254_v10 = vrot.slane %v11949_v55, 5  ;;  %v259_v43 = vsel %vm11523_vm3, %v8209_v19, %v258_v27  ;;  %v260_v22 = vrot.slane %v258_v27, 4  ;;  %v11988_v54 = vld [vmem:[%s15774_s0 + $0xb8] sm:$0xff]  ;;  %v128_v1 = vld [vmem:[%s15773_s1 + $0x10] sm:$0xff] }
  0x31   :  { %16037 = vst [vmem:[#allocation30_spill] sm:$0xff] %v11965_v28  ;;  %9698 = vmatmul.mubr.msk.f32.gmra.mrb[14].mxu1 %vm355_vm2, %v338_v57  ;;  %v252_v61 = vsel %vm11523_vm3, %v250_v46, %v251_v2  ;;  %v261_v4 = vrot.slane %v11939_v32, 5  ;;  %v264_v45 = vrot.slane %v11965_v28, 5  ;;  %v11983_v31 = vcombine.high %v11956_v56, %v11956_v56  ;;  %16039 = vst [vmem:[#allocation32_spill] sm:$0xff] %v11988_v54  ;;  %v129_v46 = vld [vmem:[%s15773_s1 + $0x18] sm:$0xff] }
  0x32   :  { %9604 = vmatmul.mubr.msk.f32.gmra.mrb[14].mxu0 %vm355_vm2, %v342_v44  ;;  %v343_v19 = vcombine.low %v249_v17, %v252_v61  ;;  %9700 = vmatprep.mubr.msk.f32.mxu1 %vm355_vm2, %v339_v16  ;;  %v255_v57 = vsel %vm11523_vm3, %v253_v15, %v254_v10  ;;  %v267_v2 = vrot.slane %v11956_v56, 5  ;;  %v10657_v27 = vpack.c.bf16 %v8203_v60, %v8202_v12  ;;  %v12004_v17 = vld [vmem:[%s15774_s0 + $0xc0] sm:$0xff] }
  0x33   :  { %16038 = vst [vmem:[#allocation31_spill] sm:$0xff] %v11983_v31  ;;  %16040 = vst [vmem:[#allocation33_spill] sm:$0xff] %v12004_v17  ;;  %v344_v16 = vcombine.low %v255_v57, %v259_v43  ;;  %v262_v15 = vsel %vm11523_vm3, %v260_v22, %v261_v4  ;;  %v263_v10 = vrot.slane %v261_v4, 4  ;;  %v266_v61 = vrot.slane %v264_v45, 4  ;;  %v12023_v57 = vld [vmem:[%s15774_s0 + $0xc8] sm:$0xff] }
  0x34   :  { %9606 = vmatprep.mubr.msk.f32.mxu0 %vm355_vm2, %v343_v19  ;;  %v269_v12 = vrot.slane %v267_v2, 4  ;;  %v270_v60 = vrot.slane %v11983_v31, 5  ;;  %10658 = vmatprep.subr.bf16.mxu1 %v10657_v27  ;;  %v12012_v55 = vcombine.high %v11988_v54, %v11988_v54  ;;  %v273_v28 = vrot.slane %v11988_v54, 5  ;;  %16042 = vst [vmem:[#allocation35_spill] sm:$0xff] %v12023_v57 }
  0x35   :  { %9701 = vmatmul.mubr.msk.f32.gmra.mrb[16].mxu1 %vm355_vm2, %v340_v40  ;;  %v265_v43 = vsel %vm11523_vm3, %v263_v10, %v264_v45  ;;  %v268_v22 = vsel %vm11523_vm3, %v266_v61, %v267_v2  ;;  %v10641_v4 = vpack.c.bf16 %v129_v46, %v128_v1  ;;  %v12027_v31 = vcombine.high %v12004_v17, %v12004_v17  ;;  %v12036_v1 = vld [vmem:[%s15774_s0 + $0xd0] sm:$0xff] }
  0x36   :  { %16041 = vst [vmem:[#allocation34_spill] sm:$0xff] %v12012_v55  ;;  %9607 = vmatmul.mubr.msk.f32.gmra.mrb[16].mxu0 %vm355_vm2, %v344_v16  ;;  %v345_v54 = vcombine.low %v262_v15, %v265_v43  ;;  %9703 = vmatprep.mubr.msk.f32.mxu1 %vm355_vm2, %v341_v50  ;;  %v271_v45 = vsel %vm11523_vm3, %v269_v12, %v270_v60  ;;  %v272_v40 = vrot.slane %v270_v60, 4  ;;  %v275_v2 = vrot.slane %v273_v28, 4 }
  0x37   :  { %16043 = vst [vmem:[#allocation36_spill] sm:$0xff] %v12027_v31  ;;  %16044 = vst [vmem:[#allocation37_spill] sm:$0xff] %v12036_v1  ;;  %v346_v46 = vcombine.low %v268_v22, %v271_v45  ;;  %10660 = vmatpush3.bf16.msra.mxu1 %v10657_v27  ;;  %v276_v10 = vrot.slane %v12012_v55, 5  ;;  %10642 = vmatprep.subr.bf16.mxu0 %v10641_v4  ;;  %v8210_v61 = vrot.slane %v12004_v17, 9  ;;  %v280_v15 = vrot.slane %v12027_v31, 5 }
  0x38   :  { %9609 = vmatprep.mubr.msk.f32.mxu0 %vm355_vm2, %v345_v54  ;;  %v274_v50 = vsel %vm11523_vm3, %v272_v40, %v273_v28  ;;  %v283_v12 = vrot.slane %v12023_v57, 5  ;;  %10644 = vmatpush3.bf16.msra.mxu0 %v10641_v4  ;;  %v12047_v60 = vcombine.high %v12023_v57, %v12023_v57  ;;  %v289_v27 = vrot.slane %v12036_v1, 5 }
  0x39   :  { %9704 = vmatmul.mubr.msk.f32.gmra.mrb[18].mxu1 %vm355_vm2, %v342_v44  ;;  %v277_v43 = vsel %vm11523_vm3, %v275_v2, %v276_v10  ;;  %v281_v22 = vsel %vm11523_vm3, %v8210_v61, %v280_v15  ;;  %v282_v45 = vrot.slane %v280_v15, 4  ;;  %v12057_v28 = vcombine.high %v12036_v1, %v12036_v1 }
  0x3a   :  { %16045 = vst [vmem:[#allocation38_spill] sm:$0xff] %v12047_v60  ;;  %9610 = vmatmul.mubr.msk.f32.gmra.mrb[18].mxu0 %vm355_vm2, %v346_v46  ;;  %v347_v4 = vcombine.low %v274_v50, %v277_v43  ;;  %9706 = vmatprep.mubr.msk.f32.mxu1 %vm355_vm2, %v343_v19  ;;  %v285_v40 = vrot.slane %v283_v12, 4  ;;  %v286_v55 = vrot.slane %v12047_v60, 5  ;;  %v291_v44 = vrot.slane %v289_v27, 4  ;;  %v8340_v19 = vld [vmem:[%s15773_s1 + $0x80] sm:$0xff] }
  0x3b   :  { %16046 = vst [vmem:[#allocation39_spill] sm:$0xff] %v12057_v28  ;;  %v284_v2 = vsel %vm11523_vm3, %v282_v45, %v283_v12  ;;  %v292_v10 = vrot.slane %v12057_v28, 5  ;;  %v8341_v12 = vld [vmem:[%s15773_s1 + $0x88] sm:$0xff]  ;;  %vm4981_vm13 = vcmask 1043459   ;;  %vm4984_vm14 = vcmask 1045509  }
  0x3c   :  { %9612 = vmatprep.mubr.msk.f32.mxu0 %vm355_vm2, %v347_v4  ;;  %v348_v61 = vcombine.low %v281_v22, %v284_v2  ;;  %v287_v15 = vsel %vm11523_vm3, %v285_v40, %v286_v55  ;;  %v288_v1 = vrot.slane %v286_v55, 4  ;;  %v8372_v22 = vld [vmem:[%s15773_s1 + $0xa0] sm:$0xff]  ;;  %v8373_v55 = vld [vmem:[%s15773_s1 + $0xa8] sm:$0xff]  ;;  %v16047_v40 = vrot.slane %v11515_v11, 5 }
  0x3d   :  { %9707 = vmatmul.mubr.msk.f32.gmra.mrb[20].mxu1 %vm355_vm2, %v344_v16  ;;  %v293_v50 = vsel %vm11523_vm3, %v291_v44, %v292_v10  ;;  %v294_v43 = vrot.slane %v292_v10, 4  ;;  %v617_v2 = vcombine.low %v11496_v5, %v11505_v8  ;;  %v10661_v28 = vpack.c.bf16 %v8341_v12, %v8340_v19 }
  0x3e   :  { %9613 = vmatmul.mubr.msk.f32.gmra.mrb[20].mxu0 %vm355_vm2, %v348_v61  ;;  %v290_v16 = vsel %vm11523_vm3, %v288_v1, %v289_v27  ;;  %9709 = vmatprep.mubr.msk.f32.mxu1 %vm355_vm2, %v345_v54  ;;  %v10669_v57 = vpack.c.bf16 %v8373_v55, %v8372_v22  ;;  %v618_v54 = vcombine.low %v11501_v6, %v11509_v9  ;;  %v8343_v1 = vld [vmem:[%s15773_s1 + $0x98] sm:$0xff]  ;;  %vm4986_vm15 = vcmask 1046534  }
  0x3f   :  { %v349_v45 = vcombine.low %v287_v15, %v290_v16  ;;  %v296_v44 = vsel %vm11523_vm3, %v294_v43, %v16047_v40  ;;  %10662 = vmatprep.subr.bf16.mxu0 %v10661_v28  ;;  %v10665_v27 = vpack.c.bf16 %v8343_v1, %v8342_v13  ;;  %v621_v15 = vcombine.low %v11623_v59, %v11661_v24  ;;  %v8375_v43 = vld [vmem:[%s15773_s1 + $0xb8] sm:$0xff]  ;;  %v8444_v16 = vld [vmem:[%s15773_s1 + $0xe0] sm:$0xff]  ;;  %v16049_v1 = vld [vmem:[#allocation23_spill] sm:$0xff] }
  0x40   :  { %v350_v10 = vcombine.low %v293_v50, %v296_v44  ;;  %10670 = vmatprep.subr.bf16.mxu1 %v10669_v57  ;;  %v623_v19 = vcombine.low %v11706_v52, %v11689_v37  ;;  %v8412_v50 = vld [vmem:[%s15773_s1 + $0xc0] sm:$0xff]  ;;  %v626_v12 = vcombine.low %v11764_v49, %v11794_v20  ;;  %v628_v40 = vcombine.low %v11802_v33, %v11811_v34 }
  0x41   :  { %9615 = vmatprep.mubr.msk.f32.mxu0 %vm355_vm2, %v349_v45  ;;  %9710 = vmatmul.mubr.msk.f32.gmra.mrb[22].mxu1 %vm355_vm2, %v346_v46  ;;  %v619_v46 = vcombine.low %v11540_v18, %v11606_v51  ;;  %v629_v44 = vcombine.low %v11830_v7, %v11835_v14  ;;  %v16048_v13 = vld [vmem:[#allocation26_spill] sm:$0xff]  ;;  %vm4988_vm0 = vcmask 1047559   ;;  %vm5053_vm1 = vcmask 687104  }
  0x42   :  { %9616 = vmatmul.mubr.msk.f32.gmra.mrb[22].mxu0 %vm355_vm2, %v350_v10  ;;  %9712 = vmatprep.mubr.msk.f32.mxu1 %vm355_vm2, %v347_v4  ;;  %v620_v4 = vcombine.low %v11583_v42, %v11598_v48  ;;  %vm7414_vm3 = vcmask 654336  }
  0x43   :  { %9632 = vmatprep.mubr.msk.f32.mxu0 %vm355_vm2, %v617_v2 }
  0x45   :  { %9713 = vmatmul.mubr.msk.f32.gmra.mrb[24].mxu1 %vm355_vm2, %v348_v61  ;;  %v622_v61 = vcombine.low %v11697_v41, %v11672_v29 }
  0x46   :  { %9633 = vmatmul.mubr.msk.f32.vlgmr.msra.gmra.mrb[0].mxu0 %vm355_vm2, %v618_v54  ;;  %9715 = vmatprep.mubr.msk.f32.mxu1 %vm355_vm2, %v349_v45  ;;  %v8445_v45 = vld [vmem:[%s15773_s1 + $0xe8] sm:$0xff] }
  0x47   :  { %9635 = vmatprep.mubr.msk.f32.mxu0 %vm355_vm2, %v619_v46  ;;  %10664 = vmatpush3.bf16.msra.mxu0 %v10661_v28  ;;  %v625_v28 = vcombine.low %v11735_v23, %v11772_v53 }
  0x48   :  { %10666 = vmatprep.subr.bf16.mxu0 %v10665_v27 }
  0x49   :  { %9716 = vmatmul.mubr.msk.f32.gmra.mrb[26].mxu1 %vm355_vm2, %v350_v10  ;;  %v631_v10 = vcombine.low %v11854_v35, %v11882_v21 }
  0x4a   :  { %9636 = vmatmul.mubr.msk.f32.gmra.mrb[2].mxu0 %vm355_vm2, %v620_v4  ;;  %9718 = vmatprep.mubr.msk.f32.mxu1 %vm355_vm2, %v11575_v39  ;;  %v624_v39 = vcombine.low %v11719_v58, %v11739_v25 }
  0x4b   :  { %9638 = vmatprep.mubr.msk.f32.mxu0 %vm355_vm2, %v621_v15  ;;  %10668 = vmatpush3.bf16.msra.mxu0 %v10665_v27  ;;  %v16050_v27 = vld [vmem:[#allocation25_spill] sm:$0xff] }
  0x4d   :  { %9719 = vmatmul.mubr.msk.f32.gmra.mrb[28].mxu1 %vm355_vm2, %v11634_v62  ;;  %v8413_v62 = vld [vmem:[%s15773_s1 + $0xc8] sm:$0xff] }
  0x4e   :  { %9639 = vmatmul.mubr.msk.f32.gmra.mrb[4].mxu0 %vm355_vm2, %v622_v61  ;;  %9721 = vmatprep.mubr.msk.f32.mxu1 %vm355_vm2, %v11665_v26  ;;  %v8374_v26 = vld [vmem:[%s15773_s1 + $0xb0] sm:$0xff]  ;;  %v12153_v22 = vpack.c.bf16 %v8413_v62, %v8412_v50  ;;  %v16055_v62 = vld [vmem:[#allocation31_spill] sm:$0xff] }
  0x4f   :  { %9641 = vmatprep.mubr.msk.f32.mxu0 %vm355_vm2, %v623_v19  ;;  %v10673_v55 = vpack.c.bf16 %v8375_v43, %v8374_v26  ;;  %v12215_v43 = vcombine.low %v12004_v17, %v12027_v31  ;;  %v8332_v17 = vrot.slane %v11496_v5, 10  ;;  %v1341_v5 = vrot.slane %v11583_v42, 6  ;;  %v16062_v31 = vld [vmem:[#allocation7_spill] sm:$0xff] }
  0x50   :  { %10678 = vmatprep.subr.bf16.mxu0 %v12153_v22 }
  0x51   :  { %9722 = vmatmul.mubr.msk.f32.gmra.mrb[30].mxu1 %vm355_vm2, %v11726_v3  ;;  %v627_v3 = vcombine.low %v11778_v63, %v11783_v0 }
  0x52   :  { %9642 = vmatmul.mubr.msk.f32.gmra.mrb[6].mxu0 %vm355_vm2, %v624_v39  ;;  %9732 = vmatprep.mubr.msk.f32.mxu1 %vm355_vm2, %v617_v2  ;;  %v12173_v2 = vpack.c.bf16 %v8445_v45, %v8444_v16  ;;  %v1329_v16 = vrot.slane %v11501_v6, 6  ;;  %v1332_v45 = vrot.slane %v11509_v9, 6  ;;  %v16059_v6 = vld [vmem:[#allocation4_spill] sm:$0xff] }
  0x53   :  { %9644 = vmatprep.mubr.msk.f32.mxu0 %vm355_vm2, %v625_v28  ;;  %v12239_v9 = vcombine.low %v11515_v11, %v16059_v6  ;;  %v16064_v11 = vld [vmem:[#allocation9_spill] sm:$0xff]  ;;  %v16065_v6 = vld [vmem:[#allocation8_spill] sm:$0xff] }
  0x55   :  { %9733 = vmatmul.mubr.msk.f32.vlgmr.msra.gmra.mrb[4].mxu1 %vm355_vm2, %v618_v54  ;;  %v632_v54 = vcombine.low %v11878_v36, %v11904_v30 }
  0x56   :  { %9645 = vmatmul.mubr.msk.f32.gmra.mrb[8].mxu0 %vm355_vm2, %v626_v12  ;;  %10672 = vmatpush3.bf16.msra.mxu1 %v10669_v57  ;;  %v630_v57 = vcombine.low %v11859_v47, %v11840_v38 }
  0x57   :  { %9647 = vmatprep.mubr.msk.f32.mxu0 %vm355_vm2, %v627_v3  ;;  %9735 = vmatprep.mubr.msk.f32.mxu1 %vm355_vm2, %v619_v46  ;;  %v633_v46 = vcombine.low %v16049_v1, %v16048_v13 }
  0x58   :  { %10674 = vmatprep.subr.bf16.mxu1 %v10673_v55 }
  0x59   :  { %9736 = vmatmul.mubr.msk.f32.gmra.mrb[6].mxu1 %vm355_vm2, %v620_v4  ;;  %v16051_v4 = vld [vmem:[#allocation24_spill] sm:$0xff] }
  0x5a   :  { %9648 = vmatmul.mubr.msk.f32.gmra.mrb[10].mxu0 %vm355_vm2, %v628_v40  ;;  %9738 = vmatprep.mubr.msk.f32.mxu1 %vm355_vm2, %v621_v15  ;;  %v634_v15 = vcombine.low %v16051_v4, %v16050_v27  ;;  %v16063_v27 = vld [vmem:[#allocation5_spill] sm:$0xff] }
  0x5b   :  { %9650 = vmatprep.mubr.msk.f32.mxu0 %vm355_vm2, %v629_v44  ;;  %10676 = vmatpush3.bf16.msra.mxu1 %v10673_v55 }
  0x5c   :  { %10686 = vmatprep.subr.bf16.mxu1 %v12173_v2 }
  0x5d   :  { %9739 = vmatmul.mubr.msk.f32.gmra.mrb[8].mxu1 %vm355_vm2, %v622_v61  ;;  %v16052_v61 = vld [vmem:[#allocation27_spill] sm:$0xff] }
  0x5e   :  { %9651 = vmatmul.mubr.msk.f32.gmra.mrb[12].mxu0 %vm355_vm2, %v630_v57  ;;  %9741 = vmatprep.mubr.msk.f32.mxu1 %vm355_vm2, %v623_v19  ;;  %v635_v19 = vcombine.low %v16052_v61, %v11939_v32 }
  0x5f   :  { %9653 = vmatprep.mubr.msk.f32.mxu0 %vm355_vm2, %v631_v10 }
  0x61   :  { %9742 = vmatmul.mubr.msk.f32.gmra.mrb[10].mxu1 %vm355_vm2, %v624_v39  ;;  %v16053_v39 = vld [vmem:[#allocation30_spill] sm:$0xff] }
  0x62   :  { %9654 = vmatmul.mubr.msk.f32.gmra.mrb[14].mxu0 %vm355_vm2, %v632_v54  ;;  %9744 = vmatprep.mubr.msk.f32.mxu1 %vm355_vm2, %v625_v28  ;;  %v636_v50 = vcombine.low %v16053_v39, %v11956_v56  ;;  %v16054_v28 = vld [vmem:[#allocation32_spill] sm:$0xff]  ;;  %v8333_v56 = vrot.slane %v11598_v48, 10  ;;  %v16067_v48 = vld [vmem:[#allocation13_spill] sm:$0xff] }
  0x63   :  { %9656 = vmatprep.mubr.msk.f32.mxu0 %vm355_vm2, %v633_v46  ;;  %v12208_v26 = vcombine.low %v16055_v62, %v16054_v28  ;;  %v12251_v28 = vcombine.low %v16063_v27, %v16062_v31  ;;  %v12258_v62 = vcombine.low %v16065_v6, %v16064_v11  ;;  %v1343_v6 = vrot.slane %v1341_v5, 4 }
  0x65   :  { %9745 = vmatmul.mubr.msk.f32.gmra.mrb[12].mxu1 %vm355_vm2, %v626_v12  ;;  %v1326_v12 = vrot.slane %v11505_v8, 6 }
  0x66   :  { %9657 = vmatmul.mubr.msk.f32.gmra.mrb[16].mxu0 %vm355_vm2, %v634_v15  ;;  %9747 = vmatprep.mubr.msk.f32.mxu1 %vm355_vm2, %v627_v3  ;;  %v16056_v3 = vld [vmem:[#allocation35_spill] sm:$0xff] }
  0x67   :  { %9659 = vmatprep.mubr.msk.f32.mxu0 %vm355_vm2, %v635_v19  ;;  %v12222_v55 = vcombine.low %v16056_v3, %v12047_v60  ;;  %v1328_v60 = vrot.slane %v1326_v12, 4  ;;  %v1331_v3 = vrot.slane %v1329_v16, 4 }
  0x69   :  { %9748 = vmatmul.mubr.msk.f32.gmra.mrb[14].mxu1 %vm355_vm2, %v628_v40  ;;  %v16057_v40 = vld [vmem:[#allocation39_spill] sm:$0xff]  ;;  %v1330_v42 = vsel %vm12241_vm6, %v1328_v60, %v1329_v16  ;;  %v1333_v31 = vsel %vm12241_vm6, %v1331_v3, %v1332_v45  ;;  %v1351_v60 = vrot.slane %v11661_v24, 6  ;;  %v1357_v16 = vrot.slane %v11672_v29, 6 }
  0x6a   :  { %9660 = vmatmul.mubr.msk.f32.gmra.mrb[18].mxu0 %vm355_vm2, %v636_v50  ;;  %9750 = vmatprep.mubr.msk.f32.mxu1 %vm355_vm2, %v629_v44  ;;  %v16058_v44 = vld [vmem:[#allocation37_spill] sm:$0xff]  ;;  %v16068_v3 = vld [vmem:[#allocation11_spill] sm:$0xff] }
  0x6b   :  { %9662 = vmatprep.mubr.msk.f32.mxu0 %vm355_vm2, %v12208_v26  ;;  %v12232_v8 = vcombine.low %v16058_v44, %v16057_v40  ;;  %v1338_v40 = vrot.slane %v11606_v51, 6  ;;  %v1334_v44 = vrot.slane %v1332_v45, 4  ;;  %v12282_v45 = vcombine.low %v16068_v3, %v16067_v48 }
  0x6d   :  { %9751 = vmatmul.mubr.msk.f32.gmra.mrb[16].mxu1 %vm355_vm2, %v630_v57 }
  0x6e   :  { %9663 = vmatmul.mubr.msk.f32.gmra.mrb[20].mxu0 %vm355_vm2, %v12215_v43  ;;  %9753 = vmatprep.mubr.msk.f32.mxu1 %vm355_vm2, %v631_v10  ;;  %v1335_v10 = vrot.slane %v11540_v18, 6  ;;  %v1327_v18 = vsel %vm12241_vm6, %v8332_v17, %v1326_v12  ;;  %v1348_v17 = vrot.slane %v11623_v59, 6  ;;  %v1354_v12 = vrot.slane %v11697_v41, 6 }
  0x6f   :  { %9665 = vmatprep.mubr.msk.f32.mxu0 %vm355_vm2, %v12222_v55  ;;  %v12288_v24 = vcombine.low %v1327_v18, %v1330_v42  ;;  %v1353_v41 = vrot.slane %v1351_v60, 4  ;;  %v1359_v42 = vrot.slane %v1357_v16, 4 }
  0x70   :  { %v1337_v27 = vrot.slane %v1335_v10, 4  ;;  %v1336_v11 = vsel %vm12241_vm6, %v1334_v44, %v1335_v10  ;;  %v1360_v44 = vrot.slane %v11706_v52, 6  ;;  %v1363_v10 = vrot.slane %v11689_v37, 6 }
  0x71   :  { %9754 = vmatmul.mubr.msk.f32.gmra.mrb[18].mxu1 %vm355_vm2, %v632_v54  ;;  %v16066_v54 = vld [vmem:[#allocation12_spill] sm:$0xff]  ;;  %v1349_v52 = vsel %vm12241_vm6, %v8333_v56, %v1348_v17  ;;  %v1350_v37 = vrot.slane %v1348_v17, 4  ;;  %v1356_v18 = vrot.slane %v1354_v12, 4  ;;  %v1379_v17 = vrot.slane %v11764_v49, 6 }
  0x72   :  { %9666 = vmatmul.mubr.msk.f32.gmra.mrb[22].mxu0 %vm355_vm2, %v12232_v8  ;;  %9756 = vmatprep.mubr.msk.f32.mxu1 %vm355_vm2, %v633_v46  ;;  %v1344_v51 = vrot.slane %v16066_v54, 6  ;;  %v1340_v46 = vrot.slane %v1338_v40, 4  ;;  %v1339_v29 = vsel %vm12241_vm6, %v1337_v27, %v1338_v40  ;;  %v1370_v54 = vrot.slane %v11739_v25, 6  ;;  %v8414_v27 = vld [vmem:[%s15773_s1 + $0xd0] sm:$0xff] }
  0x73   :  { %9668 = vmatprep.mubr.msk.f32.mxu0 %vm355_vm2, %v12239_v9  ;;  %v1362_v56 = vrot.slane %v1360_v44, 4  ;;  %v1373_v40 = vrot.slane %v11735_v23, 6  ;;  %v1352_v25 = vsel %vm12241_vm6, %v1350_v37, %v1351_v60  ;;  %v8334_v49 = vrot.slane %v11719_v58, 10 }
  0x74   :  { %v1345_v48 = vsel %vm12241_vm6, %v1343_v6, %v1344_v51  ;;  %v8415_v51 = vld [vmem:[%s15773_s1 + $0xd8] sm:$0xff]  ;;  %v1381_v58 = vrot.slane %v1379_v17, 4 }
  0x75   :  { %9757 = vmatmul.mubr.msk.f32.gmra.mrb[20].mxu1 %vm355_vm2, %v634_v15  ;;  %v12290_v15 = vcombine.low %v1333_v31, %v1336_v11  ;;  %v16069_v31 = vld [vmem:[#allocation17_spill] sm:$0xff]  ;;  %v10681_v23 = vpack.c.bf16 %v8415_v51, %v8414_v27  ;;  %v1375_v60 = vrot.slane %v1373_v40, 4 }
  0x76   :  { %9669 = vmatmul.mubr.msk.f32.gmra.mrb[24].mxu0 %vm355_vm2, %v12251_v28  ;;  %9759 = vmatprep.mubr.msk.f32.mxu1 %vm355_vm2, %v635_v19  ;;  %v1342_v19 = vsel %vm12241_vm6, %v1340_v46, %v1341_v5  ;;  %v1366_v11 = vrot.slane %v16069_v31, 6  ;;  %v1376_v5 = vrot.slane %v11772_v53, 6  ;;  %v12319_v46 = vcombine.low %v1345_v48, %v1349_v52  ;;  %v16070_v27 = vld [vmem:[#allocation21_spill] sm:$0xff] }
  0x77   :  { %9671 = vmatprep.mubr.msk.f32.mxu0 %vm355_vm2, %v12258_v62  ;;  %v12317_v6 = vcombine.low %v1339_v29, %v1342_v19  ;;  %v1382_v31 = vrot.slane %v11794_v20, 6  ;;  %v1358_v29 = vsel %vm12241_vm6, %v1356_v18, %v1357_v16  ;;  %v1361_v52 = vsel %vm12241_vm6, %v1359_v42, %v1360_v44 }
  0x78   :  { %v1372_v19 = vrot.slane %v1370_v54, 4  ;;  %v1385_v44 = vrot.slane %v11778_v63, 6  ;;  %v12352_v37 = vcombine.low %v1358_v29, %v1361_v52  ;;  %v1401_v42 = vrot.slane %v11835_v14, 6  ;;  %v8477_v14 = vld [vmem:[%s15773_s1 + $0x108] sm:$0xff] }
  0x79   :  { %9760 = vmatmul.mubr.msk.f32.gmra.mrb[22].mxu1 %vm355_vm2, %v636_v50  ;;  %v1365_v50 = vrot.slane %v1363_v10, 4  ;;  %v1384_v48 = vrot.slane %v1382_v31, 4  ;;  %v1388_v51 = vrot.slane %v16070_v27, 6  ;;  %v1414_v52 = vrot.slane %v11882_v21, 6 }
  0x7a   :  { %9672 = vmatmul.mubr.msk.f32.gmra.mrb[26].mxu0 %vm355_vm2, %v12282_v45  ;;  %9762 = vmatprep.mubr.msk.f32.mxu1 %vm355_vm2, %v12208_v26  ;;  %v1355_v26 = vsel %vm12241_vm6, %v1353_v41, %v1354_v12  ;;  %v1364_v41 = vsel %vm12241_vm6, %v1362_v56, %v1363_v10  ;;  %v1378_v12 = vrot.slane %v1376_v5, 4  ;;  %v1395_v10 = vrot.slane %v11811_v34, 6  ;;  %v8476_v56 = vld [vmem:[%s15773_s1 + $0x100] sm:$0xff] }
  0x7b   :  { %9782 = vmatprep.mubr.msk.f32.mxu0 %vm355_vm2, %v12288_v24  ;;  %v12344_v16 = vcombine.low %v1352_v25, %v1355_v26  ;;  %v1371_v25 = vsel %vm12241_vm6, %v8334_v49, %v1370_v54  ;;  %v1374_v63 = vsel %vm12241_vm6, %v1372_v19, %v1373_v40  ;;  %v1377_v34 = vsel %vm12241_vm6, %v1375_v60, %v1376_v5 }
  0x7c   :  { %v1383_v54 = vsel %vm12241_vm6, %v1381_v58, %v1382_v31  ;;  %v1397_v5 = vrot.slane %v1395_v10, 4  ;;  %v1404_v31 = vrot.slane %v11859_v47, 6  ;;  %v1407_v26 = vrot.slane %v11840_v38, 6 }
  0x7d   :  { %9763 = vmatmul.mubr.msk.f32.gmra.mrb[24].mxu1 %vm355_vm2, %v12215_v43  ;;  %v1367_v43 = vsel %vm12241_vm6, %v1365_v50, %v1366_v11  ;;  %v1387_v11 = vrot.slane %v1385_v44, 4  ;;  %v1386_v50 = vsel %vm12241_vm6, %v1384_v48, %v1385_v44  ;;  %v1403_v29 = vrot.slane %v1401_v42, 4  ;;  %v16071_v44 = vld [vmem:[#allocation22_spill] sm:$0xff] }
  0x7e   :  { %9783 = vmatmul.mubr.msk.f32.vlgmr.msra.gmra.mrb[0].mxu0 %vm355_vm2, %v12290_v15  ;;  %9765 = vmatprep.mubr.msk.f32.mxu1 %vm355_vm2, %v12222_v55  ;;  %v1392_v55 = vrot.slane %v11802_v33, 6  ;;  %v12354_v18 = vcombine.low %v1364_v41, %v1367_v43  ;;  %v12397_v49 = vpack.c.bf16 %v8477_v14, %v8476_v56  ;;  %v1417_v41 = vrot.slane %v11878_v36, 6  ;;  %v8512_v14 = vld [vmem:[%s15773_s1 + $0x120] sm:$0xff] }
  0x7f   :  { %9785 = vmatprep.mubr.msk.f32.mxu0 %vm355_vm2, %v12317_v6  ;;  %10680 = vmatpush3.bf16.msra.mxu0 %v12153_v22  ;;  %v1398_v22 = vrot.slane %v11830_v7, 6  ;;  %v1389_v38 = vsel %vm12241_vm6, %v1387_v11, %v1388_v51  ;;  %v1406_v60 = vrot.slane %v1404_v31, 4  ;;  %v1409_v58 = vrot.slane %v1407_v26, 4 }
  0x80   :  { %10682 = vmatprep.subr.bf16.mxu0 %v10681_v23  ;;  %v1394_v40 = vrot.slane %v1392_v55, 4  ;;  %v1410_v48 = vrot.slane %v16071_v44, 6  ;;  %v1423_v36 = vrot.slane %v16049_v1, 6  ;;  %v1416_v1 = vrot.slane %v1414_v52, 4 }
  0x81   :  { %9766 = vmatmul.mubr.msk.f32.gmra.mrb[26].mxu1 %vm355_vm2, %v12232_v8  ;;  %v1380_v8 = vsel %vm12241_vm6, %v1378_v12, %v1379_v17  ;;  %v1399_v43 = vsel %vm12241_vm6, %v1397_v5, %v1398_v22  ;;  %v1420_v12 = vrot.slane %v11904_v30, 6  ;;  %v1429_v5 = vrot.slane %v16051_v4, 6 }
  0x82   :  { %9786 = vmatmul.mubr.msk.f32.gmra.mrb[2].mxu0 %vm355_vm2, %v12319_v46  ;;  %9768 = vmatprep.mubr.msk.f32.mxu1 %vm355_vm2, %v12239_v9  ;;  %v8335_v9 = vrot.slane %v11783_v0, 10  ;;  %v12387_v0 = vcombine.low %v1371_v25, %v1374_v63  ;;  %v12389_v17 = vcombine.low %v1377_v34, %v1380_v8  ;;  %v8447_v25 = vld [vmem:[%s15773_s1 + $0xf8] sm:$0xff]  ;;  %v1426_v63 = vrot.slane %v16048_v13, 6 }
  0x83   :  { %9788 = vmatprep.mubr.msk.f32.mxu0 %vm355_vm2, %v12344_v16  ;;  %10684 = vmatpush3.bf16.msra.mxu0 %v10681_v23  ;;  %v1400_v23 = vrot.slane %v1398_v22, 4  ;;  %v1419_v8 = vrot.slane %v1417_v41, 4  ;;  %v1411_v51 = vsel %vm12241_vm6, %v1409_v58, %v1410_v48  ;;  %v1425_v56 = vrot.slane %v1423_v36, 4  ;;  %v16076_v58 = vld [vmem:[#allocation25_spill] sm:$0xff] }
  0x84   :  { %v1393_v19 = vsel %vm12241_vm6, %v8335_v9, %v1392_v55  ;;  %10694 = vmatprep.subr.bf16.mxu0 %v12397_v49  ;;  %v8336_v55 = vrot.slane %v11854_v35, 10  ;;  %v1405_v35 = vsel %vm12241_vm6, %v1403_v29, %v1404_v31  ;;  %v1436_v31 = vrot.slane %v16052_v61, 6  ;;  %v16072_v29 = vld [vmem:[#allocation29_spill] sm:$0xff] }
  0x85   :  { %9769 = vmatmul.mubr.msk.f32.gmra.mrb[28].mxu1 %vm355_vm2, %v12251_v28  ;;  %v12401_v28 = vcombine.low %v1383_v54, %v1386_v50  ;;  %v12436_v34 = vcombine.low %v1389_v38, %v1393_v19  ;;  %v1422_v54 = vrot.slane %v1420_v12, 4  ;;  %v8513_v50 = vld [vmem:[%s15773_s1 + $0x128] sm:$0xff]  ;;  %v8337_v48 = vrot.slane %v16076_v58, 10  ;;  %v16083_v58 = vld [vmem:[#allocation33_spill] sm:$0xff] }
  0x86   :  { %9789 = vmatmul.mubr.msk.f32.gmra.mrb[4].mxu0 %vm355_vm2, %v12352_v37  ;;  %9771 = vmatprep.mubr.msk.f32.mxu1 %vm355_vm2, %v12258_v62  ;;  %v1396_v62 = vsel %vm12241_vm6, %v1394_v40, %v1395_v10  ;;  %v8446_v10 = vld [vmem:[%s15773_s1 + $0xf0] sm:$0xff]  ;;  %v1415_v9 = vsel %vm12241_vm6, %v8336_v55, %v1414_v52  ;;  %v1428_v40 = vrot.slane %v1426_v63, 4  ;;  %v1445_v52 = vrot.slane %v16072_v29, 6  ;;  %v16073_v38 = vld [vmem:[#allocation31_spill] sm:$0xff] }
  0x87   :  { %9791 = vmatprep.mubr.msk.f32.mxu0 %vm355_vm2, %v12354_v18  ;;  %v12438_v22 = vcombine.low %v1396_v62, %v1399_v43  ;;  %v10689_v11 = vpack.c.bf16 %v8447_v25, %v8446_v10  ;;  %v1424_v4 = vsel %vm12241_vm6, %v1422_v54, %v1423_v36  ;;  %v1448_v19 = vrot.slane %v16073_v38, 6 }
  0x88   :  { %v12476_v43 = vpack.c.bf16 %v8513_v50, %v8512_v14  ;;  %v1427_v55 = vsel %vm12241_vm6, %v1425_v56, %v1426_v63  ;;  %v1431_v36 = vrot.slane %v1429_v5, 4  ;;  %v1438_v10 = vrot.slane %v1436_v31, 4  ;;  %v16079_v56 = vld [vmem:[#allocation35_spill] sm:$0xff]  ;;  %v16080_v50 = vld [vmem:[#allocation38_spill] sm:$0xff] }
  0x89   :  { %9772 = vmatmul.mubr.msk.f32.gmra.mrb[30].mxu1 %vm355_vm2, %v12282_v45  ;;  %v1402_v45 = vsel %vm12241_vm6, %v1400_v23, %v1401_v42  ;;  %v1439_v23 = vrot.slane %v11939_v32, 6  ;;  %v1461_v14 = vrot.slane %v16079_v56, 6 }
  0x8a   :  { %9792 = vmatmul.mubr.msk.f32.gmra.mrb[6].mxu0 %vm355_vm2, %v12387_v0  ;;  %9832 = vmatprep.mubr.msk.f32.mxu1 %vm355_vm2, %v12288_v24  ;;  %v1408_v24 = vsel %vm12241_vm6, %v1406_v60, %v1407_v26  ;;  %v12444_v42 = vcombine.low %v1402_v45, %v1405_v35  ;;  %v1421_v26 = vsel %vm12241_vm6, %v1419_v8, %v1420_v12  ;;  %v16075_v60 = vld [vmem:[#allocation28_spill] sm:$0xff]  ;;  %v1450_v8 = vrot.slane %v1448_v19, 4 }
  0x8b   :  { %9794 = vmatprep.mubr.msk.f32.mxu0 %vm355_vm2, %v12389_v17  ;;  %v1432_v12 = vrot.slane %v16075_v60, 6  ;;  %v12496_v25 = vcombine.low %v1421_v26, %v1424_v4  ;;  %v1441_v45 = vrot.slane %v1439_v23, 4  ;;  %v1440_v26 = vsel %vm12241_vm6, %v1438_v10, %v1439_v23 }
  0x8d   :  { %9833 = vmatmul.mubr.msk.f32.vlgmr.msra.gmra.mrb[4].mxu1 %vm355_vm2, %v12290_v15  ;;  %v1418_v15 = vsel %vm12241_vm6, %v1416_v1, %v1417_v41  ;;  %v16074_v41 = vld [vmem:[#allocation32_spill] sm:$0xff]  ;;  %v1447_v1 = vrot.slane %v1445_v52, 4 }
  0x8e   :  { %9795 = vmatmul.mubr.msk.f32.gmra.mrb[8].mxu0 %vm355_vm2, %v12401_v28  ;;  %10688 = vmatpush3.bf16.msra.mxu1 %v12173_v2  ;;  %v1442_v2 = vrot.slane %v16053_v39, 6  ;;  %v1451_v62 = vrot.slane %v16074_v41, 6  ;;  %v12482_v32 = vcombine.low %v1415_v9, %v1418_v15  ;;  %v1464_v15 = vrot.slane %v16080_v50, 6  ;;  %v16082_v41 = vld [vmem:[#allocation39_spill] sm:$0xff] }
  0x8f   :  { %9797 = vmatprep.mubr.msk.f32.mxu0 %vm355_vm2, %v12436_v34  ;;  %9835 = vmatprep.mubr.msk.f32.mxu1 %vm355_vm2, %v12317_v6  ;;  %v12480_v6 = vcombine.low %v1408_v24, %v1411_v51  ;;  %v16078_v51 = vld [vmem:[#allocation36_spill] sm:$0xff] }
  0x90   :  { %10690 = vmatprep.subr.bf16.mxu1 %v10689_v11  ;;  %v1444_v35 = vrot.slane %v1442_v2, 4  ;;  %v1453_v24 = vrot.slane %v1451_v62, 4  ;;  %v1458_v63 = vrot.slane %v16078_v51, 6  ;;  %v1443_v29 = vsel %vm12241_vm6, %v1441_v45, %v1442_v2 }
  0x91   :  { %9836 = vmatmul.mubr.msk.f32.gmra.mrb[6].mxu1 %vm355_vm2, %v12319_v46  ;;  %v1430_v46 = vsel %vm12241_vm6, %v1428_v40, %v1429_v5  ;;  %v16081_v40 = vld [vmem:[#allocation37_spill] sm:$0xff]  ;;  %v1463_v2 = vrot.slane %v1461_v14, 4 }
  0x92   :  { %9798 = vmatmul.mubr.msk.f32.gmra.mrb[10].mxu0 %vm355_vm2, %v12438_v22  ;;  %9838 = vmatprep.mubr.msk.f32.mxu1 %vm355_vm2, %v12344_v16  ;;  %v16077_v16 = vld [vmem:[#allocation34_spill] sm:$0xff]  ;;  %v12503_v9 = vcombine.low %v1427_v55, %v1430_v46  ;;  %v1467_v5 = vrot.slane %v16081_v40, 6  ;;  %v1446_v4 = vsel %vm12241_vm6, %v1444_v35, %v1445_v52  ;;  %v1460_v55 = vrot.slane %v1458_v63, 4 }
  0x93   :  { %9800 = vmatprep.mubr.msk.f32.mxu0 %vm355_vm2, %v12444_v42  ;;  %10692 = vmatpush3.bf16.msra.mxu1 %v10689_v11  ;;  %v1454_v54 = vrot.slane %v16077_v16, 6  ;;  %v1433_v11 = vsel %vm12241_vm6, %v1431_v36, %v1432_v12  ;;  %v1470_v12 = vrot.slane %v16082_v41, 6  ;;  %v1466_v46 = vrot.slane %v1464_v15, 4 }
  0x94   :  { %10702 = vmatprep.subr.bf16.mxu1 %v12476_v43  ;;  %v1469_v52 = vrot.slane %v1467_v5, 4 }
  0x95   :  { %9839 = vmatmul.mubr.msk.f32.gmra.mrb[8].mxu1 %vm355_vm2, %v12352_v37  ;;  %v1437_v37 = vsel %vm12241_vm6, %v8337_v48, %v1436_v31  ;;  %v1452_v31 = vsel %vm12241_vm6, %v1450_v8, %v1451_v62  ;;  %v1455_v23 = vsel %vm12241_vm6, %v1453_v24, %v1454_v54  ;;  %v8338_v48 = vrot.slane %v16083_v58, 10  ;;  %v16084_v24 = vld [vmem:[#allocation6_spill] sm:$0xff] }
  0x96   :  { %9801 = vmatmul.mubr.msk.f32.gmra.mrb[12].mxu0 %vm355_vm2, %v12480_v6  ;;  %9841 = vmatprep.mubr.msk.f32.mxu1 %vm355_vm2, %v12354_v18  ;;  %v1449_v18 = vsel %vm12241_vm6, %v1447_v1, %v1448_v19  ;;  %v12537_v19 = vld [vmem:[%s15774_s0 + $0xd8] sm:$0xff]  ;;  %v12544_v62 = vcombine.low %v1433_v11, %v1437_v37  ;;  %v1472_v45 = vrot.slane %v1470_v12, 4  ;;  %v12552_v35 = vcombine.low %v1452_v31, %v1455_v23 }
  0x97   :  { %9803 = vmatprep.mubr.msk.f32.mxu0 %vm355_vm2, %v12482_v32  ;;  %v1473_v36 = vrot.slane %v12537_v19, 6  ;;  %v12550_v10 = vcombine.low %v1446_v4, %v1449_v18  ;;  %v1459_v1 = vsel %vm12241_vm6, %v8338_v48, %v1458_v63  ;;  %v1462_v8 = vsel %vm12241_vm6, %v1460_v55, %v1461_v14  ;;  %v16085_v14 = vld [vmem:[#allocation5_spill] sm:$0xff]  ;;  %v12592_v4 = vld [vmem:[%s15774_s0 + $0xf0] sm:$0xff] }
  0x98   :  { %v1465_v54 = vsel %vm12241_vm6, %v1463_v2, %v1464_v15  ;;  %v1468_v56 = vsel %vm12241_vm6, %v1466_v46, %v1467_v5  ;;  %v1471_v40 = vsel %vm12241_vm6, %v1469_v52, %v1470_v12  ;;  %v1480_v15 = vrot.slane %v16085_v14, 6  ;;  %v12581_v5 = vld [vmem:[%s15774_s0 + $0xe8] sm:$0xff]  ;;  %v12599_v31 = vld [vmem:[%s15774_s0 + $0xf8] sm:$0xff] }
  0x99   :  { %9842 = vmatmul.mubr.msk.f32.gmra.mrb[10].mxu1 %vm355_vm2, %v12387_v0  ;;  %v12548_v0 = vcombine.low %v1440_v26, %v1443_v29  ;;  %v1475_v11 = vrot.slane %v1473_v36, 4  ;;  %v1483_v37 = vrot.slane %v12581_v5, 6  ;;  %v16086_v26 = vld [vmem:[#allocation8_spill] sm:$0xff]  ;;  %v1489_v18 = vrot.slane %v12592_v4, 6  ;;  %16087 = vst [vmem:[#allocation26_spill] sm:$0xff] %v12599_v31 }
  0x9a   :  { %9804 = vmatmul.mubr.msk.f32.gmra.mrb[14].mxu0 %vm355_vm2, %v12496_v25  ;;  %9844 = vmatprep.mubr.msk.f32.mxu1 %vm355_vm2, %v12389_v17  ;;  %v1476_v17 = vrot.slane %v16084_v24, 6  ;;  %v1486_v29 = vrot.slane %v16086_v26, 6  ;;  %v1492_v12 = vrot.slane %v16068_v3, 6  ;;  %v1495_v23 = vrot.slane %v12599_v31, 6 }
  0x9b   :  { %9806 = vmatprep.mubr.msk.f32.mxu0 %vm355_vm2, %v12503_v9  ;;  %v12604_v58 = vcombine.low %v1459_v1, %v1462_v8  ;;  %v12606_v48 = vcombine.low %v1465_v54, %v1468_v56  ;;  %v1482_v52 = vrot.slane %v1480_v15, 4  ;;  %v16089_v56 = vld [vmem:[#allocation2_spill] sm:$0xff] }
  0x9c   :  { %v1477_v55 = vsel %vm12241_vm6, %v1475_v11, %v1476_v17  ;;  %v1494_v1 = vrot.slane %v1492_v12, 4  ;;  %v1497_v8 = vrot.slane %v1495_v23, 4  ;;  %v16088_v17 = vld [vmem:[#allocation14_spill] sm:$0xff]  ;;  %v2065_v11 = vrot.slane %v16089_v56, 7 }
  0x9d   :  { %9845 = vmatmul.mubr.msk.f32.gmra.mrb[12].mxu1 %vm355_vm2, %v12401_v28  ;;  %v12574_v28 = vld [vmem:[%s15774_s0 + $0xe0] sm:$0xff]  ;;  %v1498_v54 = vrot.slane %v16088_v17, 6 }
  0x9e   :  { %9807 = vmatmul.mubr.msk.f32.gmra.mrb[16].mxu0 %vm355_vm2, %v12544_v62  ;;  %9847 = vmatprep.mubr.msk.f32.mxu1 %vm355_vm2, %v12436_v34  ;;  %v8339_v63 = vrot.slane %v12574_v28, 10  ;;  %v1474_v34 = vsel %vm12241_vm6, %v1472_v45, %v1473_v36  ;;  %v1488_v36 = vrot.slane %v1486_v29, 4  ;;  %v1491_v45 = vrot.slane %v1489_v18, 4  ;;  %v16093_v17 = vld [vmem:[#allocation10_spill] sm:$0xff] }
  0x9f   :  { %9809 = vmatprep.mubr.msk.f32.mxu0 %vm355_vm2, %v12548_v0  ;;  %v12614_v2 = vcombine.low %v1471_v40, %v1474_v34  ;;  %v12634_v34 = vld [vmem:[%s15774_s0 + $0x10] sm:$0xff]  ;;  %v2077_v31 = vrot.slane %v16093_v17, 7 }
  0xa0   :  { %v1481_v46 = vsel %vm12241_vm6, %v8339_v63, %v1480_v15  ;;  %v16091_v63 = vld [vmem:[#allocation3_spill] sm:$0xff]  ;;  %16092 = vst [vmem:[#allocation24_spill] sm:$0xff] %v12634_v34  ;;  %v2074_v56 = vrot.slane %v12634_v34, 7  ;;  %v1490_v17 = vsel %vm12241_vm6, %v1488_v36, %v1489_v18  ;;  %v1493_v34 = vsel %vm12241_vm6, %v1491_v45, %v1492_v12  ;;  %v12670_v12 = vld [vmem:[%s15774_s0 + $0x18] sm:$0xff] }
  0xa1   :  { %9848 = vmatmul.mubr.msk.f32.gmra.mrb[14].mxu1 %vm355_vm2, %v12438_v22  ;;  %v1485_v22 = vrot.slane %v1483_v37, 4  ;;  %v2071_v15 = vrot.slane %v16091_v63, 7  ;;  %v2067_v18 = vrot.slane %v2065_v11, 4  ;;  %16096 = vst [vmem:[#allocation27_spill] sm:$0xff] %v12670_v12  ;;  %v2079_v36 = vrot.slane %v2077_v31, 4 }
  0xa2   :  { %9810 = vmatmul.mubr.msk.f32.gmra.mrb[18].mxu0 %vm355_vm2, %v12550_v10  ;;  %9850 = vmatprep.mubr.msk.f32.mxu1 %vm355_vm2, %v12444_v42  ;;  %v12625_v42 = vld [vmem:[%s15774_s0 + $0x8] sm:$0xff] }
  0xa3   :  { %9812 = vmatprep.mubr.msk.f32.mxu0 %vm355_vm2, %v12552_v35  ;;  %16090 = vst [vmem:[#allocation23_spill] sm:$0xff] %v12625_v42  ;;  %v2068_v40 = vrot.slane %v12625_v42, 7  ;;  %v12642_v42 = vcombine.low %v1477_v55, %v1481_v46  ;;  %v1487_v63 = vsel %vm12241_vm6, %v1485_v22, %v1486_v29  ;;  %v11391_v55 = vld [vmem:[%s15774_s0] sm:$0xff]  ;;  %v1499_v29 = vsel %vm12241_vm6, %v1497_v8, %v1498_v54 }
  0xa4   :  { %v2073_v57 = vrot.slane %v2071_v15, 4  ;;  %v2076_v22 = vrot.slane %v2074_v56, 4  ;;  %v2087_v8 = vrot.slane %v11623_v59, 7 }
  0xa5   :  { %9851 = vmatmul.mubr.msk.f32.gmra.mrb[16].mxu1 %vm355_vm2, %v12480_v6  ;;  %v1484_v6 = vsel %vm12241_vm6, %v1482_v52, %v1483_v37  ;;  %v8404_v37 = vrot.slane %v11391_v55, 11  ;;  %v2070_v52 = vrot.slane %v2068_v40, 4  ;;  %v16097_v55 = vld [vmem:[#allocation12_spill] sm:$0xff]  ;;  %v2069_v59 = vsel %vm12663_vm9, %v2067_v18, %v2068_v40 }
  0xa6   :  { %9813 = vmatmul.mubr.msk.f32.gmra.mrb[20].mxu0 %vm355_vm2, %v12604_v58  ;;  %9853 = vmatprep.mubr.msk.f32.mxu1 %vm355_vm2, %v12482_v32  ;;  %v1496_v32 = vsel %vm12241_vm6, %v1494_v1, %v1495_v23  ;;  %v2080_v23 = vrot.slane %v12670_v12, 7  ;;  %v12679_v45 = vcombine.low %v1484_v6, %v1487_v63  ;;  %v12681_v1 = vcombine.low %v1490_v17, %v1493_v34 }
  0xa7   :  { %9815 = vmatprep.mubr.msk.f32.mxu0 %vm355_vm2, %v12606_v48  ;;  %v12686_v54 = vcombine.low %v1496_v32, %v1499_v29  ;;  %v2083_v12 = vrot.slane %v16097_v55, 7  ;;  %v2072_v63 = vsel %vm12663_vm9, %v2070_v52, %v2071_v15  ;;  %v2075_v32 = vsel %vm12663_vm9, %v2073_v57, %v2074_v56  ;;  %v16117_v46 = vld [vmem:[#allocation24_spill] sm:$0xff] }
  0xa8   :  { %v2082_v34 = vrot.slane %v2080_v23, 4  ;;  %v2078_v40 = vsel %vm12663_vm9, %v2076_v22, %v2077_v31  ;;  %v2081_v15 = vsel %vm12663_vm9, %v2079_v36, %v2080_v23  ;;  %v2089_v18 = vrot.slane %v2087_v8, 4  ;;  %v16101_v31 = vld [vmem:[#allocation16_spill] sm:$0xff]  ;;  %v12730_v23 = vld [vmem:[%s15774_s0 + $0x38] sm:$0xff] }
  0xa9   :  { %9854 = vmatmul.mubr.msk.f32.gmra.mrb[18].mxu1 %vm355_vm2, %v12496_v25  ;;  %v2066_v25 = vsel %vm12663_vm9, %v8404_v37, %v2065_v11  ;;  %v12704_v11 = vld [vmem:[%s15774_s0 + $0x20] sm:$0xff]  ;;  %v16099_v37 = vld [vmem:[#allocation15_spill] sm:$0xff]  ;;  %v2099_v52 = vrot.slane %v16101_v31, 7  ;;  %16102 = vst [vmem:[#allocation9_spill] sm:$0xff] %v12730_v23  ;;  %v2102_v57 = vrot.slane %v12730_v23, 7  ;;  %v12737_v36 = vcombine.low %v2072_v63, %v2075_v32 }
  0xaa   :  { %9816 = vmatmul.mubr.msk.f32.gmra.mrb[22].mxu0 %vm355_vm2, %v12614_v2  ;;  %9856 = vmatprep.mubr.msk.f32.mxu1 %vm355_vm2, %v12503_v9  ;;  %v12694_v9 = vld [vmem:[%s15774_s0 + $0x28] sm:$0xff]  ;;  %v8405_v6 = vrot.slane %v12704_v11, 11  ;;  %v2093_v29 = vrot.slane %v16099_v37, 7  ;;  %v12739_v55 = vcombine.low %v2078_v40, %v2081_v15  ;;  %v12775_v15 = vld [vmem:[%s15774_s0 + $0x50] sm:$0xff] }
  0xab   :  { %9818 = vmatprep.mubr.msk.f32.mxu0 %vm355_vm2, %v12642_v42  ;;  %16098 = vst [vmem:[#allocation4_spill] sm:$0xff] %v12694_v9  ;;  %v2090_v17 = vrot.slane %v12694_v9, 7  ;;  %v16103_v9 = vld [vmem:[#allocation17_spill] sm:$0xff]  ;;  %v2104_v63 = vrot.slane %v2102_v57, 4  ;;  %v12768_v40 = vld [vmem:[%s15774_s0 + $0x48] sm:$0xff] }
  0xac   :  { %v2088_v31 = vsel %vm12663_vm9, %v8405_v6, %v2087_v8  ;;  %v2095_v23 = vrot.slane %v2093_v29, 4  ;;  %v2105_v37 = vrot.slane %v16103_v9, 7  ;;  %v2101_v8 = vrot.slane %v2099_v52, 4  ;;  %v16104_v6 = vld [vmem:[#allocation18_spill] sm:$0xff]  ;;  %16105 = vst [vmem:[#allocation13_spill] sm:$0xff] %v12768_v40 }
  0xad   :  { %9857 = vmatmul.mubr.msk.f32.gmra.mrb[20].mxu1 %vm355_vm2, %v12544_v62  ;;  %v12723_v62 = vld [vmem:[%s15774_s0 + $0x30] sm:$0xff]  ;;  %v2092_v22 = vrot.slane %v2090_v17, 4  ;;  %v2109_v32 = vrot.slane %v16104_v6, 7 }
  0xae   :  { %9819 = vmatmul.mubr.msk.f32.gmra.mrb[24].mxu0 %vm355_vm2, %v12679_v45  ;;  %9859 = vmatprep.mubr.msk.f32.mxu1 %vm355_vm2, %v12548_v0  ;;  %16100 = vst [vmem:[#allocation7_spill] sm:$0xff] %v12723_v62  ;;  %v2096_v56 = vrot.slane %v12723_v62, 7  ;;  %v12735_v0 = vcombine.low %v2066_v25, %v2069_v59  ;;  %v2084_v62 = vsel %vm12663_vm9, %v2082_v34, %v2083_v12  ;;  %v8478_v25 = vld [vmem:[%s15773_s1 + $0x110] sm:$0xff]  ;;  %v8479_v59 = vld [vmem:[%s15773_s1 + $0x118] sm:$0xff] }
  0xaf   :  { %9821 = vmatprep.mubr.msk.f32.mxu0 %vm355_vm2, %v12681_v1  ;;  %v2094_v34 = vsel %vm12663_vm9, %v2092_v22, %v2093_v29  ;;  %v2121_v29 = vrot.slane %v11794_v20, 7  ;;  %v12782_v22 = vld [vmem:[%s15774_s0 + $0x58] sm:$0xff]  ;;  %v10697_v9 = vpack.c.bf16 %v8479_v59, %v8478_v25  ;;  %v2103_v25 = vsel %vm12663_vm9, %v2101_v8, %v2102_v57 }
  0xb0   :  { %v2098_v12 = vrot.slane %v2096_v56, 4  ;;  %16106 = vst [vmem:[#allocation11_spill] sm:$0xff] %v12782_v22  ;;  %v2124_v6 = vrot.slane %v12782_v22, 7  ;;  %v2131_v8 = vrot.slane %v11802_v33, 7 }
  0xb1   :  { %9860 = vmatmul.mubr.msk.f32.gmra.mrb[22].mxu1 %vm355_vm2, %v12550_v10  ;;  %v2091_v10 = vsel %vm12663_vm9, %v2089_v18, %v2090_v17  ;;  %v2115_v17 = vrot.slane %v11772_v53, 7  ;;  %v2118_v18 = vrot.slane %v12775_v15, 7  ;;  %v12787_v53 = vcombine.low %v2084_v62, %v2088_v31 }
  0xb2   :  { %9822 = vmatmul.mubr.msk.f32.gmra.mrb[26].mxu0 %vm355_vm2, %v12686_v54  ;;  %9862 = vmatprep.mubr.msk.f32.mxu1 %vm355_vm2, %v12552_v35  ;;  %v2112_v35 = vrot.slane %v12768_v40, 7  ;;  %v2097_v40 = vsel %vm12663_vm9, %v2095_v23, %v2096_v56  ;;  %v12795_v20 = vcombine.low %v2091_v10, %v2094_v34  ;;  %v2100_v22 = vsel %vm12663_vm9, %v2098_v12, %v2099_v52  ;;  %v12815_v12 = vld [vmem:[%s15774_s0 + $0x60] sm:$0xff] }
  0xb3   :  { %9882 = vmatprep.mubr.msk.f32.mxu0 %vm355_vm2, %v12735_v0  ;;  %v2106_v56 = vsel %vm12663_vm9, %v2104_v63, %v2105_v37  ;;  %v2127_v52 = vrot.slane %v16070_v27, 7  ;;  %v2117_v23 = vrot.slane %v2115_v17, 4  ;;  %v2120_v59 = vrot.slane %v2118_v18, 4  ;;  %v12822_v27 = vld [vmem:[%s15774_s0 + $0x68] sm:$0xff] }
  0xb4   :  { %v2114_v31 = vrot.slane %v2112_v35, 4  ;;  %v2123_v57 = vrot.slane %v2121_v29, 4  ;;  %v2126_v10 = vrot.slane %v2124_v6, 4  ;;  %v8407_v37 = vrot.slane %v12815_v12, 11  ;;  %16107 = vst [vmem:[#allocation21_spill] sm:$0xff] %v12822_v27 }
  0xb5   :  { %9863 = vmatmul.mubr.msk.f32.gmra.mrb[24].mxu1 %vm355_vm2, %v12604_v58  ;;  %v11400_v58 = vld [vmem:[%s15774_s0 + $0x40] sm:$0xff]  ;;  %v12831_v63 = vcombine.low %v2103_v25, %v2106_v56  ;;  %v2137_v34 = vrot.slane %v11830_v7, 7  ;;  %v2143_v56 = vrot.slane %v11859_v47, 7 }
  0xb6   :  { %9883 = vmatmul.mubr.msk.f32.vlgmr.msra.gmra.mrb[0].mxu0 %vm355_vm2, %v12737_v36  ;;  %9865 = vmatprep.mubr.msk.f32.mxu1 %vm355_vm2, %v12606_v48  ;;  %v8406_v62 = vrot.slane %v11400_v58, 11  ;;  %v2111_v48 = vrot.slane %v2109_v32, 4  ;;  %v2132_v25 = vsel %vm12663_vm9, %v8407_v37, %v2131_v8  ;;  %v2149_v37 = vrot.slane %v16071_v44, 7 }
  0xb7   :  { %9885 = vmatprep.mubr.msk.f32.mxu0 %vm355_vm2, %v12739_v55  ;;  %10696 = vmatpush3.bf16.msra.mxu0 %v12397_v49  ;;  %v2134_v49 = vrot.slane %v12822_v27, 7  ;;  %v2116_v27 = vsel %vm12663_vm9, %v2114_v31, %v2115_v17  ;;  %v2128_v17 = vsel %vm12663_vm9, %v2126_v10, %v2127_v52  ;;  %v2153_v52 = vrot.slane %v11882_v21, 7 }
  0xb8   :  { %10698 = vmatprep.subr.bf16.mxu0 %v10697_v9  ;;  %v2110_v33 = vsel %vm12663_vm9, %v8406_v62, %v2109_v32  ;;  %v2113_v58 = vsel %vm12663_vm9, %v2111_v48, %v2112_v35  ;;  %v2122_v32 = vsel %vm12663_vm9, %v2120_v59, %v2121_v29  ;;  %v2125_v35 = vsel %vm12663_vm9, %v2123_v57, %v2124_v6 }
  0xb9   :  { %9866 = vmatmul.mubr.msk.f32.gmra.mrb[26].mxu1 %vm355_vm2, %v12614_v2  ;;  %v12829_v2 = vcombine.low %v2097_v40, %v2100_v22  ;;  %v2119_v22 = vsel %vm12663_vm9, %v2117_v23, %v2118_v18  ;;  %v2133_v62 = vrot.slane %v2131_v8, 4  ;;  %v12865_v6 = vcombine.low %v2110_v33, %v2113_v58  ;;  %v8514_v8 = vld [vmem:[%s15773_s1 + $0x130] sm:$0xff]  ;;  %v12907_v58 = vld [vmem:[%s15774_s0 + $0x88] sm:$0xff] }
  0xba   :  { %9886 = vmatmul.mubr.msk.f32.gmra.mrb[2].mxu0 %vm355_vm2, %v12787_v53  ;;  %9868 = vmatprep.mubr.msk.f32.mxu1 %vm355_vm2, %v12642_v42  ;;  %v12845_v42 = vld [vmem:[%s15774_s0 + $0x70] sm:$0xff]  ;;  %v2139_v18 = vrot.slane %v2137_v34, 4  ;;  %v12875_v48 = vcombine.low %v2116_v27, %v2119_v22  ;;  %v12878_v23 = vcombine.low %v2122_v32, %v2125_v35  ;;  %v2145_v10 = vrot.slane %v2143_v56, 4  ;;  %v8515_v27 = vld [vmem:[%s15773_s1 + $0x138] sm:$0xff] }
  0xbb   :  { %9888 = vmatprep.mubr.msk.f32.mxu0 %vm355_vm2, %v12795_v20  ;;  %v2140_v40 = vrot.slane %v12845_v42, 7  ;;  %10700 = vmatpush3.bf16.msra.mxu0 %v10697_v9  ;;  %v2136_v9 = vrot.slane %v2134_v49, 4  ;;  %v2135_v59 = vsel %vm12663_vm9, %v2133_v62, %v2134_v49  ;;  %v2156_v22 = vrot.slane %v12907_v58, 7  ;;  %v12918_v35 = vld [vmem:[%s15774_s0 + $0x90] sm:$0xff] }
  0xbc   :  { %v2159_v32 = vrot.slane %v11904_v30, 7  ;;  %v10705_v62 = vpack.c.bf16 %v8515_v27, %v8514_v8 }
  0xbd   :  { %9869 = vmatmul.mubr.msk.f32.gmra.mrb[28].mxu1 %vm355_vm2, %v12679_v45  ;;  %v12870_v45 = vld [vmem:[%s15774_s0 + $0x78] sm:$0xff]  ;;  %v2142_v31 = vrot.slane %v2140_v40, 4  ;;  %v2138_v57 = vsel %vm12663_vm9, %v2136_v9, %v2137_v34  ;;  %v11405_v34 = vld [vmem:[%s15774_s0 + $0x80] sm:$0xff] }
  0xbe   :  { %9889 = vmatmul.mubr.msk.f32.gmra.mrb[4].mxu0 %vm355_vm2, %v12829_v2  ;;  %9871 = vmatprep.mubr.msk.f32.mxu1 %vm355_vm2, %v12681_v1  ;;  %v2146_v29 = vrot.slane %v12870_v45, 7  ;;  %v12880_v1 = vcombine.low %v2128_v17, %v2132_v25  ;;  %v8408_v33 = vrot.slane %v11405_v34, 11  ;;  %v2162_v17 = vrot.slane %v12918_v35, 7 }
  0xbf   :  { %9891 = vmatprep.mubr.msk.f32.mxu0 %vm355_vm2, %v12831_v63  ;;  %v2165_v25 = vrot.slane %v16048_v13, 7  ;;  %v12924_v9 = vcombine.low %v2135_v59, %v2138_v57  ;;  %v2158_v57 = vrot.slane %v2156_v22, 4  ;;  %v2171_v34 = vrot.slane %v16075_v60, 7 }
  0xc0   :  { %v2148_v49 = vrot.slane %v2146_v29, 4 }
  0xc1   :  { %9872 = vmatmul.mubr.msk.f32.gmra.mrb[30].mxu1 %vm355_vm2, %v12686_v54  ;;  %v2141_v54 = vsel %vm12663_vm9, %v2139_v18, %v2140_v40  ;;  %v2155_v40 = vrot.slane %v2153_v52, 4  ;;  %v12931_v18 = vld [vmem:[%s15774_s0 + $0x98] sm:$0xff]  ;;  %v2167_v27 = vrot.slane %v2165_v25, 4 }
  0xc2   :  { %9892 = vmatmul.mubr.msk.f32.gmra.mrb[6].mxu0 %vm355_vm2, %v12865_v6  ;;  %9932 = vmatprep.mubr.msk.f32.mxu1 %vm355_vm2, %v12735_v0  ;;  %v2144_v0 = vsel %vm12663_vm9, %v2142_v31, %v2143_v56  ;;  %v2147_v56 = vsel %vm12663_vm9, %v2145_v10, %v2146_v29  ;;  %v2168_v31 = vrot.slane %v12931_v18, 7  ;;  %v2154_v29 = vsel %vm12663_vm9, %v8408_v33, %v2153_v52 }
  0xc3   :  { %9894 = vmatprep.mubr.msk.f32.mxu0 %vm355_vm2, %v12875_v48  ;;  %v12937_v8 = vcombine.low %v2141_v54, %v2144_v0  ;;  %v2157_v59 = vsel %vm12663_vm9, %v2155_v40, %v2156_v22  ;;  %v2161_v10 = vrot.slane %v2159_v32, 4  ;;  %v2175_v54 = vrot.slane %v16052_v61, 7  ;;  %v12963_v61 = vld [vmem:[%s15774_s0 + $0xa0] sm:$0xff]  ;;  %v12969_v22 = vld [vmem:[%s15774_s0 + $0xb0] sm:$0xff] }
  0xc4   :  { %v8409_v33 = vrot.slane %v12963_v61, 11  ;;  %16109 = vst [vmem:[#allocation29_spill] sm:$0xff] %v12969_v22  ;;  %v2184_v0 = vrot.slane %v12969_v22, 7  ;;  %v12978_v60 = vcombine.low %v2154_v29, %v2157_v59  ;;  %v2187_v40 = vrot.slane %v16073_v38, 7 }
  0xc5   :  { %9933 = vmatmul.mubr.msk.f32.vlgmr.msra.gmra.mrb[4].mxu1 %vm355_vm2, %v12737_v36  ;;  %v2150_v36 = vsel %vm12663_vm9, %v2148_v49, %v2149_v37  ;;  %v12953_v37 = vld [vmem:[%s15774_s0 + $0xa8] sm:$0xff]  ;;  %v2181_v49 = vrot.slane %v16053_v39, 7  ;;  %v2160_v22 = vsel %vm12663_vm9, %v2158_v57, %v2159_v32  ;;  %v2177_v29 = vrot.slane %v2175_v54, 4 }
  0xc6   :  { %9895 = vmatmul.mubr.msk.f32.gmra.mrb[8].mxu0 %vm355_vm2, %v12878_v23  ;;  %10704 = vmatpush3.bf16.msra.mxu1 %v12476_v43  ;;  %v2164_v43 = vrot.slane %v2162_v17, 4  ;;  %16108 = vst [vmem:[#allocation22_spill] sm:$0xff] %v12953_v37  ;;  %v2178_v52 = vrot.slane %v12953_v37, 7  ;;  %v12984_v37 = vld [vmem:[%s15774_s0 + $0xb8] sm:$0xff]  ;;  %v2176_v32 = vsel %vm12663_vm9, %v8409_v33, %v2175_v54  ;;  %v2197_v57 = vrot.slane %v16078_v51, 7 }
  0xc7   :  { %9897 = vmatprep.mubr.msk.f32.mxu0 %vm355_vm2, %v12880_v1  ;;  %9935 = vmatprep.mubr.msk.f32.mxu1 %vm355_vm2, %v12739_v55  ;;  %v2170_v55 = vrot.slane %v2168_v31, 4  ;;  %16110 = vst [vmem:[#allocation32_spill] sm:$0xff] %v12984_v37  ;;  %v2190_v39 = vrot.slane %v12984_v37, 7  ;;  %v2183_v38 = vrot.slane %v2181_v49, 4 }
  0xc8   :  { %10706 = vmatprep.subr.bf16.mxu1 %v10705_v62  ;;  %v2180_v59 = vrot.slane %v2178_v52, 4 }
  0xc9   :  { %9936 = vmatmul.mubr.msk.f32.gmra.mrb[6].mxu1 %vm355_vm2, %v12787_v53  ;;  %v12976_v53 = vcombine.low %v2147_v56, %v2150_v36  ;;  %v2166_v56 = vsel %vm12663_vm9, %v2164_v43, %v2165_v25  ;;  %v2169_v36 = vsel %vm12663_vm9, %v2167_v27, %v2168_v31  ;;  %v2172_v37 = vsel %vm12663_vm9, %v2170_v55, %v2171_v34  ;;  %v13018_v43 = vld [vmem:[%s15774_s0 + $0xc8] sm:$0xff] }
  0xca   :  { %9898 = vmatmul.mubr.msk.f32.gmra.mrb[10].mxu0 %vm355_vm2, %v12924_v9  ;;  %9938 = vmatprep.mubr.msk.f32.mxu1 %vm355_vm2, %v12795_v20  ;;  %v2163_v20 = vsel %vm12663_vm9, %v2161_v10, %v2162_v17  ;;  %v2186_v17 = vrot.slane %v2184_v0, 4  ;;  %v2192_v31 = vrot.slane %v2190_v39, 4  ;;  %v13013_v10 = vcombine.low %v2166_v56, %v2169_v36 }
  0xcb   :  { %9900 = vmatprep.mubr.msk.f32.mxu0 %vm355_vm2, %v12937_v8  ;;  %10708 = vmatpush3.bf16.msra.mxu1 %v10705_v62  ;;  %v13008_v25 = vcombine.low %v2160_v22, %v2163_v20  ;;  %v2189_v62 = vrot.slane %v2187_v40, 4  ;;  %v2200_v27 = vrot.slane %v13018_v43, 7  ;;  %v13022_v54 = vcombine.low %v2172_v37, %v2176_v32  ;;  %v11414_v37 = vld [vmem:[%s15774_s0 + $0xc0] sm:$0xff] }
  0xcc   :  { %v2179_v55 = vsel %vm12663_vm9, %v2177_v29, %v2178_v52  ;;  %v2182_v34 = vsel %vm12663_vm9, %v2180_v59, %v2181_v49  ;;  %v2185_v33 = vsel %vm12663_vm9, %v2183_v38, %v2184_v0  ;;  %v2188_v22 = vsel %vm12663_vm9, %v2186_v17, %v2187_v40  ;;  %v13040_v52 = vld [vmem:[%s15774_s0 + $0xd0] sm:$0xff] }
  0xcd   :  { %9939 = vmatmul.mubr.msk.f32.gmra.mrb[8].mxu1 %vm355_vm2, %v12829_v2  ;;  %v2193_v2 = vrot.slane %v16077_v16, 7  ;;  %v8410_v20 = vrot.slane %v11414_v37, 11  ;;  %v2199_v56 = vrot.slane %v2197_v57, 4  ;;  %v2206_v49 = vrot.slane %v13040_v52, 7 }
  0xce   :  { %9901 = vmatmul.mubr.msk.f32.gmra.mrb[12].mxu0 %vm355_vm2, %v12976_v53  ;;  %9941 = vmatprep.mubr.msk.f32.mxu1 %vm355_vm2, %v12831_v63  ;;  %v2203_v63 = vrot.slane %v16080_v50, 7  ;;  %v2191_v38 = vsel %vm12663_vm9, %v2189_v62, %v2190_v39  ;;  %v2209_v0 = vrot.slane %v16082_v41, 7  ;;  %v2212_v40 = vrot.slane %v12537_v19, 7 }
  0xcf   :  { %9903 = vmatprep.mubr.msk.f32.mxu0 %vm355_vm2, %v12978_v60  ;;  %v13055_v36 = vcombine.low %v2179_v55, %v2182_v34  ;;  %v2202_v29 = vrot.slane %v2200_v27, 4  ;;  %v13057_v32 = vcombine.low %v2185_v33, %v2188_v22  ;;  %v2201_v17 = vsel %vm12663_vm9, %v2199_v56, %v2200_v27 }
  0xd0   :  { %v2205_v59 = vrot.slane %v2203_v63, 4  ;;  %v2208_v62 = vrot.slane %v2206_v49, 4  ;;  %v2215_v55 = vrot.slane %v16084_v24, 7  ;;  %v8411_v34 = vrot.slane %v12574_v28, 11 }
  0xd1   :  { %9942 = vmatmul.mubr.msk.f32.gmra.mrb[10].mxu1 %vm355_vm2, %v12865_v6  ;;  %v2194_v6 = vsel %vm12663_vm9, %v2192_v31, %v2193_v2  ;;  %v2211_v31 = vrot.slane %v2209_v0, 4  ;;  %v2214_v2 = vrot.slane %v2212_v40, 4  ;;  %v2222_v33 = vrot.slane %v12581_v5, 7 }
  0xd2   :  { %9904 = vmatmul.mubr.msk.f32.gmra.mrb[14].mxu0 %vm355_vm2, %v13008_v25  ;;  %9944 = vmatprep.mubr.msk.f32.mxu1 %vm355_vm2, %v12875_v48  ;;  %v13061_v39 = vcombine.low %v2191_v38, %v2194_v6  ;;  %v2198_v48 = vsel %vm12663_vm9, %v8410_v20, %v2197_v57  ;;  %v2204_v57 = vsel %vm12663_vm9, %v2202_v29, %v2203_v63  ;;  %v2228_v22 = vrot.slane %v12592_v4, 7  ;;  %v16111_v6 = vld [vmem:[#allocation26_spill] sm:$0xff] }
  0xd3   :  { %9906 = vmatprep.mubr.msk.f32.mxu0 %vm355_vm2, %v13013_v10  ;;  %v2207_v27 = vsel %vm12663_vm9, %v2205_v59, %v2206_v49  ;;  %v2265_v24 = vcombine.low %v2198_v48, %v2201_v17  ;;  %v2213_v37 = vsel %vm12663_vm9, %v2211_v31, %v2212_v40  ;;  %v2216_v20 = vsel %vm12663_vm9, %v2214_v2, %v2215_v55  ;;  %v16112_v2 = vld [vmem:[#allocation14_spill] sm:$0xff] }
  0xd4   :  { %v2266_v63 = vcombine.low %v2204_v57, %v2207_v27  ;;  %v2224_v49 = vrot.slane %v2222_v33, 4  ;;  %v2231_v38 = vrot.slane %v16068_v3, 7  ;;  %v2230_v29 = vrot.slane %v2228_v22, 4 }
  0xd5   :  { %9945 = vmatmul.mubr.msk.f32.gmra.mrb[12].mxu1 %vm355_vm2, %v12878_v23  ;;  %v2219_v23 = vrot.slane %v16085_v14, 7  ;;  %v2210_v14 = vsel %vm12663_vm9, %v2208_v62, %v2209_v0  ;;  %v2234_v0 = vrot.slane %v16111_v6, 7  ;;  %v2237_v55 = vrot.slane %v16112_v2, 7 }
  0xd6   :  { %9907 = vmatmul.mubr.msk.f32.gmra.mrb[16].mxu0 %vm355_vm2, %v13022_v54  ;;  %9947 = vmatprep.mubr.msk.f32.mxu1 %vm355_vm2, %v12880_v1  ;;  %v2225_v1 = vrot.slane %v16086_v26, 7  ;;  %v2267_v40 = vcombine.low %v2210_v14, %v2213_v37  ;;  %v2233_v62 = vrot.slane %v2231_v38, 4 }
  0xd7   :  { %9909 = vmatprep.mubr.msk.f32.mxu0 %vm355_vm2, %v13055_v36  ;;  %v2221_v56 = vrot.slane %v2219_v23, 4  ;;  %v2236_v31 = vrot.slane %v2234_v0, 4 }
  0xd8   :  { %v2226_v17 = vsel %vm12663_vm9, %v2224_v49, %v2225_v1 }
  0xd9   :  { %9948 = vmatmul.mubr.msk.f32.gmra.mrb[14].mxu1 %vm355_vm2, %v12924_v9  ;;  %v2220_v9 = vsel %vm12663_vm9, %v8411_v34, %v2219_v23  ;;  %v2223_v48 = vsel %vm12663_vm9, %v2221_v56, %v2222_v33  ;;  %v2235_v34 = vsel %vm12663_vm9, %v2233_v62, %v2234_v0  ;;  %v2238_v33 = vsel %vm12663_vm9, %v2236_v31, %v2237_v55  ;;  %v16132_v55 = vld [vmem:[#allocation11_spill] sm:$0xff] }
  0xda   :  { %9910 = vmatmul.mubr.msk.f32.gmra.mrb[18].mxu0 %vm355_vm2, %v13057_v32  ;;  %9950 = vmatprep.mubr.msk.f32.mxu1 %vm355_vm2, %v12937_v8  ;;  %v2227_v8 = vrot.slane %v2225_v1, 4  ;;  %v2268_v59 = vcombine.low %v2216_v20, %v2220_v9  ;;  %v2269_v23 = vcombine.low %v2223_v48, %v2226_v17  ;;  %v16120_v20 = vld [vmem:[#allocation10_spill] sm:$0xff]  ;;  %v16128_v48 = vld [vmem:[#allocation9_spill] sm:$0xff] }
  0xdb   :  { %9912 = vmatprep.mubr.msk.f32.mxu0 %vm355_vm2, %v13061_v39 }
  0xdd   :  { %9951 = vmatmul.mubr.msk.f32.gmra.mrb[16].mxu1 %vm355_vm2, %v12976_v53  ;;  %v2229_v53 = vsel %vm12663_vm9, %v2227_v8, %v2228_v22  ;;  %v16116_v22 = vld [vmem:[#allocation2_spill] sm:$0xff]  ;;  %v16125_v8 = vld [vmem:[#allocation16_spill] sm:$0xff] }
  0xde   :  { %9913 = vmatmul.mubr.msk.f32.gmra.mrb[20].mxu0 %vm355_vm2, %v2265_v24  ;;  %9953 = vmatprep.mubr.msk.f32.mxu1 %vm355_vm2, %v12978_v60  ;;  %v2232_v60 = vsel %vm12663_vm9, %v2230_v29, %v2231_v38  ;;  %v16124_v38 = vld [vmem:[#allocation4_spill] sm:$0xff] }
  0xdf   :  { %9915 = vmatprep.mubr.msk.f32.mxu0 %vm355_vm2, %v2266_v63  ;;  %v2270_v27 = vcombine.low %v2229_v53, %v2232_v60  ;;  %v16133_v53 = vld [vmem:[#allocation20_spill] sm:$0xff] }
  0xe0   :  { %v2813_v60 = vcombine.low %v16133_v53, %v16132_v55 }
  0xe1   :  { %9954 = vmatmul.mubr.msk.f32.gmra.mrb[18].mxu1 %vm355_vm2, %v13008_v25  ;;  %v2271_v25 = vcombine.low %v2235_v34, %v2238_v33  ;;  %v2816_v34 = vcombine.low %v12845_v42, %v11859_v47  ;;  %v2818_v33 = vcombine.low %v11882_v21, %v12907_v58  ;;  %v2820_v47 = vcombine.low %v16048_v13, %v12931_v18  ;;  %v16136_v42 = vld [vmem:[#allocation22_spill] sm:$0xff]  ;;  %v16138_v13 = vld [vmem:[#allocation29_spill] sm:$0xff] }
  0xe2   :  { %9916 = vmatmul.mubr.msk.f32.gmra.mrb[22].mxu0 %vm355_vm2, %v2267_v40  ;;  %9956 = vmatprep.mubr.msk.f32.mxu1 %vm355_vm2, %v13013_v10  ;;  %v16115_v10 = vld [vmem:[#allocation23_spill] sm:$0xff]  ;;  %v8482_v21 = vcombine.high %v12931_v18, %v12963_v61  ;;  %v2825_v18 = vcombine.low %v16078_v51, %v13018_v43  ;;  %v2826_v61 = vcombine.low %v16080_v50, %v13040_v52  ;;  %v8670_v43 = vld [vmem:[%s15775_s3 + $0xc0] sm:$0xff] }
  0xe3   :  { %9918 = vmatprep.mubr.msk.f32.mxu0 %vm355_vm2, %v2268_v59  ;;  %v13122_v57 = vpop.f32.mrb[0].mxu1  ;;  %v2804_v14 = vcombine.low %v16116_v22, %v16115_v10  ;;  %v8483_v10 = vcombine.high %v12537_v19, %v12574_v28  ;;  %v2829_v51 = vcombine.low %v12581_v5, %v16086_v26  ;;  %v2830_v50 = vcombine.low %v12592_v4, %v16068_v3  ;;  %v8668_v3 = vld [vmem:[%s15775_s3 + $0xb0] sm:$0xff]  ;;  %v8701_v28 = vld [vmem:[%s15775_s3 + $0x108] sm:$0xff]  ;;  %v8704_v22 = vld [vmem:[%s15775_s3 + $0x120] sm:$0xff] }
  0xe4   :  { %16113 = vst [vmem:[#allocation28_spill] sm:$0xff] %v13122_v57  ;;  %v13128_v1 = vpop.f32.mrb[1].mxu1  ;;  %v8702_v26 = vld [vmem:[%s15775_s3 + $0x110] sm:$0xff]  ;;  %v8671_v52 = vld [vmem:[%s15775_s3 + $0xc8] sm:$0xff] }
  0xe5   :  { %16114 = vst [vmem:[#allocation25_spill] sm:$0xff] %v13128_v1  ;;  %9957 = vmatmul.mubr.msk.f32.gmra.mrb[20].mxu1 %vm355_vm2, %v13022_v54  ;;  %v16118_v54 = vld [vmem:[#allocation3_spill] sm:$0xff]  ;;  %v10749_v4 = vpack.c.bf16 %v8702_v26, %v8701_v28 }
  0xe6   :  { %9919 = vmatmul.mubr.msk.f32.gmra.mrb[24].mxu0 %vm355_vm2, %v2269_v23  ;;  %9959 = vmatprep.mubr.msk.f32.mxu1 %vm355_vm2, %v13055_v36  ;;  %v2805_v37 = vcombine.low %v16118_v54, %v16117_v46  ;;  %v16119_v36 = vld [vmem:[#allocation27_spill] sm:$0xff]  ;;  %v8672_v46 = vld [vmem:[%s15775_s3 + $0xd0] sm:$0xff]  ;;  %v8673_v54 = vld [vmem:[%s15775_s3 + $0xd8] sm:$0xff] }
  0xe7   :  { %9921 = vmatprep.mubr.msk.f32.mxu0 %vm355_vm2, %v2270_v27  ;;  %v2806_v56 = vcombine.low %v16120_v20, %v16119_v36  ;;  %10750 = vmatprep.subr.bf16.mxu1 %v10749_v4  ;;  %v8706_v20 = vld [vmem:[%s15775_s3 + $0x130] sm:$0xff] }
  0xe9   :  { %9960 = vmatmul.mubr.msk.f32.gmra.mrb[22].mxu1 %vm355_vm2, %v13057_v32  ;;  %v8480_v32 = vcombine.high %v16119_v36, %v12704_v11  ;;  %v16129_v11 = vld [vmem:[#allocation13_spill] sm:$0xff]  ;;  %v10717_v36 = vpack.c.bf16 %v8673_v54, %v8672_v46 }
  0xea   :  { %9922 = vmatmul.mubr.msk.f32.gmra.mrb[26].mxu0 %vm355_vm2, %v2271_v25  ;;  %9962 = vmatprep.mubr.msk.f32.mxu1 %vm355_vm2, %v13061_v39  ;;  %v16123_v39 = vld [vmem:[#allocation15_spill] sm:$0xff] }
  0xeb   :  { %9982 = vmatprep.mubr.msk.f32.mxu0 %vm355_vm2, %v2804_v14  ;;  %v2808_v0 = vcombine.low %v16124_v38, %v16123_v39  ;;  %v8675_v39 = vld [vmem:[%s15775_s3 + $0xe8] sm:$0xff]  ;;  %v8707_v38 = vld [vmem:[%s15775_s3 + $0x138] sm:$0xff] }
  0xec   :  { %v13148_v9 = vpop.f32.mrb[2].mxu1 }
  0xed   :  { %16121 = vst [vmem:[#allocation34_spill] sm:$0xff] %v13148_v9  ;;  %v13150_v49 = vpop.f32.mrb[3].mxu1  ;;  %9963 = vmatmul.mubr.msk.f32.gmra.mrb[24].mxu1 %vm355_vm2, %v2265_v24  ;;  %v16126_v24 = vld [vmem:[#allocation7_spill] sm:$0xff] }
  0xee   :  { %16122 = vst [vmem:[#allocation36_spill] sm:$0xff] %v13150_v49  ;;  %9983 = vmatmul.mubr.msk.f32.vlgmr.msra.gmra.mrb[0].mxu0 %vm355_vm2, %v2805_v37  ;;  %9965 = vmatprep.mubr.msk.f32.mxu1 %vm355_vm2, %v2266_v63  ;;  %v2809_v29 = vcombine.low %v16126_v24, %v16125_v8  ;;  %v16127_v63 = vld [vmem:[#allocation17_spill] sm:$0xff]  ;;  %v8708_v8 = vld [vmem:[%s15775_s3 + $0x140] sm:$0xff] }
  0xef   :  { %9985 = vmatprep.mubr.msk.f32.mxu0 %vm355_vm2, %v2806_v56  ;;  %v2810_v17 = vcombine.low %v16128_v48, %v16127_v63  ;;  %v10761_v24 = vpack.c.bf16 %v8708_v8, %v8707_v38  ;;  %v8677_v63 = vld [vmem:[%s15775_s3 + $0xf8] sm:$0xff]  ;;  %v8709_v48 = vld [vmem:[%s15775_s3 + $0x148] sm:$0xff] }
  0xf1   :  { %9966 = vmatmul.mubr.msk.f32.gmra.mrb[26].mxu1 %vm355_vm2, %v2267_v40  ;;  %v16130_v40 = vld [vmem:[#allocation18_spill] sm:$0xff] }
  0xf2   :  { %9986 = vmatmul.mubr.msk.f32.gmra.mrb[2].mxu0 %vm355_vm2, %v8480_v32  ;;  %9968 = vmatprep.mubr.msk.f32.mxu1 %vm355_vm2, %v2268_v59  ;;  %v2811_v62 = vcombine.low %v16130_v40, %v16129_v11  ;;  %v16131_v59 = vld [vmem:[#allocation19_spill] sm:$0xff]  ;;  %v8710_v11 = vld [vmem:[%s15775_s3 + $0x150] sm:$0xff] }
  0xf3   :  { %9988 = vmatprep.mubr.msk.f32.mxu0 %vm355_vm2, %v2808_v0  ;;  %v2812_v31 = vcombine.low %v16131_v59, %v12775_v15  ;;  %v16134_v15 = vld [vmem:[#allocation21_spill] sm:$0xff]  ;;  %v10765_v40 = vpack.c.bf16 %v8710_v11, %v8709_v48 }
  0xf4   :  { %v8711_v59 = vld [vmem:[%s15775_s3 + $0x158] sm:$0xf] }
  0xf5   :  { %9969 = vmatmul.mubr.msk.f32.gmra.mrb[28].mxu1 %vm355_vm2, %v2269_v23  ;;  %v8481_v23 = vcombine.high %v16132_v55, %v12815_v12  ;;  %v2817_v12 = vcombine.low %v12870_v45, %v16071_v44  ;;  %v16135_v44 = vld [vmem:[#allocation30_spill] sm:$0xff] }
  0xf6   :  { %9989 = vmatmul.mubr.msk.f32.gmra.mrb[4].mxu0 %vm355_vm2, %v2809_v29  ;;  %9971 = vmatprep.mubr.msk.f32.mxu1 %vm355_vm2, %v2270_v27  ;;  %v2815_v27 = vcombine.low %v16134_v15, %v11830_v7  ;;  %v2819_v7 = vcombine.low %v11904_v30, %v12918_v35  ;;  %v2822_v45 = vcombine.low %v16136_v42, %v16135_v44  ;;  %v16137_v30 = vld [vmem:[#allocation31_spill] sm:$0xff]  ;;  %v16139_v35 = vld [vmem:[#allocation32_spill] sm:$0xff] }
  0xf7   :  { %9991 = vmatprep.mubr.msk.f32.mxu0 %vm355_vm2, %v2810_v17  ;;  %v2823_v58 = vcombine.low %v16138_v13, %v16137_v30 }
  0xf9   :  { %9972 = vmatmul.mubr.msk.f32.gmra.mrb[30].mxu1 %vm355_vm2, %v2271_v25  ;;  %v2824_v25 = vcombine.low %v16139_v35, %v16077_v16  ;;  %v2827_v16 = vcombine.low %v16082_v41, %v12537_v19  ;;  %v2831_v41 = vcombine.low %v16111_v6, %v16112_v2  ;;  %v8669_v19 = vld [vmem:[%s15775_s3 + $0xb8] sm:$0xff]  ;;  %v10713_v2 = vpack.c.bf16 %v8671_v52, %v8670_v43 }
  0xfa   :  { %9992 = vmatmul.mubr.msk.f32.gmra.mrb[6].mxu0 %vm355_vm2, %v2811_v62  ;;  %10032 = vmatprep.mubr.msk.f32.mxu1 %vm355_vm2, %v2804_v14  ;;  %v10709_v5 = vpack.c.bf16 %v8669_v19, %v8668_v3  ;;  %v8703_v6 = vld [vmem:[%s15775_s3 + $0x118] sm:$0xff] }
  0xfb   :  { %9994 = vmatprep.mubr.msk.f32.mxu0 %vm355_vm2, %v2812_v31  ;;  %v10753_v14 = vpack.c.bf16 %v8704_v22, %v8703_v6 }
  0xfc   :  { %10710 = vmatprep.subr.bf16.mxu0 %v10709_v5 }
  0xfd   :  { %10033 = vmatmul.mubr.msk.f32.vlgmr.msra.gmra.mrb[4].mxu1 %vm355_vm2, %v2805_v37  ;;  %10712 = vmatpush3.bf16.msra.mxu0 %v10709_v5  ;;  %v8705_v37 = vld [vmem:[%s15775_s3 + $0x128] sm:$0xff] }
  0xfe   :  { %9995 = vmatmul.mubr.msk.f32.gmra.mrb[8].mxu0 %vm355_vm2, %v2813_v60  ;;  %10035 = vmatprep.mubr.msk.f32.mxu1 %vm355_vm2, %v2806_v56  ;;  %v10757_v56 = vpack.c.bf16 %v8706_v20, %v8705_v37 }
  0xff   :  { %9997 = vmatprep.mubr.msk.f32.mxu0 %vm355_vm2, %v8481_v23  ;;  %10752 = vmatpush3.bf16.msra.mxu1 %v10749_v4 }
 0x100   :  { %10714 = vmatprep.subr.bf16.mxu0 %v10713_v2  ;;  %10754 = vmatprep.subr.bf16.mxu1 %v10753_v14 }
 0x101   :  { %10036 = vmatmul.mubr.msk.f32.gmra.mrb[6].mxu1 %vm355_vm2, %v8480_v32  ;;  %10716 = vmatpush3.bf16.msra.mxu0 %v10713_v2  ;;  %v8674_v32 = vld [vmem:[%s15775_s3 + $0xe0] sm:$0xff] }
 0x102   :  { %9998 = vmatmul.mubr.msk.f32.gmra.mrb[10].mxu0 %vm355_vm2, %v2815_v27  ;;  %10038 = vmatprep.mubr.msk.f32.mxu1 %vm355_vm2, %v2808_v0  ;;  %v10721_v0 = vpack.c.bf16 %v8675_v39, %v8674_v32 }
 0x103   :  { %10000 = vmatprep.mubr.msk.f32.mxu0 %vm355_vm2, %v2816_v34  ;;  %10756 = vmatpush3.bf16.msra.mxu1 %v10753_v14 }
 0x104   :  { %10718 = vmatprep.subr.bf16.mxu0 %v10717_v36  ;;  %10758 = vmatprep.subr.bf16.mxu1 %v10757_v56 }
 0x105   :  { %10039 = vmatmul.mubr.msk.f32.gmra.mrb[8].mxu1 %vm355_vm2, %v2809_v29  ;;  %10720 = vmatpush3.bf16.msra.mxu0 %v10717_v36  ;;  %v8676_v29 = vld [vmem:[%s15775_s3 + $0xf0] sm:$0xff] }
 0x106   :  { %10001 = vmatmul.mubr.msk.f32.gmra.mrb[12].mxu0 %vm355_vm2, %v2817_v12  ;;  %10041 = vmatprep.mubr.msk.f32.mxu1 %vm355_vm2, %v2810_v17  ;;  %v10725_v17 = vpack.c.bf16 %v8677_v63, %v8676_v29 }
 0x107   :  { %10003 = vmatprep.mubr.msk.f32.mxu0 %vm355_vm2, %v2818_v33  ;;  %10760 = vmatpush3.bf16.msra.mxu1 %v10757_v56 }
 0x108   :  { %10722 = vmatprep.subr.bf16.mxu0 %v10721_v0  ;;  %10762 = vmatprep.subr.bf16.mxu1 %v10761_v24 }
 0x109   :  { %10042 = vmatmul.mubr.msk.f32.gmra.mrb[10].mxu1 %vm355_vm2, %v2811_v62  ;;  %10724 = vmatpush3.bf16.msra.mxu0 %v10721_v0  ;;  %v8678_v62 = vld [vmem:[%s15775_s3 + $0x100] sm:$0xf] }
 0x10a   :  { %10004 = vmatmul.mubr.msk.f32.gmra.mrb[14].mxu0 %vm355_vm2, %v2819_v7  ;;  %10044 = vmatprep.mubr.msk.f32.mxu1 %vm355_vm2, %v2812_v31 }
 0x10b   :  { %10006 = vmatprep.mubr.msk.f32.mxu0 %vm355_vm2, %v2820_v47  ;;  %10764 = vmatpush3.bf16.msra.mxu1 %v10761_v24 }
 0x10c   :  { %10726 = vmatprep.subr.bf16.mxu0 %v10725_v17  ;;  %10766 = vmatprep.subr.bf16.mxu1 %v10765_v40 }
 0x10d   :  { %10045 = vmatmul.mubr.msk.f32.gmra.mrb[12].mxu1 %vm355_vm2, %v2813_v60  ;;  %10728 = vmatpush3.bf16.msra.mxu0 %v10725_v17 }
 0x10e   :  { %10007 = vmatmul.mubr.msk.f32.gmra.mrb[16].mxu0 %vm355_vm2, %v8482_v21  ;;  %10047 = vmatprep.mubr.msk.f32.mxu1 %vm355_vm2, %v8481_v23 }
 0x10f   :  { %10009 = vmatprep.mubr.msk.f32.mxu0 %vm355_vm2, %v2822_v45  ;;  %10768 = vmatpush3.bf16.msra.mxu1 %v10765_v40 }
 0x110   :  { %10094 = vmatprep.subr.msk.mxu0 %vm5074_vm10, %v8678_v62  ;;  %10168 = vmatprep.subr.msk.mxu1 %vm5074_vm10, %v8711_v59 }
 0x111   :  { %10048 = vmatmul.mubr.msk.f32.gmra.mrb[14].mxu1 %vm355_vm2, %v2815_v27  ;;  %10095 = vmatpush3.msk.msra.mxu0 %vm5074_vm10, %v8678_v62  ;;  %v11417_v27 = vmov 1983009808  }
 0x112   :  { %10010 = vmatmul.mubr.msk.f32.gmra.mrb[18].mxu0 %vm355_vm2, %v2823_v58  ;;  %10050 = vmatprep.mubr.msk.f32.mxu1 %vm355_vm2, %v2816_v34  ;;  %v3508_v34 = vunpack.c.l.s4 %v11417_v27 }
 0x113   :  { %10012 = vmatprep.mubr.msk.f32.mxu0 %vm355_vm2, %v2824_v25  ;;  %10169 = vmatpush3.msk.msra.mxu1 %vm5074_vm10, %v8711_v59 }
 0x115   :  { %10051 = vmatmul.mubr.msk.f32.gmra.mrb[16].mxu1 %vm355_vm2, %v2817_v12  ;;  %v3510_v12 = vlaneseq }
 0x116   :  { %10013 = vmatmul.mubr.msk.f32.gmra.mrb[20].mxu0 %vm355_vm2, %v2825_v18  ;;  %10053 = vmatprep.mubr.msk.f32.mxu1 %vm355_vm2, %v2818_v33 }
 0x117   :  { %10015 = vmatprep.mubr.msk.f32.mxu0 %vm355_vm2, %v2826_v61  ;;  %v3511_v44 = vshrl.u32 %v3510_v12, 7 }
 0x119   :  { %10054 = vmatmul.mubr.msk.f32.gmra.mrb[18].mxu1 %vm355_vm2, %v2819_v7  ;;  %v13337_v7 = vld [vmem:[%s15776_s2] ss:$0 sm:$0xff]  ;;  %v13346_v3 = vsub.s32 0, %v3511_v44 }
 0x11a   :  { %10016 = vmatmul.mubr.msk.f32.gmra.mrb[22].mxu0 %vm355_vm2, %v2827_v16  ;;  %10056 = vmatprep.mubr.msk.f32.mxu1 %vm355_vm2, %v2820_v47 }
 0x11b   :  { %10018 = vmatprep.mubr.msk.f32.mxu0 %vm355_vm2, %v8483_v10 }
 0x11d   :  { %10057 = vmatmul.mubr.msk.f32.gmra.mrb[20].mxu1 %vm355_vm2, %v8482_v21  ;;  %v3509_v21 = vunpack.c.0.s8 %v3508_v34 }
 0x11e   :  { %10019 = vmatmul.mubr.msk.f32.gmra.mrb[24].mxu0 %vm355_vm2, %v2829_v51  ;;  %10059 = vmatprep.mubr.msk.f32.mxu1 %vm355_vm2, %v2822_v45 }
 0x11f   :  { %10021 = vmatprep.mubr.msk.f32.mxu0 %vm355_vm2, %v2830_v50 }
 0x121   :  { %10060 = vmatmul.mubr.msk.f32.gmra.mrb[22].mxu1 %vm355_vm2, %v2823_v58 }
 0x122   :  { %10022 = vmatmul.mubr.msk.f32.gmra.mrb[26].mxu0 %vm355_vm2, %v2831_v41  ;;  %10062 = vmatprep.mubr.msk.f32.mxu1 %vm355_vm2, %v2824_v25 }
 0x125   :  { %10063 = vmatmul.mubr.msk.f32.gmra.mrb[24].mxu1 %vm355_vm2, %v2825_v18 }
 0x126   :  { %10065 = vmatprep.mubr.msk.f32.mxu1 %vm355_vm2, %v2826_v61 }
 0x129   :  { %10066 = vmatmul.mubr.msk.f32.gmra.mrb[26].mxu1 %vm355_vm2, %v2827_v16  ;;  %v13343_v16 = vsub.s32 %v3509_v21, %v3511_v44 }
 0x12a   :  { %10068 = vmatprep.mubr.msk.f32.mxu1 %vm355_vm2, %v8483_v10 }
 0x12b   :  { %16140 = vst [vmem:[#allocation35_spill] sm:$0xff] %v13343_v16 }
 0x12d   :  { %10069 = vmatmul.mubr.msk.f32.gmra.mrb[28].mxu1 %vm355_vm2, %v2829_v51 }
 0x12e   :  { %10071 = vmatprep.mubr.msk.f32.mxu1 %vm355_vm2, %v2830_v50 }
 0x131   :  { %10072 = vmatmul.mubr.msk.f32.gmra.mrb[30].mxu1 %vm355_vm2, %v2831_v41  ;;  %vm11419_vm2 = vmmov 0  }
 0x1c1   :  { %v9984_v31 = vpop.f32.mrb[0].mxu0 }
 0x1c2   :  { %v2954_v55 = vpop.f32.mrb[1].mxu0  ;;  %v3367_v45 = vadd.f32 %v9984_v31, %v13337_v7 }
 0x1c3   :  { %v3366_v35 = vadd.f32 %v13337_v7, %v2954_v55 }
 0x1c5   :  { %v9987_v53 = vpop.f32.mrb[2].mxu0 }
 0x1c6   :  { %v2964_v60 = vpop.f32.mrb[3].mxu0  ;;  %v3369_v50 = vadd.f32 %v9987_v53, %v13337_v7 }
 0x1c7   :  { %v3368_v26 = vadd.f32 %v13337_v7, %v2964_v60 }
 0x1c9   :  { %v9990_v23 = vpop.f32.mrb[4].mxu0 }
 0x1ca   :  { %v2974_v15 = vpop.f32.mrb[5].mxu0  ;;  %v13351_v4 = vadd.f32 %v9990_v23, %v13337_v7 }
 0x1cb   :  { %v13355_v2 = vadd.f32 %v13337_v7, %v2974_v15 }
 0x1cd   :  { %v9993_v33 = vpop.f32.mrb[6].mxu0 }
 0x1ce   :  { %v2984_v47 = vpop.f32.mrb[7].mxu0  ;;  %v13359_v54 = vadd.f32 %v9993_v33, %v13337_v7 }
 0x1cf   :  { %v13365_v32 = vadd.f32 %v13337_v7, %v2984_v47 }
 0x1d0   :  { %v10034_v42 = vpop.f32.mrb[4].mxu1 }
 0x1d1   :  { %v9996_v30 = vpop.f32.mrb[8].mxu0  ;;  %v3395_v13 = vadd.f32 %v10034_v42, %v13337_v7  ;;  %v3192_v58 = vpop.f32.mrb[5].mxu1 }
 0x1d2   :  { %v2994_v25 = vpop.f32.mrb[9].mxu0  ;;  %v3394_v18 = vadd.f32 %v13337_v7, %v3192_v58  ;;  %v13378_v27 = vadd.f32 %v9996_v30, %v13337_v7 }
 0x1d3   :  { %v3423_v61 = vmax.f32 %v3367_v45, %v3395_v13  ;;  %v13381_v12 = vadd.f32 %v13337_v7, %v2994_v25 }
 0x1d4   :  { %v3422_v10 = vmax.f32 %v3366_v35, %v3394_v18  ;;  %v10037_v51 = vpop.f32.mrb[6].mxu1 }
 0x1d5   :  { %v3451_v41 = vmax.f32 %v3423_v61, 0.0  ;;  %v9999_v19 = vpop.f32.mrb[10].mxu0  ;;  %v3397_v28 = vadd.f32 %v10037_v51, %v13337_v7  ;;  %v3202_v5 = vpop.f32.mrb[7].mxu1 }
 0x1d6   :  { %v3450_v43 = vmax.f32 %v3422_v10, 0.0  ;;  %v3004_v52 = vpop.f32.mrb[11].mxu0  ;;  %v3396_v6 = vadd.f32 %v13337_v7, %v3202_v5  ;;  %v13388_v45 = vadd.f32 %v9999_v19, %v13337_v7 }
 0x1d7   :  { %v3523_v22 = vcombine.high %v3451_v41, %v3451_v41  ;;  %v3530_v14 = vrot.slane %v3451_v41, %v13343_v16  ;;  %v3425_v46 = vmax.f32 %v3369_v50, %v3397_v28  ;;  %v13391_v13 = vadd.f32 %v13337_v7, %v3004_v52 }
 0x1d8   :  { %v3506_v37 = vcombine.high %v3450_v43, %v3450_v43  ;;  %v3513_v36 = vrot.slane %v3450_v43, %v13343_v16  ;;  %v3424_v20 = vmax.f32 %v3368_v26, %v3396_v6  ;;  %v13362_v56 = vpop.f32.mrb[8].mxu1 }
 0x1d9   :  { %v3537_v39 = vrot.slane %v3523_v22, %v13343_v16  ;;  %v3538_v38 = vcombine.high %v3530_v14, %v3530_v14  ;;  %v8549_v0 = vrot.slane %v3530_v14, 9  ;;  %v13368_v8 = vpop.f32.mrb[12].mxu0  ;;  %v13370_v24 = vpop.f32.mrb[9].mxu1  ;;  %v3453_v17 = vmax.f32 %v3425_v46, 0.0 }
 0x1da   :  { %v3520_v29 = vrot.slane %v3506_v37, %v13343_v16  ;;  %v3521_v63 = vcombine.high %v3513_v36, %v3513_v36  ;;  %v8545_v48 = vrot.slane %v3513_v36, 9  ;;  %v13373_v11 = vpop.f32.mrb[13].mxu0  ;;  %v3452_v33 = vmax.f32 %v3424_v20, 0.0 }
 0x1db   :  { %v3539_v40 = vcombine.high %v3537_v39, %v3537_v39  ;;  %v8550_v62 = vrot.slane %v3538_v38, 9  ;;  %v8551_v59 = vrot.slane %v3537_v39, 9  ;;  %v4434_v31 = vmax.f32 %v3530_v14, %v8549_v0 }
 0x1dc   :  { %v3522_v55 = vcombine.high %v3520_v29, %v3520_v29  ;;  %v8546_v53 = vrot.slane %v3521_v63, 9  ;;  %v8547_v60 = vrot.slane %v3520_v29, 9  ;;  %v4430_v23 = vmax.f32 %v3513_v36, %v8545_v48  ;;  %v13375_v15 = vpop.f32.mrb[10].mxu1 }
 0x1dd   :  { %v8552_v34 = vrot.slane %v3539_v40, 9  ;;  %v13383_v47 = vpop.f32.mrb[14].mxu0  ;;  %v13385_v21 = vpop.f32.mrb[11].mxu1  ;;  %v4435_v44 = vmax.f32 %v3538_v38, %v8550_v62  ;;  %v4436_v30 = vmax.f32 %v3537_v39, %v8551_v59  ;;  %v13396_v35 = vrot.slane %v4434_v31, %v13346_v3 }
 0x1de   :  { %v4431_v42 = vmax.f32 %v3521_v63, %v8546_v53  ;;  %v13393_v58 = vpop.f32.mrb[15].mxu0  ;;  %v8548_v25 = vrot.slane %v3522_v55, 9  ;;  %v3557_v18 = vcombine.high %v3453_v17, %v3453_v17  ;;  %v4432_v61 = vmax.f32 %v3520_v29, %v8547_v60 }
 0x1df   :  { %16141 = vst [vmem:[#allocation38_spill] sm:$0xff] %v13396_v35  ;;  %v5204_v51 = vrot.slane %v4430_v23, %v13346_v3  ;;  %v3564_v50 = vrot.slane %v3453_v17, %v13343_v16  ;;  %v4437_v19 = vmax.f32 %v3539_v40, %v8552_v34  ;;  %v3540_v5 = vcombine.high %v3452_v33, %v3452_v33 }
 0x1e0   :  { %v13399_v10 = vrot.slane %v4431_v42, %v13346_v3  ;;  %v13403_v41 = vpop.f32.mrb[12].mxu1  ;;  %v3571_v28 = vrot.slane %v3557_v18, %v13343_v16  ;;  %v3547_v26 = vrot.slane %v3452_v33, %v13343_v16  ;;  %v13412_v6 = vrot.slane %v4435_v44, %v13346_v3 }
 0x1e1   :  { %v13407_v43 = vpop.f32.mrb[16].mxu0  ;;  %v13409_v52 = vpop.f32.mrb[13].mxu1  ;;  %v3572_v14 = vcombine.high %v3564_v50, %v3564_v50  ;;  %v8557_v46 = vrot.slane %v3564_v50, 9  ;;  %v3554_v39 = vrot.slane %v3540_v5, %v13343_v16  ;;  %v13422_v0 = vrot.slane %v4436_v30, %v13346_v3 }
 0x1e2   :  { %16142 = vst [vmem:[#allocation37_spill] sm:$0xff] %v13412_v6  ;;  %v13416_v22 = vsel %vm4977_vm11, %v13399_v10, %v5204_v51  ;;  %v13418_v37 = vpop.f32.mrb[17].mxu0  ;;  %v3573_v36 = vcombine.high %v3571_v28, %v3571_v28  ;;  %v8559_v20 = vrot.slane %v3571_v28, 9  ;;  %v3555_v38 = vcombine.high %v3547_v26, %v3547_v26 }
 0x1e3   :  { %16143 = vst [vmem:[#allocation39_spill] sm:$0xff] %v13416_v22  ;;  %16144 = vst [vmem:[#allocation33_spill] sm:$0xff] %v13422_v0  ;;  %v4433_v29 = vmax.f32 %v3522_v55, %v8548_v25  ;;  %v8558_v63 = vrot.slane %v3572_v14, 9  ;;  %v8553_v48 = vrot.slane %v3547_v26, 9  ;;  %v4442_v62 = vmax.f32 %v3564_v50, %v8557_v46 }
 0x1e4   :  { %v13424_v17 = vpop.f32.mrb[14].mxu1  ;;  %v8560_v40 = vrot.slane %v3573_v36, 9  ;;  %v3556_v59 = vcombine.high %v3554_v39, %v3554_v39  ;;  %v8554_v31 = vrot.slane %v3555_v38, 9  ;;  %v13431_v23 = vrot.slane %v4437_v19, %v13346_v3 }
 0x1e5   :  { %v13426_v53 = vpop.f32.mrb[18].mxu0  ;;  %v13428_v60 = vpop.f32.mrb[15].mxu1  ;;  %v13434_v34 = vrot.slane %v4432_v61, %v13346_v3  ;;  %v13436_v33 = vmax.f32 %v3571_v28, %v8559_v20  ;;  %v8555_v55 = vrot.slane %v3554_v39, 9  ;;  %v4443_v42 = vmax.f32 %v3572_v14, %v8558_v63 }
 0x1e6   :  { %16145 = vst [vmem:[#allocation6_spill] sm:$0xff] %v13431_v23  ;;  %v13438_v44 = vpop.f32.mrb[19].mxu0  ;;  %v8556_v30 = vrot.slane %v3556_v59, 9  ;;  %v4438_v25 = vmax.f32 %v3547_v26, %v8553_v48  ;;  %v4439_v18 = vmax.f32 %v3555_v38, %v8554_v31  ;;  %v13441_v51 = vrot.slane %v4433_v29, %v13346_v3 }
 0x1e7   :  { %16146 = vst [vmem:[#allocation5_spill] sm:$0xff] %v13436_v33  ;;  %v4445_v50 = vmax.f32 %v3573_v36, %v8560_v40  ;;  %v4440_v5 = vmax.f32 %v3554_v39, %v8555_v55  ;;  %v3399_v19 = vadd.f32 %v13362_v56, %v13337_v7  ;;  %v6122_v28 = vrot.slane %v4442_v62, %v13346_v3 }
 0x1e8   :  { %16147 = vst [vmem:[#allocation8_spill] sm:$0xff] %v13441_v51  ;;  %v13445_v61 = vpop.f32.mrb[16].mxu1  ;;  %v4441_v46 = vmax.f32 %v3556_v59, %v8556_v30  ;;  %v13449_v20 = vrot.slane %v4439_v18, %v13346_v3  ;;  %v13453_v26 = vadd.f32 %v13368_v8, %v13337_v7  ;;  %v3398_v29 = vadd.f32 %v13337_v7, %v13370_v24 }
 0x1e9   :  { %v13455_v14 = vpop.f32.mrb[20].mxu0  ;;  %v13457_v36 = vpop.f32.mrb[17].mxu1  ;;  %v13462_v39 = vrot.slane %v4440_v5, %v13346_v3  ;;  %v3427_v38 = vmax.f32 %v13351_v4, %v3399_v19  ;;  %v6532_v8 = vrot.slane %v4443_v42, %v13346_v3  ;;  %v13471_v48 = vrot.slane %v4438_v25, %v13346_v3 }
 0x1ea   :  { %16148 = vst [vmem:[#allocation12_spill] sm:$0xff] %v13449_v20  ;;  %v13467_v63 = vpop.f32.mrb[21].mxu0  ;;  %v13474_v40 = vrot.slane %v4441_v46, %v13346_v3  ;;  %v3401_v62 = vadd.f32 %v13375_v15, %v13337_v7  ;;  %v13479_v59 = vrot.slane %v4445_v50, %v13346_v3  ;;  %v3426_v31 = vmax.f32 %v13355_v2, %v3398_v29 }
 0x1eb   :  { %16149 = vst [vmem:[#allocation26_spill] sm:$0xff] %v13462_v39  ;;  %16150 = vst [vmem:[#allocation14_spill] sm:$0xff] %v13471_v48  ;;  %v3455_v4 = vmax.f32 %v3427_v38, 0.0  ;;  %v3400_v24 = vadd.f32 %v13337_v7, %v13385_v21  ;;  %v13492_v30 = vadd.f32 %v13337_v7, %v13373_v11  ;;  %v4990_v15 = vsel %vm4977_vm11, %v13462_v39, %v13449_v20 }
 0x1ec   :  { %16151 = vst [vmem:[#allocation23_spill] sm:$0xff] %v13474_v40  ;;  %16152 = vst [vmem:[#allocation2_spill] sm:$0xff] %v13479_v59  ;;  %v13484_v55 = vpop.f32.mrb[18].mxu1  ;;  %v13488_v42 = vsel %vm4977_vm11, %v6122_v28, %v13474_v40  ;;  %v3429_v25 = vmax.f32 %v13359_v54, %v3401_v62  ;;  %v3454_v5 = vmax.f32 %v3426_v31, 0.0  ;;  %v13507_v11 = vsel %vm4977_vm11, %v6532_v8, %v6122_v28 }
 0x1ed   :  { %16153 = vst [vmem:[#allocation24_spill] sm:$0xff] %v13488_v42  ;;  %v13498_v2 = vpop.f32.mrb[22].mxu0  ;;  %v13500_v18 = vpop.f32.mrb[19].mxu1  ;;  %v3591_v21 = vcombine.high %v3455_v4, %v3455_v4  ;;  %v3598_v50 = vrot.slane %v3455_v4, %v13343_v16  ;;  %v3428_v19 = vmax.f32 %v13365_v32, %v3400_v24  ;;  %16154 = vst [vmem:[#allocation3_spill] sm:$0xff] %v13507_v11 }
 0x1ee   :  { %v13504_v46 = vpop.f32.mrb[23].mxu0  ;;  %v13511_v38 = vadd.f32 %v13383_v47, %v13337_v7  ;;  %v3457_v54 = vmax.f32 %v3429_v25, 0.0  ;;  %v13515_v29 = vadd.f32 %v13337_v7, %v13393_v58  ;;  %v3574_v56 = vcombine.high %v3454_v5, %v3454_v5 }
 0x1ef   :  { %v3605_v62 = vrot.slane %v3591_v21, %v13343_v16  ;;  %v3606_v4 = vcombine.high %v3598_v50, %v3598_v50  ;;  %v8565_v31 = vrot.slane %v3598_v50, 9  ;;  %v3581_v24 = vrot.slane %v3454_v5, %v13343_v16 }
 0x1f0   :  { %16155 = vst [vmem:[#allocation27_spill] sm:$0xff] %v13515_v29  ;;  %v13518_v32 = vpop.f32.mrb[20].mxu1  ;;  %v4991_v28 = vsel %vm4979_vm12, %v13479_v59, %v4990_v15  ;;  %v5748_v47 = vsel %vm4977_vm11, %v13474_v40, %v13462_v39  ;;  %v3625_v8 = vcombine.high %v3457_v54, %v3457_v54  ;;  %v3632_v33 = vrot.slane %v3457_v54, %v13343_v16 }
 0x1f1   :  { %16156 = vst [vmem:[#allocation10_spill] sm:$0xff] %v13518_v32  ;;  %v13526_v25 = vpop.f32.mrb[24].mxu0  ;;  %v13528_v58 = vpop.f32.mrb[21].mxu1  ;;  %v3607_v21 = vcombine.high %v3605_v62, %v3605_v62  ;;  %v8566_v11 = vrot.slane %v3606_v4, 9  ;;  %v8567_v42 = vrot.slane %v3605_v62, 9  ;;  %v4450_v5 = vmax.f32 %v3598_v50, %v8565_v31 }
 0x1f2   :  { %16157 = vst [vmem:[#allocation15_spill] sm:$0xff] %v13526_v25  ;;  %16158 = vst [vmem:[#allocation4_spill] sm:$0xff] %v13528_v58  ;;  %v13531_v20 = vpop.f32.mrb[25].mxu0  ;;  %v3588_v15 = vrot.slane %v3574_v56, %v13343_v16  ;;  %v3589_v59 = vcombine.high %v3581_v24, %v3581_v24  ;;  %v8561_v22 = vrot.slane %v3581_v24, 9  ;;  %v3639_v9 = vrot.slane %v3625_v8, %v13343_v16 }
 0x1f3   :  { %16159 = vst [vmem:[#allocation16_spill] sm:$0xff] %v13531_v20  ;;  %v8568_v49 = vrot.slane %v3607_v21, 9  ;;  %v4451_v40 = vmax.f32 %v3606_v4, %v8566_v11  ;;  %v4452_v39 = vmax.f32 %v3605_v62, %v8567_v42  ;;  %v3640_v31 = vcombine.high %v3632_v33, %v3632_v33 }
 0x1f4   :  { %v13535_v1 = vpop.f32.mrb[22].mxu1  ;;  %v3590_v58 = vcombine.high %v3588_v15, %v3588_v15  ;;  %v8562_v32 = vrot.slane %v3589_v59, 9  ;;  %v8563_v25 = vrot.slane %v3588_v15, 9  ;;  %v4446_v57 = vmax.f32 %v3581_v24, %v8561_v22 }
 0x1f5   :  { %16160 = vst [vmem:[#allocation7_spill] sm:$0xff] %v13535_v1  ;;  %v13537_v29 = vpop.f32.mrb[26].mxu0  ;;  %v13539_v54 = vpop.f32.mrb[23].mxu1  ;;  %v4453_v50 = vmax.f32 %v3607_v21, %v8568_v49  ;;  %v3456_v56 = vmax.f32 %v3428_v19, 0.0  ;;  %v13543_v20 = vadd.f32 %v13407_v43, %v13337_v7  ;;  %v3641_v22 = vcombine.high %v3639_v9, %v3639_v9 }
 0x1f6   :  { %16161 = vst [vmem:[#allocation17_spill] sm:$0xff] %v13537_v29  ;;  %16162 = vst [vmem:[#allocation9_spill] sm:$0xff] %v13539_v54  ;;  %v13545_v42 = vpop.f32.mrb[27].mxu0  ;;  %v8564_v11 = vrot.slane %v3590_v58, 9  ;;  %v4447_v62 = vmax.f32 %v3589_v59, %v8562_v32  ;;  %v4448_v4 = vmax.f32 %v3588_v15, %v8563_v25  ;;  %v13548_v8 = vrot.slane %v4446_v57, %v13346_v3 }
 0x1f7   :  { %16163 = vst [vmem:[#allocation13_spill] sm:$0xff] %v13545_v42  ;;  %v8573_v24 = vrot.slane %v3632_v33, 9  ;;  %v3403_v54 = vadd.f32 %v13403_v41, %v13337_v7  ;;  %v13554_v49 = vadd.f32 %v13337_v7, %v13418_v37  ;;  %v13559_v43 = vrot.slane %v4450_v5, %v13346_v3 }
 0x1f8   :  { %16164 = vst [vmem:[#allocation18_spill] sm:$0xff] %v13548_v8  ;;  %v13556_v19 = vpop.f32.mrb[24].mxu1  ;;  %v13562_v59 = vrot.slane %v4451_v40, %v13346_v3  ;;  %v13565_v57 = vrot.slane %v4452_v39, %v13346_v3  ;;  %v4449_v32 = vmax.f32 %v3590_v58, %v8564_v11  ;;  %v13570_v41 = vrot.slane %v4453_v50, %v13346_v3 }
 0x1f9   :  { %16165 = vst [vmem:[#allocation19_spill] sm:$0xff] %v13554_v49  ;;  %16166 = vst [vmem:[#allocation11_spill] sm:$0xff] %v13556_v19  ;;  %v13567_v25 = vpop.f32.mrb[25].mxu1  ;;  %v13573_v37 = vrot.slane %v4447_v62, %v13346_v3  ;;  %v13576_v21 = vrot.slane %v4448_v4, %v13346_v3  ;;  %v8574_v5 = vrot.slane %v3640_v31, 9  ;;  %v13580_v40 = vsel %vm4981_vm13, %v13548_v8, %v4991_v28 }
 0x1fa   :  { %16167 = vst [vmem:[#allocation20_spill] sm:$0xff] %v13559_v43  ;;  %16168 = vst [vmem:[#allocation21_spill] sm:$0xff] %v13562_v59  ;;  %v8575_v15 = vrot.slane %v3639_v9, 9  ;;  %v3608_v39 = vcombine.high %v3456_v56, %v3456_v56  ;;  %v3615_v58 = vrot.slane %v3456_v56, %v13343_v16  ;;  %v13585_v11 = vsel %vm4979_vm12, %v13548_v8, %v5748_v47 }
 0x1fb   :  { %16169 = vst [vmem:[#allocation30_spill] sm:$0xff] %v13565_v57  ;;  %16170 = vst [vmem:[#allocation22_spill] sm:$0xff] %v13567_v25  ;;  %v8576_v50 = vrot.slane %v3641_v22, 9  ;;  %v13587_v25 = vmax.f32 %v3632_v33, %v8573_v24  ;;  %v3431_v62 = vmax.f32 %v13378_v27, %v3403_v54  ;;  %v13593_v19 = vrot.slane %v4449_v32, %v13346_v3 }
 0x1fc   :  { %16171 = vst [vmem:[#allocation31_spill] sm:$0xff] %v13570_v41  ;;  %16172 = vst [vmem:[#allocation29_spill] sm:$0xff] %v13573_v37  ;;  %v13590_v4 = vpop.f32.mrb[26].mxu1  ;;  %v3622_v28 = vrot.slane %v3608_v39, %v13343_v16  ;;  %v3623_v42 = vcombine.high %v3615_v58, %v3615_v58  ;;  %v8569_v1 = vrot.slane %v3615_v58, 9  ;;  %v4459_v56 = vmax.f32 %v3640_v31, %v8574_v5 }
 0x1fd   :  { %16173 = vst [vmem:[#allocation32_spill] sm:$0xff] %v13576_v21  ;;  %16174 = vst [vmem:[#allocation40_spill] sm:$0xff] %v13585_v11  ;;  %v13596_v29 = vpop.f32.mrb[27].mxu1  ;;  %v3459_v41 = vmax.f32 %v3431_v62, 0.0  ;;  %v3402_v47 = vadd.f32 %v13337_v7, %v13409_v52  ;;  %v3405_v33 = vadd.f32 %v13424_v17, %v13337_v7  ;;  %v13602_v27 = vmax.f32 %v3639_v9, %v8575_v15 }
 0x1fe   :  { %16175 = vst [vmem:[#allocation41_spill] sm:$0xff] %v13587_v25  ;;  %16176 = vst [vmem:[#allocation42_spill] sm:$0xff] %v13590_v4  ;;  %v3624_v54 = vcombine.high %v3622_v28, %v3622_v28  ;;  %v8570_v24 = vrot.slane %v3623_v42, 9  ;;  %v8571_v32 = vrot.slane %v3622_v28, 9  ;;  %v4454_v62 = vmax.f32 %v3615_v58, %v8569_v1 }
 0x1ff   :  { %16177 = vst [vmem:[#allocation43_spill] sm:$0xff] %v13593_v19  ;;  %16178 = vst [vmem:[#allocation44_spill] sm:$0xff] %v13596_v29  ;;  %v3659_v11 = vcombine.high %v3459_v41, %v3459_v41  ;;  %v3666_v39 = vrot.slane %v3459_v41, %v13343_v16  ;;  %v3430_v8 = vmax.f32 %v13381_v12, %v3402_v47 }
 0x200   :  { %v3433_v29 = vmax.f32 %v13388_v45, %v3405_v33  ;;  %v13607_v31 = vpop.f32.mrb[28].mxu1  ;;  %v8572_v5 = vrot.slane %v3624_v54, 9  ;;  %v4455_v52 = vmax.f32 %v3623_v42, %v8570_v24  ;;  %v4456_v4 = vmax.f32 %v3622_v28, %v8571_v32 }
 0x201   :  { %16179 = vst [vmem:[#allocation45_spill] sm:$0xff] %v13607_v31  ;;  %v13609_v49 = vpop.f32.mrb[29].mxu1  ;;  %v3673_v9 = vrot.slane %v3659_v11, %v13343_v16  ;;  %v3674_v17 = vcombine.high %v3666_v39, %v3666_v39  ;;  %v8581_v15 = vrot.slane %v3666_v39, 9  ;;  %v3458_v57 = vmax.f32 %v3430_v8, 0.0 }
 0x202   :  { %16180 = vst [vmem:[#allocation46_spill] sm:$0xff] %v13609_v49  ;;  %v13612_v59 = vmax.f32 %v3641_v22, %v8576_v50  ;;  %v13615_v41 = vrot.slane %v4459_v56, %v13346_v3  ;;  %v3461_v45 = vmax.f32 %v3433_v29, 0.0  ;;  %v13621_v58 = vadd.f32 %v13426_v53, %v13337_v7 }
 0x203   :  { %v3675_v47 = vcombine.high %v3673_v9, %v3673_v9  ;;  %v8582_v1 = vrot.slane %v3674_v17, 9  ;;  %v8583_v42 = vrot.slane %v3673_v9, 9  ;;  %v13626_v8 = vrot.slane %v4454_v62, %v13346_v3 }
 0x204   :  { %16181 = vst [vmem:[#allocation47_spill] sm:$0xff] %v13615_v41  ;;  %16182 = vst [vmem:[#allocation48_spill] sm:$0xff] %v13621_v58  ;;  %v13623_v11 = vpop.f32.mrb[30].mxu1  ;;  %v3642_v22 = vcombine.high %v3458_v57, %v3458_v57  ;;  %v3649_v50 = vrot.slane %v3458_v57, %v13343_v16  ;;  %v3693_v28 = vcombine.high %v3461_v45, %v3461_v45 }
 0x205   :  { %16183 = vst [vmem:[#allocation49_spill] sm:$0xff] %v13623_v11  ;;  %16184 = vst [vmem:[#allocation50_spill] sm:$0xff] %v13626_v8  ;;  %v13629_v56 = vpop.f32.mrb[31].mxu1  ;;  %v13631_v33 = vmax.f32 %v3624_v54, %v8572_v5  ;;  %v13634_v29 = vrot.slane %v4455_v52, %v13346_v3  ;;  %v13637_v24 = vrot.slane %v4456_v4, %v13346_v3  ;;  %v8584_v11 = vrot.slane %v3675_v47, 9 }
 0x206   :  { %16185 = vst [vmem:[#allocation51_spill] sm:$0xff] %v13629_v56  ;;  %v4466_v53 = vmax.f32 %v3666_v39, %v8581_v15  ;;  %v3656_v32 = vrot.slane %v3642_v22, %v13343_v16  ;;  %v3657_v12 = vcombine.high %v3649_v50, %v3649_v50  ;;  %v8577_v62 = vrot.slane %v3649_v50, 9 }
 0x207   :  { %16186 = vst [vmem:[#allocation52_spill] sm:$0xff] %v13631_v33  ;;  %16187 = vst [vmem:[#allocation53_spill] sm:$0xff] %v13634_v29  ;;  %v3700_v25 = vrot.slane %v3461_v45, %v13343_v16  ;;  %v4467_v57 = vmax.f32 %v3674_v17, %v8582_v1  ;;  %v4468_v49 = vmax.f32 %v3673_v9, %v8583_v42 }
 0x208   :  { %16188 = vst [vmem:[#allocation54_spill] sm:$0xff] %v13637_v24  ;;  %v3707_v56 = vrot.slane %v3693_v28, %v13343_v16  ;;  %v3658_v54 = vcombine.high %v3656_v32, %v3656_v32  ;;  %v8578_v5 = vrot.slane %v3657_v12, 9  ;;  %v8579_v31 = vrot.slane %v3656_v32, 9 }
 0x209   :  { %v4462_v52 = vmax.f32 %v3649_v50, %v8577_v62  ;;  %v3708_v29 = vcombine.high %v3700_v25, %v3700_v25  ;;  %v8589_v4 = vrot.slane %v3700_v25, 9  ;;  %v13645_v45 = vrot.slane %v4466_v53, %v13346_v3 }
 0x20a   :  { %v3709_v58 = vcombine.high %v3707_v56, %v3707_v56  ;;  %v8591_v24 = vrot.slane %v3707_v56, 9  ;;  %v8580_v15 = vrot.slane %v3658_v54, 9  ;;  %v4463_v22 = vmax.f32 %v3657_v12, %v8578_v5 }
 0x20b   :  { %v4464_v41 = vmax.f32 %v3656_v32, %v8579_v31  ;;  %16189 = vst [vmem:[#allocation55_spill] sm:$0xff] %v13645_v45  ;;  %v8590_v9 = vrot.slane %v3708_v29, 9  ;;  %v13647_v42 = vmax.f32 %v3675_v47, %v8584_v11  ;;  %v13650_v50 = vrot.slane %v4467_v57, %v13346_v3 }
 0x20c   :  { %v8592_v17 = vrot.slane %v3709_v58, 9  ;;  %v4476_v1 = vmax.f32 %v3707_v56, %v8591_v24  ;;  %v13653_v28 = vrot.slane %v4468_v49, %v13346_v3  ;;  %v4465_v62 = vmax.f32 %v3658_v54, %v8580_v15 }
 0x20d   :  { %16190 = vst [vmem:[#allocation56_spill] sm:$0xff] %v13647_v42  ;;  %16191 = vst [vmem:[#allocation57_spill] sm:$0xff] %v13650_v50  ;;  %v13656_v39 = vrot.slane %v4462_v52, %v13346_v3  ;;  %v13659_v31 = vrot.slane %v4463_v22, %v13346_v3  ;;  %v13661_v12 = vmax.f32 %v3700_v25, %v8589_v4 }
 0x20e   :  { %16192 = vst [vmem:[#allocation58_spill] sm:$0xff] %v13653_v28  ;;  %v3404_v47 = vadd.f32 %v13337_v7, %v13428_v60  ;;  %v13666_v11 = vrot.slane %v4464_v41, %v13346_v3  ;;  %v4475_v56 = vmax.f32 %v3708_v29, %v8590_v9  ;;  %v13670_v49 = vadd.f32 %v13337_v7, %v13438_v44 }
 0x20f   :  { %16193 = vst [vmem:[#allocation59_spill] sm:$0xff] %v13656_v39  ;;  %16194 = vst [vmem:[#allocation60_spill] sm:$0xff] %v13659_v31  ;;  %v3407_v24 = vadd.f32 %v13445_v61, %v13337_v7  ;;  %v4477_v53 = vmax.f32 %v3709_v58, %v8592_v17  ;;  %v13675_v32 = vrot.slane %v4476_v1, %v13346_v3 }
 0x210   :  { %16195 = vst [vmem:[#allocation61_spill] sm:$0xff] %v13666_v11  ;;  %v3432_v25 = vmax.f32 %v13391_v13, %v3404_v47  ;;  %v3406_v60 = vadd.f32 %v13337_v7, %v13457_v36  ;;  %v13681_v41 = vrot.slane %v4465_v62, %v13346_v3  ;;  %v4978_v44 = vsel %vm4977_vm11, %v13434_v34, %v13399_v10 }
 0x211   :  { %16196 = vst [vmem:[#allocation62_spill] sm:$0xff] %v13675_v32  ;;  %v3435_v29 = vmax.f32 %v13453_v26, %v3407_v24  ;;  %v3409_v61 = vadd.f32 %v13484_v55, %v13337_v7  ;;  %v13691_v13 = vadd.f32 %v13455_v14, %v13337_v7  ;;  %v4980_v57 = vsel %vm4979_vm12, %v13441_v51, %v4978_v44 }
 0x212   :  { %16197 = vst [vmem:[#allocation63_spill] sm:$0xff] %v13681_v41  ;;  %v3460_v58 = vmax.f32 %v3432_v25, 0.0  ;;  %v3434_v36 = vmax.f32 %v13492_v30, %v3406_v60  ;;  %v13698_v54 = vadd.f32 %v13337_v7, %v13467_v63  ;;  %v4982_v10 = vsel %vm4981_vm13, %v13396_v35, %v4980_v57 }
 0x213   :  { %v3463_v26 = vmax.f32 %v3435_v29, 0.0  ;;  %v3437_v55 = vmax.f32 %v13511_v38, %v3409_v61  ;;  %v13704_v5 = vrot.slane %v4475_v56, %v13346_v3  ;;  %v13708_v4 = vrot.slane %v4477_v53, %v13346_v3 }
 0x214   :  { %v3676_v14 = vcombine.high %v3460_v58, %v3460_v58  ;;  %v3683_v30 = vrot.slane %v3460_v58, %v13343_v16  ;;  %v3462_v52 = vmax.f32 %v3434_v36, 0.0  ;;  %v4983_v63 = vsel %vm2061_vm8, %v13412_v6, %v4982_v10 }
 0x215   :  { %16198 = vst [vmem:[#allocation64_spill] sm:$0xff] %v13704_v5  ;;  %v3727_v15 = vcombine.high %v3463_v26, %v3463_v26  ;;  %v3734_v22 = vrot.slane %v3463_v26, %v13343_v16  ;;  %v13716_v1 = vadd.f32 %v13498_v2, %v13337_v7  ;;  %v4985_v25 = vsel %vm4984_vm14, %v13422_v0, %v4983_v63 }
 0x216   :  { %v3690_v9 = vrot.slane %v3676_v14, %v13343_v16  ;;  %v3691_v17 = vcombine.high %v3683_v30, %v3683_v30  ;;  %v8585_v38 = vrot.slane %v3683_v30, 9  ;;  %v3710_v56 = vcombine.high %v3462_v52, %v3462_v52 }
 0x217   :  { %v13719_v62 = vrot.slane %v3727_v15, %v13343_v16  ;;  %v8597_v47 = vrot.slane %v3734_v22, 9  ;;  %v3717_v24 = vrot.slane %v3462_v52, %v13343_v16  ;;  %v3465_v60 = vmax.f32 %v3437_v55, 0.0 }
 0x218   :  { %v13722_v53 = vcombine.high %v3690_v9, %v3690_v9  ;;  %v3408_v29 = vadd.f32 %v13337_v7, %v13500_v18  ;;  %v8586_v44 = vrot.slane %v3691_v17, 9  ;;  %v8587_v61 = vrot.slane %v3690_v9, 9 }
 0x219   :  { %16199 = vst [vmem:[#allocation65_spill] sm:$0xff] %v13719_v62  ;;  %v13728_v2 = vcombine.high %v3734_v22, %v3734_v22  ;;  %v13732_v58 = vadd.f32 %v13337_v7, %v13504_v46  ;;  %v4470_v57 = vmax.f32 %v3683_v30, %v8585_v38  ;;  %v13737_v26 = vcombine.high %v13719_v62, %v13719_v62  ;;  %v16202_v30 = vld [vmem:[#allocation27_spill] sm:$0xff] }
 0x21a   :  { %v13739_v10 = vmax.f32 %v3734_v22, %v8597_v47  ;;  %v3724_v55 = vrot.slane %v3710_v56, %v13343_v16  ;;  %v3725_v18 = vcombine.high %v3717_v24, %v3717_v24  ;;  %v8593_v14 = vrot.slane %v3717_v24, 9 }
 0x21b   :  { %16200 = vst [vmem:[#allocation66_spill] sm:$0xff] %v13728_v2  ;;  %16201 = vst [vmem:[#allocation67_spill] sm:$0xff] %v13737_v26  ;;  %v4987_v52 = vsel %vm4986_vm15, %v13431_v23, %v4985_v25  ;;  %v3761_v15 = vcombine.high %v3465_v60, %v3465_v60  ;;  %v3768_v63 = vrot.slane %v3465_v60, %v13343_v16 }
 0x21c   :  { %v4989_v46 = vsel %vm4988_vm0, %v13471_v48, %v4987_v52  ;;  %v3436_v38 = vmax.f32 %v16202_v30, %v3408_v29  ;;  %v3726_v36 = vcombine.high %v3724_v55, %v3724_v55  ;;  %v8594_v33 = vrot.slane %v3725_v18, 9 }
 0x21d   :  { %v8595_v26 = vrot.slane %v3724_v55, 9  ;;  %v4478_v22 = vmax.f32 %v3717_v24, %v8593_v14  ;;  %10096 = vmatprep.mubr.msk.f32.mxu0 %vm5053_vm1, %v4989_v46  ;;  %10170 = vmatprep.mubr.msk.f32.mxu1 %vm5053_vm1, %v4989_v46  ;;  %v3775_v47 = vrot.slane %v3761_v15, %v13343_v16  ;;  %v3776_v56 = vcombine.high %v3768_v63, %v3768_v63 }
 0x21e   :  { %v8605_v25 = vrot.slane %v3768_v63, 9  ;;  %v3464_v62 = vmax.f32 %v3436_v38, 0.0  ;;  %v13751_v42 = vmax.f32 %v3691_v17, %v8586_v44  ;;  %v8596_v52 = vrot.slane %v3726_v36, 9 }
 0x21f   :  { %v4479_v2 = vmax.f32 %v3725_v18, %v8594_v33  ;;  %v4480_v60 = vmax.f32 %v3724_v55, %v8595_v26  ;;  %v3777_v23 = vcombine.high %v3775_v47, %v3775_v47  ;;  %v8606_v29 = vrot.slane %v3776_v56, 9 }
 0x220   :  { %16203 = vst [vmem:[#allocation27_spill] sm:$0xff] %v13751_v42  ;;  %v8607_v30 = vrot.slane %v3775_v47, 9  ;;  %v4490_v0 = vmax.f32 %v3768_v63, %v8605_v25  ;;  %v13753_v48 = vmax.f32 %v3690_v9, %v8587_v61  ;;  %v13756_v24 = vrot.slane %v4470_v57, %v13346_v3  ;;  %v16214_v42 = vld [vmem:[#allocation16_spill] sm:$0xff] }
 0x221   :  { %v13759_v14 = vrot.slane %v4478_v22, %v13346_v3  ;;  %v3744_v46 = vcombine.high %v3464_v62, %v3464_v62  ;;  %v4481_v15 = vmax.f32 %v3726_v36, %v8596_v52  ;;  %v13762_v17 = vrot.slane %v4479_v2, %v13346_v3  ;;  %v16210_v52 = vld [vmem:[#allocation28_spill] sm:$0xff] }
 0x222   :  { %16204 = vst [vmem:[#allocation68_spill] sm:$0xff] %v13753_v48  ;;  %16205 = vst [vmem:[#allocation69_spill] sm:$0xff] %v13756_v24  ;;  %v13765_v33 = vrot.slane %v4480_v60, %v13346_v3  ;;  %v8608_v44 = vrot.slane %v3777_v23, 9  ;;  %v4491_v26 = vmax.f32 %v3776_v56, %v8606_v29  ;;  %v3751_v55 = vrot.slane %v3464_v62, %v13343_v16 }
 0x223   :  { %16206 = vst [vmem:[#allocation70_spill] sm:$0xff] %v13762_v17  ;;  %v3758_v9 = vrot.slane %v3744_v46, %v13343_v16  ;;  %v4993_v61 = vsel %vm2061_vm8, %v13573_v37, %v13580_v40  ;;  %v4492_v57 = vmax.f32 %v3775_v47, %v8607_v30  ;;  %v13773_v36 = vrot.slane %v4490_v0, %v13346_v3  ;;  %v16211_v40 = vld [vmem:[#allocation15_spill] sm:$0xff]  ;;  %v16226_v37 = vld [vmem:[#allocation48_spill] sm:$0xff] }
 0x224   :  { %16207 = vst [vmem:[#allocation71_spill] sm:$0xff] %v13765_v33  ;;  %v4493_v18 = vmax.f32 %v3777_v23, %v8608_v44  ;;  %v4994_v2 = vsel %vm4984_vm14, %v13576_v21, %v4993_v61  ;;  %v3759_v63 = vcombine.high %v3751_v55, %v3751_v55  ;;  %v8601_v22 = vrot.slane %v3751_v55, 9  ;;  %v16212_v23 = vld [vmem:[#allocation10_spill] sm:$0xff] }
 0x225   :  { %16208 = vst [vmem:[#allocation72_spill] sm:$0xff] %v13773_v36  ;;  %v3760_v38 = vcombine.high %v3758_v9, %v3758_v9  ;;  %v8603_v56 = vrot.slane %v3758_v9, 9  ;;  %v13778_v62 = vrot.slane %v4481_v15, %v13346_v3  ;;  %v4995_v25 = vsel %vm4986_vm15, %v13593_v19, %v4994_v2  ;;  %v16213_v2 = vld [vmem:[#allocation25_spill] sm:$0xff] }
 0x226   :  { %v11036_v47 = vadd.f32 %v16211_v40, %v16210_v52  ;;  %v3411_v0 = vadd.f32 %v16212_v23, %v13337_v7  ;;  %v8602_v60 = vrot.slane %v3759_v63, 9  ;;  %v13786_v30 = vmax.f32 %v3751_v55, %v8601_v22 }
 0x227   :  { %16209 = vst [vmem:[#allocation73_spill] sm:$0xff] %v13778_v62  ;;  %v8604_v29 = vrot.slane %v3760_v38, 9  ;;  %v4488_v46 = vmax.f32 %v3758_v9, %v8603_v56  ;;  %v13789_v44 = vrot.slane %v4491_v26, %v13346_v3  ;;  %v4996_v15 = vsel %vm4988_vm0, %v13559_v43, %v4995_v25  ;;  %v16218_v25 = vld [vmem:[#allocation30_spill] sm:$0xff] }
 0x228   :  { %v3439_v61 = vmax.f32 %v13543_v20, %v3411_v0  ;;  %v11037_v24 = vadd.f32 %v16214_v42, %v16213_v2  ;;  %v13797_v52 = vrot.slane %v4492_v57, %v13346_v3  ;;  %v13800_v40 = vrot.slane %v4493_v18, %v13346_v3  ;;  %10097 = vmatmul.mubr.msk.f32.vlgmr.msra.gmra.mrb[28].mxu0 %vm5053_vm1, %v4996_v15  ;;  %v16215_v42 = vld [vmem:[#allocation4_spill] sm:$0xff] }
 0x229   :  { %v4487_v55 = vmax.f32 %v3759_v63, %v8602_v60  ;;  %v13804_v26 = vadd.f32 %v11036_v47, %v13337_v7  ;;  %v4489_v9 = vmax.f32 %v3760_v38, %v8604_v29  ;;  %v13807_v22 = vrot.slane %v4488_v46, %v13346_v3  ;;  %10171 = vmatmul.mubr.msk.f32.vlgmr.msra.gmra.mrb[32].mxu1 %vm5053_vm1, %v4996_v15  ;;  %v16217_v38 = vld [vmem:[#allocation21_spill] sm:$0xff]  ;;  %v16219_v60 = vld [vmem:[#allocation19_spill] sm:$0xff] }
 0x22a   :  { %v3467_v20 = vmax.f32 %v3439_v61, 0.0  ;;  %v3410_v57 = vadd.f32 %v13337_v7, %v16215_v42  ;;  %v5220_v18 = vrot.slane %v13786_v30, %v13346_v3  ;;  %v13815_v63 = vadd.f32 %v11037_v24, %v13337_v7  ;;  %v16220_v46 = vld [vmem:[#allocation31_spill] sm:$0xff]  ;;  %v16222_v61 = vld [vmem:[#allocation17_spill] sm:$0xff] }
 0x22b   :  { %v13819_v56 = vrot.slane %v13602_v27, %v13346_v3  ;;  %v4997_v47 = vsel %vm4977_vm11, %v16218_v25, %v16217_v38  ;;  %v13829_v30 = vrot.slane %v4487_v55, %v13346_v3  ;;  %v16221_v27 = vld [vmem:[#allocation34_spill] sm:$0xff]  ;;  %v16223_v42 = vld [vmem:[#allocation7_spill] sm:$0xff] }
 0x22c   :  { %v3795_v23 = vcombine.high %v3467_v20, %v3467_v20  ;;  %v3802_v0 = vrot.slane %v3467_v20, %v13343_v16  ;;  %v3438_v29 = vmax.f32 %v16219_v60, %v3410_v57  ;;  %v4998_v15 = vsel %vm4979_vm12, %v16220_v46, %v4997_v47  ;;  %v16225_v55 = vld [vmem:[#allocation47_spill] sm:$0xff]  ;;  %v16228_v46 = vld [vmem:[#allocation13_spill] sm:$0xff] }
 0x22d   :  { %16216 = vst [vmem:[#allocation28_spill] sm:$0xff] %v13819_v56  ;;  %v4999_v24 = vsel %vm4981_vm13, %v13626_v8, %v4998_v15  ;;  %v11038_v2 = vadd.f32 %v16222_v61, %v16221_v27  ;;  %v3413_v48 = vadd.f32 %v16223_v42, %v13337_v7  ;;  %v13840_v47 = vrot.slane %v13612_v59, %v13346_v3  ;;  %v16227_v8 = vld [vmem:[#allocation36_spill] sm:$0xff] }
 0x22e   :  { %v3809_v19 = vrot.slane %v3795_v23, %v13343_v16  ;;  %v3810_v20 = vcombine.high %v3802_v0, %v3802_v0  ;;  %v8613_v21 = vrot.slane %v3802_v0, 9  ;;  %v3466_v57 = vmax.f32 %v3438_v29, 0.0 }
 0x22f   :  { %16224 = vst [vmem:[#allocation15_spill] sm:$0xff] %v13840_v47  ;;  %v5000_v60 = vsel %vm2061_vm8, %v16225_v55, %v4999_v24  ;;  %v3441_v15 = vmax.f32 %v16226_v37, %v3413_v48  ;;  %v11039_v27 = vadd.f32 %v16228_v46, %v16227_v8  ;;  %v13848_v23 = vrot.slane %v4489_v9, %v13346_v3 }
 0x230   :  { %v3811_v61 = vcombine.high %v3809_v19, %v3809_v19  ;;  %v8614_v25 = vrot.slane %v3810_v20, 9  ;;  %v8615_v42 = vrot.slane %v3809_v19, 9  ;;  %v4498_v38 = vmax.f32 %v3802_v0, %v8613_v21 }
 0x231   :  { %16229 = vst [vmem:[#allocation10_spill] sm:$0xff] %v13848_v23  ;;  %v3778_v29 = vcombine.high %v3466_v57, %v3466_v57  ;;  %v3785_v43 = vrot.slane %v3466_v57, %v13343_v16  ;;  %v5001_v59 = vsel %vm4984_vm14, %v13819_v56, %v5000_v60  ;;  %v3469_v48 = vmax.f32 %v3441_v15, 0.0 }
 0x232   :  { %v8616_v6 = vrot.slane %v3811_v61, 9  ;;  %v4499_v24 = vmax.f32 %v3810_v20, %v8614_v25  ;;  %v13853_v55 = vmax.f32 %v3809_v19, %v8615_v42  ;;  %v5002_v21 = vsel %vm4986_vm15, %v13840_v47, %v5001_v59 }
 0x233   :  { %v3792_v37 = vrot.slane %v3778_v29, %v13343_v16  ;;  %v3793_v8 = vcombine.high %v3785_v43, %v3785_v43  ;;  %v8609_v46 = vrot.slane %v3785_v43, 9  ;;  %v13859_v0 = vrot.slane %v4498_v38, %v13346_v3 }
 0x234   :  { %16230 = vst [vmem:[#allocation25_spill] sm:$0xff] %v13853_v55  ;;  %v4501_v9 = vmax.f32 %v3811_v61, %v8616_v6  ;;  %v6548_v57 = vrot.slane %v4499_v24, %v13346_v3  ;;  %v5003_v60 = vsel %vm4988_vm0, %v13656_v39, %v5002_v21  ;;  %v13868_v42 = vsel %vm4977_vm11, %v13829_v30, %v5220_v18 }
 0x235   :  { %16231 = vst [vmem:[#allocation16_spill] sm:$0xff] %v13859_v0  ;;  %v3794_v25 = vcombine.high %v3792_v37, %v3792_v37  ;;  %v8610_v19 = vrot.slane %v3793_v8, 9  ;;  %v8611_v20 = vrot.slane %v3792_v37, 9  ;;  %v4494_v15 = vmax.f32 %v3785_v43, %v8609_v46  ;;  %10099 = vmatprep.mubr.msk.f32.mxu0 %vm5053_vm1, %v5003_v60  ;;  %10173 = vmatprep.mubr.msk.f32.mxu1 %vm5053_vm1, %v5003_v60 }
 0x236   :  { %16232 = vst [vmem:[#allocation4_spill] sm:$0xff] %v13868_v42  ;;  %v13871_v6 = vadd.f32 %v11038_v2, %v13337_v7  ;;  %v3829_v38 = vcombine.high %v3469_v48, %v3469_v48  ;;  %v3836_v61 = vrot.slane %v3469_v48, %v13343_v16  ;;  %v13875_v29 = vrot.slane %v4501_v9, %v13346_v3  ;;  %v16235_v9 = vld [vmem:[#allocation9_spill] sm:$0xff] }
 0x237   :  { %v13881_v59 = vsel %vm4977_vm11, %v6548_v57, %v13859_v0  ;;  %v8612_v24 = vrot.slane %v3794_v25, 9  ;;  %v4495_v46 = vmax.f32 %v3793_v8, %v8610_v19  ;;  %v4496_v60 = vmax.f32 %v3792_v37, %v8611_v20  ;;  %v16236_v19 = vld [vmem:[#allocation11_spill] sm:$0xff]  ;;  %v16237_v37 = vld [vmem:[#allocation22_spill] sm:$0xff] }
 0x238   :  { %16233 = vst [vmem:[#allocation19_spill] sm:$0xff] %v13881_v59  ;;  %v3843_v18 = vrot.slane %v3829_v38, %v13343_v16  ;;  %v3844_v21 = vcombine.high %v3836_v61, %v3836_v61  ;;  %v8621_v2 = vrot.slane %v3836_v61, 9  ;;  %v13885_v48 = vrot.slane %v4494_v15, %v13346_v3 }
 0x239   :  { %v4497_v42 = vmax.f32 %v3794_v25, %v8612_v24  ;;  %v3412_v39 = vadd.f32 %v13337_v7, %v16235_v9  ;;  %v13890_v57 = vadd.f32 %v11039_v27, %v13337_v7  ;;  %v3415_v38 = vadd.f32 %v16236_v19, %v13337_v7 }
 0x23a   :  { %16234 = vst [vmem:[#allocation34_spill] sm:$0xff] %v13885_v48  ;;  %v3845_v47 = vcombine.high %v3843_v18, %v3843_v18  ;;  %v8622_v43 = vrot.slane %v3844_v21, 9  ;;  %v8623_v55 = vrot.slane %v3843_v18, 9  ;;  %v4506_v56 = vmax.f32 %v3836_v61, %v8621_v2 }
 0x23b   :  { %v3440_v8 = vmax.f32 %v13670_v49, %v3412_v39  ;;  %v3414_v25 = vadd.f32 %v13337_v7, %v16237_v37  ;;  %v13898_v20 = vrot.slane %v4495_v46, %v13346_v3  ;;  %v13901_v59 = vrot.slane %v4496_v60, %v13346_v3 }
 0x23c   :  { %v8624_v15 = vrot.slane %v3845_v47, 9  ;;  %v4507_v24 = vmax.f32 %v3844_v21, %v8622_v43  ;;  %v4508_v9 = vmax.f32 %v3843_v18, %v8623_v55  ;;  %v3443_v27 = vmax.f32 %v13691_v13, %v3415_v38 }
 0x23d   :  { %16238 = vst [vmem:[#allocation17_spill] sm:$0xff] %v13898_v20  ;;  %16239 = vst [vmem:[#allocation7_spill] sm:$0xff] %v13901_v59  ;;  %v3468_v61 = vmax.f32 %v3440_v8, 0.0  ;;  %v3442_v39 = vmax.f32 %v13698_v54, %v3414_v25  ;;  %v13906_v49 = vrot.slane %v4497_v42, %v13346_v3  ;;  %v13909_v7 = vrot.slane %v4506_v56, %v13346_v3 }
 0x23e   :  { %v4509_v2 = vmax.f32 %v3845_v47, %v8624_v15  ;;  %v16241_v46 = vrot.slane %v13722_v53, 9  ;;  %v3471_v21 = vmax.f32 %v3443_v27, 0.0  ;;  %v13916_v13 = vrot.slane %v4507_v24, %v13346_v3 }
 0x23f   :  { %16240 = vst [vmem:[#allocation48_spill] sm:$0xff] %v13906_v49  ;;  %v3812_v55 = vcombine.high %v3468_v61, %v3468_v61  ;;  %v3819_v18 = vrot.slane %v3468_v61, %v13343_v16  ;;  %v3470_v60 = vmax.f32 %v3442_v39, 0.0  ;;  %v13919_v54 = vrot.slane %v4508_v9, %v13346_v3 }
 0x240   :  { %v4473_v43 = vmax.f32 %v13722_v53, %v16241_v46  ;;  %v13922_v47 = vrot.slane %v4509_v2, %v13346_v3  ;;  %v13926_v56 = vrot.slane %v13661_v12, %v13346_v3  ;;  %v3863_v19 = vcombine.high %v3471_v21, %v3471_v21 }
 0x241   :  { %16242 = vst [vmem:[#allocation36_spill] sm:$0xff] %v13919_v54  ;;  %v3826_v53 = vrot.slane %v3812_v55, %v13343_v16  ;;  %v3827_v42 = vcombine.high %v3819_v18, %v3819_v18  ;;  %v8617_v8 = vrot.slane %v3819_v18, 9  ;;  %v3870_v38 = vrot.slane %v3471_v21, %v13343_v16 }
 0x242   :  { %16243 = vst [vmem:[#allocation13_spill] sm:$0xff] %v13922_v47  ;;  %16244 = vst [vmem:[#allocation9_spill] sm:$0xff] %v13926_v56  ;;  %v3846_v37 = vcombine.high %v3470_v60, %v3470_v60  ;;  %v3853_v25 = vrot.slane %v3470_v60, %v13343_v16  ;;  %v13932_v15 = vrot.slane %v4473_v43, %v13346_v3 }
 0x243   :  { %v3828_v24 = vcombine.high %v3826_v53, %v3826_v53  ;;  %v8618_v9 = vrot.slane %v3827_v42, 9  ;;  %v8619_v61 = vrot.slane %v3826_v53, 9  ;;  %v4502_v27 = vmax.f32 %v3819_v18, %v8617_v8 }
 0x244   :  { %16245 = vst [vmem:[#allocation11_spill] sm:$0xff] %v13932_v15  ;;  %v3877_v12 = vrot.slane %v3863_v19, %v13343_v16  ;;  %v3878_v39 = vcombine.high %v3870_v38, %v3870_v38  ;;  %v8629_v2 = vrot.slane %v3870_v38, 9  ;;  %v5004_v46 = vsel %vm4977_vm11, %v13666_v11, %v13659_v31 }
 0x245   :  { %v8620_v55 = vrot.slane %v3828_v24, 9  ;;  %v4503_v21 = vmax.f32 %v3827_v42, %v8618_v9  ;;  %v4504_v0 = vmax.f32 %v3826_v53, %v8619_v61  ;;  %v3860_v60 = vrot.slane %v3846_v37, %v13343_v16 }
 0x246   :  { %v3879_v49 = vcombine.high %v3877_v12, %v3877_v12  ;;  %v8630_v43 = vrot.slane %v3878_v39, 9  ;;  %v8631_v35 = vrot.slane %v3877_v12, 9  ;;  %v13939_v51 = vmax.f32 %v3870_v38, %v8629_v2 }
 0x247   :  { %v13942_v18 = vrot.slane %v4502_v27, %v13346_v3  ;;  %v3861_v8 = vcombine.high %v3853_v25, %v3853_v25  ;;  %v5005_v19 = vsel %vm4979_vm12, %v13681_v41, %v5004_v46  ;;  %v13949_v11 = vsel %vm4977_vm11, %v13704_v5, %v13926_v56 }
 0x248   :  { %16246 = vst [vmem:[#allocation22_spill] sm:$0xff] %v13939_v51  ;;  %16247 = vst [vmem:[#allocation74_spill] sm:$0xff] %v13949_v11  ;;  %v4505_v53 = vmax.f32 %v3828_v24, %v8620_v55  ;;  %v13952_v42 = vrot.slane %v4503_v21, %v13346_v3  ;;  %v13955_v37 = vrot.slane %v4504_v0, %v13346_v3  ;;  %v8632_v38 = vrot.slane %v3879_v49, 9  ;;  %v16250_v51 = vld [vmem:[#allocation44_spill] sm:$0xff] }
 0x249   :  { %v4515_v9 = vmax.f32 %v3878_v39, %v8630_v43  ;;  %v3862_v61 = vcombine.high %v3860_v60, %v3860_v60  ;;  %v8625_v27 = vrot.slane %v3853_v25, 9  ;;  %v8626_v2 = vrot.slane %v3861_v8, 9  ;;  %v16249_v43 = vld [vmem:[#allocation42_spill] sm:$0xff] }
 0x24a   :  { %16248 = vst [vmem:[#allocation75_spill] sm:$0xff] %v13952_v42  ;;  %v13957_v31 = vmax.f32 %v3877_v12, %v8631_v35  ;;  %v8627_v41 = vrot.slane %v3860_v60, 9  ;;  %v5006_v24 = vsel %vm4981_vm13, %v13645_v45, %v5005_v19  ;;  %v13966_v39 = vrot.slane %v4505_v53, %v13346_v3  ;;  %v11416_v12 = vld [vmem:[%s15776_s2] ss:$0 sm:$0xff] }
 0x24b   :  { %v8628_v55 = vrot.slane %v3862_v61, 9  ;;  %v4510_v21 = vmax.f32 %v3853_v25, %v8625_v27  ;;  %v4511_v11 = vmax.f32 %v3861_v8, %v8626_v2  ;;  %v5007_v0 = vsel %vm2061_vm8, %v13650_v50, %v5006_v24  ;;  %v16259_v50 = vld [vmem:[#allocation51_spill] sm:$0xff] }
 0x24c   :  { %v5008_v35 = vsel %vm4984_vm14, %v13653_v28, %v5007_v0  ;;  %v3417_v46 = vadd.f32 %v11416_v12, %v16249_v43  ;;  %v3416_v19 = vadd.f32 %v11416_v12, %v16250_v51  ;;  %v13975_v45 = vmax.f32 %v3879_v49, %v8632_v38 }
 0x24d   :  { %v13978_v25 = vrot.slane %v4515_v9, %v13346_v3  ;;  %v4512_v8 = vmax.f32 %v3860_v60, %v8627_v41  ;;  %v5009_v53 = vsel %vm4986_vm15, %v13932_v15, %v5008_v35  ;;  %v13982_v27 = vmax.f32 %v3862_v61, %v8628_v55 }
 0x24e   :  { %v5010_v2 = vsel %vm4988_vm0, %v13926_v56, %v5009_v53  ;;  %v3445_v24 = vmax.f32 %v13716_v1, %v3417_v46  ;;  %v3444_v0 = vmax.f32 %v13732_v58, %v3416_v19  ;;  %v13989_v51 = vrot.slane %v4510_v21, %v13346_v3  ;;  %v16254_v58 = vld [vmem:[#allocation45_spill] sm:$0xff]  ;;  %v16256_v46 = vld [vmem:[#allocation46_spill] sm:$0xff] }
 0x24f   :  { %16251 = vst [vmem:[#allocation42_spill] sm:$0xff] %v13982_v27  ;;  %v13992_v49 = vrot.slane %v4511_v11, %v13346_v3  ;;  %10100 = vmatmul.mubr.msk.f32.gmra.mrb[30].mxu0 %vm5053_vm1, %v5010_v2  ;;  %10174 = vmatmul.mubr.msk.f32.gmra.mrb[34].mxu1 %vm5053_vm1, %v5010_v2  ;;  %v5011_v41 = vsel %vm4977_vm11, %v13675_v32, %v13704_v5  ;;  %v16257_v21 = vld [vmem:[#allocation49_spill] sm:$0xff] }
 0x250   :  { %16252 = vst [vmem:[#allocation44_spill] sm:$0xff] %v13989_v51  ;;  %v3473_v60 = vmax.f32 %v3445_v24, 0.0  ;;  %v3472_v38 = vmax.f32 %v3444_v0, 0.0  ;;  %v5012_v1 = vsel %vm4979_vm12, %v13708_v4, %v5011_v41  ;;  %v3419_v9 = vadd.f32 %v11416_v12, %v16254_v58 }
 0x251   :  { %16253 = vst [vmem:[#allocation76_spill] sm:$0xff] %v13992_v49  ;;  %v14003_v61 = vrot.slane %v4512_v8, %v13346_v3  ;;  %v5013_v11 = vsel %vm4981_vm13, %v13759_v14, %v5012_v1  ;;  %v3418_v55 = vadd.f32 %v11416_v12, %v16256_v46  ;;  %v3421_v35 = vadd.f32 %v11416_v12, %v16257_v21 }
 0x252   :  { %v3897_v43 = vcombine.high %v3473_v60, %v3473_v60  ;;  %v3904_v19 = vrot.slane %v3473_v60, %v13343_v16  ;;  %v3880_v53 = vcombine.high %v3472_v38, %v3472_v38  ;;  %v3887_v2 = vrot.slane %v3472_v38, %v13343_v16 }
 0x253   :  { %16255 = vst [vmem:[#allocation45_spill] sm:$0xff] %v14003_v61  ;;  %v5014_v24 = vsel %vm2061_vm8, %v13762_v17, %v5013_v11  ;;  %v3447_v0 = vmax.f32 %v13804_v26, %v3419_v9  ;;  %v3446_v8 = vmax.f32 %v13815_v63, %v3418_v55  ;;  %v3449_v41 = vmax.f32 %v13871_v6, %v3421_v35 }
 0x254   :  { %v3911_v1 = vrot.slane %v3897_v43, %v13343_v16  ;;  %v3912_v58 = vcombine.high %v3904_v19, %v3904_v19  ;;  %v8637_v46 = vrot.slane %v3904_v19, 9  ;;  %v3894_v21 = vrot.slane %v3880_v53, %v13343_v16 }
 0x255   :  { %v3895_v61 = vcombine.high %v3887_v2, %v3887_v2  ;;  %v8633_v38 = vrot.slane %v3887_v2, 9  ;;  %v5015_v11 = vsel %vm4984_vm14, %v13765_v33, %v5014_v24  ;;  %v14024_v53 = vrot.slane %v13739_v10, %v13346_v3  ;;  %v4542_v10 = vld [vmem:[%s15775_s3] sm:$0xff] }
 0x256   :  { %v3913_v49 = vcombine.high %v3911_v1, %v3911_v1  ;;  %v8638_v26 = vrot.slane %v3912_v58, 9  ;;  %v8639_v9 = vrot.slane %v3911_v1, 9  ;;  %v4522_v63 = vmax.f32 %v3904_v19, %v8637_v46 }
 0x257   :  { %v3896_v55 = vcombine.high %v3894_v21, %v3894_v21  ;;  %v8634_v6 = vrot.slane %v3895_v61, 9  ;;  %v8635_v35 = vrot.slane %v3894_v21, 9  ;;  %v4518_v43 = vmax.f32 %v3887_v2, %v8633_v38  ;;  %16258 = vst [vmem:[#allocation46_spill] sm:$0xff] %v14024_v53 }
 0x258   :  { %v8640_v5 = vrot.slane %v3913_v49, 9  ;;  %v4523_v56 = vmax.f32 %v3912_v58, %v8638_v26  ;;  %v3475_v60 = vmax.f32 %v3447_v0, 0.0  ;;  %v4524_v27 = vmax.f32 %v3911_v1, %v8639_v9 }
 0x259   :  { %v8636_v28 = vrot.slane %v3896_v55, 9  ;;  %v4519_v15 = vmax.f32 %v3895_v61, %v8634_v6  ;;  %v3420_v24 = vadd.f32 %v11416_v12, %v16259_v50  ;;  %v14028_v33 = vrot.slane %v4522_v63, %v13346_v3  ;;  %v4543_v61 = vld [vmem:[%s15775_s3 + $0x8] sm:$0xff] }
 0x25a   :  { %v4520_v19 = vmax.f32 %v3894_v21, %v8635_v35  ;;  %v14031_v46 = vrot.slane %v4518_v43, %v13346_v3  ;;  %v5016_v2 = vsel %vm4986_vm15, %v13778_v62, %v5015_v11  ;;  %v14041_v0 = vmax.f32 %v3913_v49, %v8640_v5 }
 0x25b   :  { %v14044_v50 = vrot.slane %v4523_v56, %v13346_v3  ;;  %v4521_v12 = vmax.f32 %v3896_v55, %v8636_v28  ;;  %v5017_v1 = vsel %vm4988_vm0, %v14024_v53, %v5016_v2  ;;  %v3931_v58 = vcombine.high %v3475_v60, %v3475_v60 }
 0x25c   :  { %16260 = vst [vmem:[#allocation49_spill] sm:$0xff] %v14041_v0  ;;  %10102 = vmatprep.mubr.msk.f32.mxu0 %vm5053_vm1, %v5017_v1  ;;  %10176 = vmatprep.mubr.msk.f32.mxu1 %vm5053_vm1, %v5017_v1  ;;  %v3938_v21 = vrot.slane %v3475_v60, %v13343_v16  ;;  %v3474_v38 = vmax.f32 %v3446_v8, 0.0  ;;  %v3477_v11 = vmax.f32 %v3449_v41, 0.0  ;;  %v14052_v26 = vrot.slane %v4524_v27, %v13346_v3 }
 0x25d   :  { %v14055_v5 = vrot.slane %v4519_v15, %v13346_v3  ;;  %v3448_v28 = vmax.f32 %v13890_v57, %v3420_v24  ;;  %v10729_v56 = vpack.c.bf16 %v4543_v61, %v4542_v10  ;;  %v14059_v49 = vrot.slane %v4520_v19, %v13346_v3 }
 0x25e   :  { %16261 = vst [vmem:[#allocation51_spill] sm:$0xff] %v14052_v26  ;;  %v3945_v9 = vrot.slane %v3931_v58, %v13343_v16  ;;  %v3946_v63 = vcombine.high %v3938_v21, %v3938_v21  ;;  %v3914_v55 = vcombine.high %v3474_v38, %v3474_v38  ;;  %v14063_v60 = vrot.slane %v4521_v12, %v13346_v3 }
 0x25f   :  { %v8645_v8 = vrot.slane %v3938_v21, 9  ;;  %v3921_v27 = vrot.slane %v3474_v38, %v13343_v16  ;;  %v3965_v41 = vcombine.high %v3477_v11, %v3477_v11  ;;  %10730 = vmatprep.subr.bf16.mxu0 %v10729_v56  ;;  %v3972_v57 = vrot.slane %v3477_v11, %v13343_v16 }
 0x260   :  { %16262 = vst [vmem:[#allocation77_spill] sm:$0xff] %v14063_v60  ;;  %v3947_v15 = vcombine.high %v3945_v9, %v3945_v9  ;;  %v8646_v6 = vrot.slane %v3946_v63, 9  ;;  %v8647_v35 = vrot.slane %v3945_v9, 9  ;;  %10732 = vmatpush3.bf16.msra.mxu0 %v10729_v56  ;;  %v3928_v43 = vrot.slane %v3914_v55, %v13343_v16 }
 0x261   :  { %v3929_v24 = vcombine.high %v3921_v27, %v3921_v27  ;;  %v8641_v19 = vrot.slane %v3921_v27, 9  ;;  %v14069_v2 = vrot.slane %v3965_v41, %v13343_v16  ;;  %v5018_v1 = vsel %vm4977_vm11, %v13807_v22, %v13829_v30  ;;  %v4545_v41 = vld [vmem:[%s15775_s3 + $0x18] sm:$0xff] }
 0x262   :  { %v8648_v10 = vrot.slane %v3947_v15, 9  ;;  %v4531_v61 = vmax.f32 %v3946_v63, %v8646_v6  ;;  %v4532_v12 = vmax.f32 %v3945_v9, %v8647_v35  ;;  %v8643_v38 = vrot.slane %v3928_v43, 9  ;;  %v8657_v63 = vld [vmem:[%s15775_s3 + $0x58] sm:$0xff]  ;;  %v8658_v9 = vld [vmem:[%s15775_s3 + $0x60] sm:$0xff] }
 0x263   :  { %16263 = vst [vmem:[#allocation78_spill] sm:$0xff] %v14069_v2  ;;  %v8642_v58 = vrot.slane %v3929_v24, 9  ;;  %v4526_v0 = vmax.f32 %v3921_v27, %v8641_v19  ;;  %v3476_v53 = vmax.f32 %v3448_v28, 0.0  ;;  %v14074_v11 = vmax.f32 %v3938_v21, %v8645_v8  ;;  %v4544_v27 = vld [vmem:[%s15775_s3 + $0x10] sm:$0xff] }
 0x264   :  { %v4533_v56 = vmax.f32 %v3947_v15, %v8648_v10  ;;  %v14076_v55 = vcombine.high %v3928_v43, %v3928_v43  ;;  %v14078_v62 = vcombine.high %v3972_v57, %v3972_v57  ;;  %v14087_v30 = vrot.slane %v4531_v61, %v13346_v3 }
 0x265   :  { %v14090_v28 = vrot.slane %v4532_v12, %v13346_v3  ;;  %v14092_v21 = vmax.f32 %v3929_v24, %v8642_v58  ;;  %v14096_v8 = vcombine.high %v14069_v2, %v14069_v2  ;;  %v14107_v6 = vmax.f32 %v3928_v43, %v8643_v38  ;;  %v8659_v58 = vld [vmem:[%s15775_s3 + $0x68] sm:$0xff]  ;;  %v8660_v43 = vld [vmem:[%s15775_s3 + $0x70] sm:$0xff] }
 0x266   :  { %16264 = vst [vmem:[#allocation79_spill] sm:$0xff] %v14078_v62  ;;  %16265 = vst [vmem:[#allocation80_spill] sm:$0xff] %v14087_v30  ;;  %v14105_v15 = vrot.slane %v4533_v56, %v13346_v3  ;;  %v14110_v35 = vrot.slane %v4526_v0, %v13346_v3  ;;  %v8653_v24 = vrot.slane %v3972_v57, 9  ;;  %v3948_v19 = vcombine.high %v3476_v53, %v3476_v53 }
 0x267   :  { %16266 = vst [vmem:[#allocation81_spill] sm:$0xff] %v14090_v28  ;;  %16267 = vst [vmem:[#allocation82_spill] sm:$0xff] %v14092_v21  ;;  %v3955_v10 = vrot.slane %v3476_v53, %v13343_v16  ;;  %v5019_v61 = vsel %vm4979_vm12, %v13848_v23, %v5018_v1  ;;  %v10769_v12 = vpack.c.bf16 %v8658_v9, %v8657_v63 }
 0x268   :  { %16268 = vst [vmem:[#allocation83_spill] sm:$0xff] %v14096_v8  ;;  %16269 = vst [vmem:[#allocation84_spill] sm:$0xff] %v14105_v15  ;;  %v14121_v38 = vmax.f32 %v3972_v57, %v8653_v24  ;;  %v5020_v0 = vsel %vm4981_vm13, %v13773_v36, %v5019_v61  ;;  %v5025_v53 = vsel %vm4977_vm11, %v13901_v59, %v13898_v20  ;;  %v8644_v8 = vrot.slane %v14076_v55, 9 }
 0x269   :  { %16270 = vst [vmem:[#allocation85_spill] sm:$0xff] %v14110_v35  ;;  %v10733_v56 = vpack.c.bf16 %v4545_v41, %v4544_v27  ;;  %v3962_v1 = vrot.slane %v3948_v19, %v13343_v16  ;;  %v3963_v63 = vcombine.high %v3955_v10, %v3955_v10  ;;  %v8649_v9 = vrot.slane %v3955_v10, 9  ;;  %10770 = vmatprep.subr.bf16.mxu1 %v10769_v12  ;;  %v4547_v35 = vld [vmem:[%s15775_s3 + $0x28] sm:$0xff] }
 0x26a   :  { %v5021_v21 = vsel %vm2061_vm8, %v13789_v44, %v5020_v0  ;;  %10772 = vmatpush3.bf16.msra.mxu1 %v10769_v12  ;;  %v5026_v24 = vsel %vm4979_vm12, %v13875_v29, %v5025_v53  ;;  %v10773_v61 = vpack.c.bf16 %v8660_v43, %v8659_v58  ;;  %v4546_v0 = vld [vmem:[%s15775_s3 + $0x20] sm:$0xff]  ;;  %v14148_v58 = vrot.slane %v13957_v31, %v13346_v3  ;;  %v8661_v43 = vld [vmem:[%s15775_s3 + $0x78] sm:$0xff]  ;;  %v4548_v31 = vld [vmem:[%s15775_s3 + $0x30] sm:$0xff] }
 0x26b   :  { %v5022_v57 = vsel %vm4984_vm14, %v13797_v52, %v5021_v21  ;;  %10734 = vmatprep.subr.bf16.mxu0 %v10733_v56  ;;  %v3964_v27 = vcombine.high %v3962_v1, %v3962_v1  ;;  %v8650_v41 = vrot.slane %v3963_v63, 9  ;;  %v8651_v19 = vrot.slane %v3962_v1, 9 }
 0x26c   :  { %v4534_v16 = vmax.f32 %v3955_v10, %v8649_v9  ;;  %10736 = vmatpush3.bf16.msra.mxu0 %v10733_v56  ;;  %v5023_v21 = vsel %vm4986_vm15, %v13800_v40, %v5022_v57  ;;  %v5027_v12 = vsel %vm4981_vm13, %v13942_v18, %v5026_v24  ;;  %10774 = vmatprep.subr.bf16.mxu1 %v10773_v61  ;;  %v8662_v24 = vld [vmem:[%s15775_s3 + $0x80] sm:$0xff] }
 0x26d   :  { %v14152_v10 = vrot.slane %v13975_v45, %v13346_v3  ;;  %v8652_v53 = vrot.slane %v3964_v27, 9  ;;  %v4535_v56 = vmax.f32 %v3963_v63, %v8650_v41  ;;  %v4536_v9 = vmax.f32 %v3962_v1, %v8651_v19  ;;  %v4549_v45 = vld [vmem:[%s15775_s3 + $0x38] sm:$0xff]  ;;  %v8663_v41 = vld [vmem:[%s15775_s3 + $0x88] sm:$0xff]  ;;  %v8664_v19 = vld [vmem:[%s15775_s3 + $0x90] sm:$0xff] }
 0x26e   :  { %v14158_v57 = vrot.slane %v4534_v16, %v13346_v3  ;;  %v5024_v2 = vsel %vm4988_vm0, %v13885_v48, %v5023_v21  ;;  %v5028_v1 = vsel %vm2061_vm8, %v13952_v42, %v5027_v12  ;;  %10776 = vmatpush3.bf16.msra.mxu1 %v10773_v61  ;;  %v5032_v16 = vsel %vm4977_vm11, %v13919_v54, %v13916_v13 }
 0x26f   :  { %v10737_v63 = vpack.c.bf16 %v4547_v35, %v4546_v0  ;;  %v4537_v62 = vmax.f32 %v3964_v27, %v8652_v53  ;;  %v14183_v21 = vrot.slane %v4535_v56, %v13346_v3  ;;  %v14186_v12 = vrot.slane %v4536_v9, %v13346_v3  ;;  %10103 = vmatmul.mubr.msk.f32.gmra.mrb[32].mxu0 %vm5053_vm1, %v5024_v2  ;;  %v4550_v9 = vld [vmem:[%s15775_s3 + $0x40] sm:$0xff] }
 0x270   :  { %10177 = vmatmul.mubr.msk.f32.gmra.mrb[36].mxu1 %vm5053_vm1, %v5024_v2  ;;  %v5029_v35 = vsel %vm4984_vm14, %v13955_v37, %v5028_v1  ;;  %v5033_v61 = vsel %vm4979_vm12, %v13922_v47, %v5032_v16  ;;  %v10777_v0 = vpack.c.bf16 %v8662_v24, %v8661_v43  ;;  %v10741_v59 = vpack.c.bf16 %v4549_v45, %v4548_v31  ;;  %v4551_v43 = vld [vmem:[%s15775_s3 + $0x48] sm:$0xff] }
 0x271   :  { %16271 = vst [vmem:[#allocation86_spill] sm:$0xff] %v14183_v21  ;;  %16272 = vst [vmem:[#allocation87_spill] sm:$0xff] %v14186_v12  ;;  %10738 = vmatprep.subr.bf16.mxu0 %v10737_v63  ;;  %v14195_v27 = vrot.slane %v4537_v62, %v13346_v3  ;;  %v5030_v53 = vsel %vm4986_vm15, %v13966_v39, %v5029_v35  ;;  %v5034_v56 = vsel %vm4981_vm13, %v13989_v51, %v5033_v61  ;;  %v8734_v35 = vld [vmem:[%s15775_s3 + $0x160] sm:$0xff]  ;;  %v8735_v61 = vld [vmem:[%s15775_s3 + $0x168] sm:$0xff] }
 0x272   :  { %10740 = vmatpush3.bf16.msra.mxu0 %v10737_v63  ;;  %v10781_v2 = vpack.c.bf16 %v8664_v19, %v8663_v41  ;;  %v5031_v62 = vsel %vm4988_vm0, %v13909_v7, %v5030_v53  ;;  %v5035_v24 = vsel %vm2061_vm8, %v13978_v25, %v5034_v56  ;;  %10778 = vmatprep.subr.bf16.mxu1 %v10777_v0  ;;  %v8665_v63 = vld [vmem:[%s15775_s3 + $0x98] sm:$0xff] }
 0x273   :  { %16273 = vst [vmem:[#allocation88_spill] sm:$0xff] %v14195_v27  ;;  %10742 = vmatprep.subr.bf16.mxu0 %v10741_v59  ;;  %v4529_v31 = vmax.f32 %v14076_v55, %v8644_v8  ;;  %10105 = vmatprep.mubr.msk.f32.mxu0 %vm5053_vm1, %v5031_v62  ;;  %v5036_v45 = vsel %vm4984_vm14, %v14148_v58, %v5035_v24  ;;  %v8666_v55 = vld [vmem:[%s15775_s3 + $0xa0] sm:$0xff] }
 0x274   :  { %10179 = vmatprep.mubr.msk.f32.mxu1 %vm5053_vm1, %v5031_v62  ;;  %v14218_v1 = vrot.slane %v14074_v11, %v13346_v3  ;;  %v5039_v16 = vsel %vm4977_vm11, %v14059_v49, %v14055_v5  ;;  %v5037_v8 = vsel %vm4986_vm15, %v14152_v10, %v5036_v45  ;;  %10780 = vmatpush3.bf16.msra.mxu1 %v10777_v0 }
 0x275   :  { %v14232_v41 = vrot.slane %v4529_v31, %v13346_v3  ;;  %v5040_v11 = vsel %vm4979_vm12, %v14063_v60, %v5039_v16  ;;  %v10745_v19 = vpack.c.bf16 %v4551_v43, %v4550_v9  ;;  %v5038_v53 = vsel %vm4988_vm0, %v14031_v46, %v5037_v8  ;;  %10782 = vmatprep.subr.bf16.mxu1 %v10781_v2  ;;  %v8756_v9 = vld [vmem:[%s15775_s3 + $0x1b8] sm:$0xff]  ;;  %v8757_v43 = vld [vmem:[%s15775_s3 + $0x1c0] sm:$0xff]  ;;  %v16276_v16 = vld [vmem:[#allocation39_spill] sm:$0xff] }
 0x276   :  { %16274 = vst [vmem:[#allocation89_spill] sm:$0xff] %v14218_v1  ;;  %10744 = vmatpush3.bf16.msra.mxu0 %v10741_v59  ;;  %v5041_v0 = vsel %vm4981_vm13, %v14028_v33, %v5040_v11  ;;  %v14249_v56 = vsel %vm4977_vm11, %v14087_v30, %v14218_v1  ;;  %10180 = vmatmul.mubr.msk.f32.gmra.mrb[38].mxu1 %vm5053_vm1, %v5038_v53 }
 0x277   :  { %10106 = vmatmul.mubr.msk.f32.gmra.mrb[34].mxu0 %vm5053_vm1, %v5038_v53  ;;  %v5042_v59 = vsel %vm2061_vm8, %v14044_v50, %v5041_v0  ;;  %v10785_v62 = vpack.c.bf16 %v8666_v55, %v8665_v63  ;;  %v14263_v24 = vrot.slane %v14121_v38, %v13346_v3  ;;  %10746 = vmatprep.subr.bf16.mxu0 %v10745_v19  ;;  %v4552_v55 = vld [vmem:[%s15775_s3 + $0x50] sm:$0xf] }
 0x278   :  { %v5043_v31 = vsel %vm4984_vm14, %v14052_v26, %v5042_v59  ;;  %v5046_v45 = vsel %vm4977_vm11, %v14090_v28, %v14087_v30  ;;  %v5234_v8 = vsel %vm4979_vm12, %v13434_v34, %v16276_v16  ;;  %v14273_v11 = vpack.c.bf16 %v8735_v61, %v8734_v35  ;;  %10784 = vmatpush3.bf16.msra.mxu1 %v10781_v2  ;;  %v16277_v53 = vld [vmem:[#allocation8_spill] sm:$0xff]  ;;  %v16278_v35 = vld [vmem:[#allocation38_spill] sm:$0xff]  ;;  %v16286_v26 = vld [vmem:[#allocation21_spill] sm:$0xff] }
 0x279   :  { %16275 = vst [vmem:[#allocation90_spill] sm:$0xff] %v14263_v24  ;;  %v5044_v63 = vsel %vm4986_vm15, %v14232_v41, %v5043_v31  ;;  %v5047_v38 = vsel %vm4979_vm12, %v14105_v15, %v5046_v45  ;;  %v5235_v0 = vsel %vm4981_vm13, %v16277_v53, %v5234_v8  ;;  %v10809_v59 = vpack.c.bf16 %v8757_v43, %v8756_v9  ;;  %v16279_v45 = vld [vmem:[#allocation37_spill] sm:$0xff]  ;;  %v16280_v43 = vld [vmem:[#allocation14_spill] sm:$0xff]  ;;  %v16281_v8 = vld [vmem:[#allocation12_spill] sm:$0xff] }
 0x27a   :  { %v5045_v16 = vsel %vm4988_vm0, %v14218_v1, %v5044_v63  ;;  %10786 = vmatprep.subr.bf16.mxu1 %v10785_v62  ;;  %10748 = vmatpush3.bf16.msra.mxu0 %v10745_v19  ;;  %v5048_v2 = vsel %vm4981_vm13, %v14158_v57, %v5047_v38  ;;  %v5236_v61 = vsel %vm2061_vm8, %v16278_v35, %v5235_v0  ;;  %v8667_v19 = vld [vmem:[%s15775_s3 + $0xa8] sm:$0xf]  ;;  %v16282_v0 = vld [vmem:[#allocation33_spill] sm:$0xff]  ;;  %v16285_v1 = vld [vmem:[#allocation20_spill] sm:$0xff] }
 0x27b   :  { %10108 = vmatprep.mubr.msk.f32.mxu0 %vm5053_vm1, %v5045_v16  ;;  %10182 = vmatprep.mubr.msk.f32.mxu1 %vm5053_vm1, %v5045_v16  ;;  %v5049_v31 = vsel %vm2061_vm8, %v14183_v21, %v5048_v2  ;;  %v5237_v9 = vsel %vm4984_vm14, %v16279_v45, %v5236_v61  ;;  %v5240_v63 = vsel %vm4977_vm11, %v16281_v8, %v16280_v43  ;;  %v16283_v2 = vld [vmem:[#allocation5_spill] sm:$0xff]  ;;  %v8736_v8 = vld [vmem:[%s15775_s3 + $0x170] sm:$0xff]  ;;  %v16287_v43 = vld [vmem:[#allocation6_spill] sm:$0xff] }
 0x27c   :  { %v5050_v38 = vsel %vm4984_vm14, %v14186_v12, %v5049_v31  ;;  %10131 = vmatprep.subr.msk.mxu0 %vm5074_vm10, %v4552_v55  ;;  %v5238_v16 = vsel %vm4986_vm15, %v16282_v0, %v5237_v9  ;;  %v16284_v30 = vrot.slane %v16283_v2, %v13346_v3  ;;  %v5247_v51 = vsel %vm4977_vm11, %v16286_v26, %v16285_v1  ;;  %v8737_v31 = vld [vmem:[%s15775_s3 + $0x178] sm:$0xff]  ;;  %v16289_v0 = vld [vmem:[#allocation30_spill] sm:$0xff]  ;;  %v8758_v1 = vld [vmem:[%s15775_s3 + $0x1c8] sm:$0xff] }
 0x27d   :  { %10788 = vmatpush3.bf16.msra.mxu1 %v10785_v62  ;;  %v5051_v9 = vsel %vm4986_vm15, %v14195_v27, %v5050_v38  ;;  %v5239_v2 = vsel %vm4988_vm0, %v16287_v43, %v5238_v16  ;;  %v5248_v26 = vsel %vm4979_vm12, %v16289_v0, %v5247_v51  ;;  %v8759_v62 = vld [vmem:[%s15775_s3 + $0x1d0] sm:$0xff]  ;;  %v16290_v16 = vld [vmem:[#allocation18_spill] sm:$0xff]  ;;  %v16292_v0 = vld [vmem:[#allocation29_spill] sm:$0xff]  ;;  %v10793_v12 = vpack.c.bf16 %v8737_v31, %v8736_v8 }
 0x27e   :  { %v5241_v61 = vsel %vm4979_vm12, %v16284_v30, %v5240_v63  ;;  %v16288_v30 = vld [vmem:[#allocation2_spill] sm:$0xff]  ;;  %v5052_v38 = vsel %vm4988_vm0, %v14263_v24, %v5051_v9  ;;  %10205 = vmatprep.subr.msk.mxu1 %vm5074_vm10, %v8667_v19  ;;  %10132 = vmatpush3.msk.msra.mxu0 %vm5074_vm10, %v4552_v55  ;;  %v16293_v27 = vld [vmem:[#allocation41_spill] sm:$0xff] }
 0x27f   :  { %v5242_v63 = vsel %vm4981_vm13, %v16288_v30, %v5241_v61  ;;  %v16291_v30 = vld [vmem:[#allocation31_spill] sm:$0xff]  ;;  %10109 = vmatmul.mubr.msk.f32.gmra.mrb[36].mxu0 %vm5053_vm1, %v5052_v38  ;;  %10183 = vmatmul.mubr.msk.f32.gmra.mrb[40].mxu1 %vm5053_vm1, %v5052_v38  ;;  %v16294_v9 = vrot.slane %v16293_v27, %v13346_v3  ;;  %v8738_v55 = vld [vmem:[%s15775_s3 + $0x180] sm:$0xff]  ;;  %v8760_v8 = vld [vmem:[%s15775_s3 + $0x1d8] sm:$0xff] }
 0x280   :  { %v5243_v61 = vsel %vm2061_vm8, %v16290_v16, %v5242_v63  ;;  %v5249_v51 = vsel %vm4981_vm13, %v16291_v30, %v5248_v26  ;;  %v8739_v26 = vld [vmem:[%s15775_s3 + $0x188] sm:$0xff]  ;;  %10133 = vmatprep.mubr.msk.f32.mxu0 %vm5053_vm1, %v5239_v2  ;;  %10207 = vmatprep.mubr.msk.f32.mxu1 %vm5053_vm1, %v5239_v2  ;;  %v16295_v63 = vld [vmem:[#allocation32_spill] sm:$0xff]  ;;  %v8761_v31 = vld [vmem:[%s15775_s3 + $0x1e0] sm:$0xff] }
 0x281   :  { %v5244_v43 = vsel %vm4984_vm14, %v16292_v0, %v5243_v61  ;;  %v5250_v24 = vsel %vm2061_vm8, %v16294_v9, %v5249_v51  ;;  %v16296_v16 = vld [vmem:[#allocation47_spill] sm:$0xff]  ;;  %v10813_v61 = vpack.c.bf16 %v8759_v62, %v8758_v1  ;;  %10206 = vmatpush3.msk.msra.mxu1 %vm5074_vm10, %v8667_v19  ;;  %10790 = vmatprep.subr.bf16.mxu0 %v14273_v11  ;;  %v16299_v1 = vld [vmem:[#allocation68_spill] sm:$0xff]  ;;  %v16303_v19 = vld [vmem:[#allocation74_spill] sm:$0xff] }
 0x282   :  { %v5245_v38 = vsel %vm4986_vm15, %v16295_v63, %v5244_v43  ;;  %v5251_v27 = vsel %vm4984_vm14, %v16296_v16, %v5250_v24  ;;  %v16297_v2 = vld [vmem:[#allocation43_spill] sm:$0xff]  ;;  %v16298_v43 = vld [vmem:[#allocation28_spill] sm:$0xff]  ;;  %v5216_v24 = vrot.slane %v16299_v1, %v13346_v3  ;;  %10810 = vmatprep.subr.bf16.mxu1 %v10809_v59  ;;  %v5262_v45 = vsel %vm4979_vm12, %v13675_v32, %v16303_v19 }
 0x283   :  { %v5246_v51 = vsel %vm4988_vm0, %v16297_v2, %v5245_v38  ;;  %v5252_v9 = vsel %vm4986_vm15, %v16298_v43, %v5251_v27  ;;  %v16300_v62 = vld [vmem:[#allocation15_spill] sm:$0xff]  ;;  %v16302_v63 = vld [vmem:[#allocation60_spill] sm:$0xff]  ;;  %v10797_v21 = vpack.c.bf16 %v8739_v26, %v8738_v55  ;;  %v16304_v38 = vld [vmem:[#allocation61_spill] sm:$0xff]  ;;  %v5263_v1 = vsel %vm4981_vm13, %v13708_v4, %v5262_v45 }
 0x284   :  { %v5253_v16 = vsel %vm4988_vm0, %v16300_v62, %v5252_v9  ;;  %v16301_v30 = vld [vmem:[#allocation59_spill] sm:$0xff]  ;;  %10134 = vmatmul.mubr.msk.f32.vlgmr.msra.gmra.mrb[28].mxu0 %vm5053_vm1, %v5246_v51  ;;  %10208 = vmatmul.mubr.msk.f32.vlgmr.msra.gmra.mrb[32].mxu1 %vm5053_vm1, %v5246_v51  ;;  %v10817_v9 = vpack.c.bf16 %v8761_v31, %v8760_v8  ;;  %v5264_v55 = vsel %vm2061_vm8, %v13759_v14, %v5263_v1  ;;  %v16306_v26 = vld [vmem:[#allocation4_spill] sm:$0xff]  ;;  %v16308_v8 = vld [vmem:[#allocation57_spill] sm:$0xff] }
 0x285   :  { %v5254_v0 = vsel %vm4977_vm11, %v16302_v63, %v16301_v30  ;;  %10792 = vmatpush3.bf16.msra.mxu0 %v14273_v11  ;;  %10812 = vmatpush3.bf16.msra.mxu1 %v10809_v59  ;;  %v16305_v63 = vld [vmem:[#allocation63_spill] sm:$0xff]  ;;  %v5269_v51 = vsel %vm4979_vm12, %v13807_v22, %v16306_v26  ;;  %v5265_v11 = vsel %vm4984_vm14, %v13762_v17, %v5264_v55  ;;  %v8741_v1 = vld [vmem:[%s15775_s3 + $0x198] sm:$0xff] }
 0x286   :  { %v5255_v27 = vsel %vm4979_vm12, %v16304_v38, %v5254_v0  ;;  %10136 = vmatprep.mubr.msk.f32.mxu0 %vm5053_vm1, %v5253_v16  ;;  %10210 = vmatprep.mubr.msk.f32.mxu1 %vm5053_vm1, %v5253_v16  ;;  %v16307_v0 = vld [vmem:[#allocation55_spill] sm:$0xff]  ;;  %v5270_v59 = vsel %vm4981_vm13, %v13848_v23, %v5269_v51  ;;  %v16310_v26 = vld [vmem:[#allocation73_spill] sm:$0xff] }
 0x287   :  { %v5256_v30 = vsel %vm4981_vm13, %v16305_v63, %v5255_v27  ;;  %10794 = vmatprep.subr.bf16.mxu0 %v10793_v12  ;;  %10814 = vmatprep.subr.bf16.mxu1 %v10813_v61  ;;  %v16309_v19 = vld [vmem:[#allocation71_spill] sm:$0xff]  ;;  %v5271_v16 = vsel %vm2061_vm8, %v13773_v36, %v5270_v59 }
 0x288   :  { %v5257_v45 = vsel %vm2061_vm8, %v16307_v0, %v5256_v30  ;;  %v5266_v27 = vsel %vm4986_vm15, %v16309_v19, %v5265_v11  ;;  %v8740_v30 = vld [vmem:[%s15775_s3 + $0x190] sm:$0xff]  ;;  %v5275_v11 = vsel %vm4977_vm11, %v13898_v20, %v13885_v48  ;;  %v8762_v59 = vld [vmem:[%s15775_s3 + $0x1e8] sm:$0xff] }
 0x289   :  { %v5258_v31 = vsel %vm4984_vm14, %v16308_v8, %v5257_v45  ;;  %v5267_v51 = vsel %vm4988_vm0, %v16310_v26, %v5266_v27  ;;  %v5272_v45 = vsel %vm4984_vm14, %v13789_v44, %v5271_v16  ;;  %v8763_v19 = vld [vmem:[%s15775_s3 + $0x1f0] sm:$0xff]  ;;  %v16311_v36 = vld [vmem:[#allocation11_spill] sm:$0xff]  ;;  %10796 = vmatpush3.bf16.msra.mxu0 %v10793_v12  ;;  %10816 = vmatpush3.bf16.msra.mxu1 %v10813_v61  ;;  %v16312_v27 = vld [vmem:[#allocation25_spill] sm:$0xff] }
 0x28a   :  { %v5259_v55 = vsel %vm4986_vm15, %v5216_v24, %v5258_v31  ;;  %v5273_v31 = vsel %vm4986_vm15, %v13797_v52, %v5272_v45  ;;  %v16313_v16 = vrot.slane %v16312_v27, %v13346_v3  ;;  %v10801_v12 = vpack.c.bf16 %v8741_v1, %v8740_v30  ;;  %10798 = vmatprep.subr.bf16.mxu0 %v10797_v21  ;;  %v8742_v30 = vld [vmem:[%s15775_s3 + $0x1a0] sm:$0xff] }
 0x28b   :  { %v5260_v24 = vsel %vm4988_vm0, %v16311_v36, %v5259_v55  ;;  %v5274_v48 = vsel %vm4988_vm0, %v13800_v40, %v5273_v31  ;;  %v10821_v55 = vpack.c.bf16 %v8763_v19, %v8762_v59  ;;  %v5282_v45 = vsel %vm4977_vm11, %v13916_v13, %v13909_v7  ;;  %10818 = vmatprep.subr.bf16.mxu1 %v10817_v9  ;;  %v8743_v19 = vld [vmem:[%s15775_s3 + $0x1a8] sm:$0xff]  ;;  %v8764_v59 = vld [vmem:[%s15775_s3 + $0x1f8] sm:$0xff] }
 0x28c   :  { %v5276_v20 = vsel %vm4979_vm12, %v16313_v16, %v5275_v11  ;;  %10137 = vmatmul.mubr.msk.f32.gmra.mrb[30].mxu0 %vm5053_vm1, %v5260_v24  ;;  %10211 = vmatmul.mubr.msk.f32.gmra.mrb[34].mxu1 %vm5053_vm1, %v5260_v24  ;;  %v8765_v24 = vld [vmem:[%s15775_s3 + $0x200] sm:$0xff] }
 0x28d   :  { %v5277_v36 = vsel %vm4981_vm13, %v13875_v29, %v5276_v20  ;;  %10139 = vmatprep.mubr.msk.f32.mxu0 %vm5053_vm1, %v5267_v51  ;;  %10213 = vmatprep.mubr.msk.f32.mxu1 %vm5053_vm1, %v5267_v51  ;;  %v5283_v29 = vsel %vm4979_vm12, %v13919_v54, %v5282_v45  ;;  %v5232_v20 = vrot.slane %v14107_v6, %v13346_v3 }
 0x28e   :  { %v5278_v61 = vsel %vm2061_vm8, %v13942_v18, %v5277_v36  ;;  %10800 = vmatpush3.bf16.msra.mxu0 %v10797_v21  ;;  %10820 = vmatpush3.bf16.msra.mxu1 %v10817_v9  ;;  %v5284_v51 = vsel %vm4981_vm13, %v13922_v47, %v5283_v29  ;;  %v5289_v6 = vsel %vm4977_vm11, %v14055_v5, %v14031_v46  ;;  %v16314_v9 = vld [vmem:[#allocation22_spill] sm:$0xff] }
 0x28f   :  { %v5279_v11 = vsel %vm4984_vm14, %v13952_v42, %v5278_v61  ;;  %v16315_v31 = vrot.slane %v16314_v9, %v13346_v3  ;;  %v5290_v16 = vsel %vm4979_vm12, %v14059_v49, %v5289_v6  ;;  %v10805_v61 = vpack.c.bf16 %v8743_v19, %v8742_v30  ;;  %10802 = vmatprep.subr.bf16.mxu0 %v10801_v12  ;;  %v16318_v9 = vld [vmem:[#allocation40_spill] sm:$0xff] }
 0x290   :  { %v5280_v1 = vsel %vm4986_vm15, %v13955_v37, %v5279_v11  ;;  %10140 = vmatmul.mubr.msk.f32.gmra.mrb[32].mxu0 %vm5053_vm1, %v5274_v48  ;;  %10214 = vmatmul.mubr.msk.f32.gmra.mrb[36].mxu1 %vm5053_vm1, %v5274_v48  ;;  %v5291_v48 = vsel %vm4981_vm13, %v14063_v60, %v5290_v16  ;;  %v10825_v29 = vpack.c.bf16 %v8765_v24, %v8764_v59  ;;  %v8766_v59 = vld [vmem:[%s15775_s3 + $0x208] sm:$0xf]  ;;  %v16317_v24 = vld [vmem:[#allocation37_spill] sm:$0xff]  ;;  %v8778_v16 = vld [vmem:[%s15775_s3 + $0x210] sm:$0xff] }
 0x291   :  { %v5281_v21 = vsel %vm4988_vm0, %v13966_v39, %v5280_v1  ;;  %v5285_v27 = vsel %vm2061_vm8, %v16315_v31, %v5284_v51  ;;  %10822 = vmatprep.subr.bf16.mxu1 %v10821_v55  ;;  %v5292_v11 = vsel %vm2061_vm8, %v14028_v33, %v5291_v48  ;;  %v5297_v30 = vsel %vm4979_vm12, %v14090_v28, %v14249_v56  ;;  %v16319_v31 = vld [vmem:[#allocation29_spill] sm:$0xff]  ;;  %v16320_v48 = vld [vmem:[#allocation87_spill] sm:$0xff] }
 0x292   :  { %10142 = vmatprep.mubr.msk.f32.mxu0 %vm5053_vm1, %v5281_v21  ;;  %10216 = vmatprep.mubr.msk.f32.mxu1 %vm5053_vm1, %v5281_v21  ;;  %v5286_v36 = vsel %vm4984_vm14, %v13978_v25, %v5285_v27  ;;  %v5293_v25 = vsel %vm4984_vm14, %v14044_v50, %v5292_v11  ;;  %v5298_v51 = vsel %vm4981_vm13, %v14105_v15, %v5297_v30  ;;  %v16321_v11 = vld [vmem:[#allocation33_spill] sm:$0xff] }
 0x293   :  { %v5287_v45 = vsel %vm4986_vm15, %v14148_v58, %v5286_v36  ;;  %10804 = vmatpush3.bf16.msra.mxu0 %v10801_v12  ;;  %10824 = vmatpush3.bf16.msra.mxu1 %v10821_v55  ;;  %v5294_v19 = vsel %vm4986_vm15, %v5232_v20, %v5293_v25  ;;  %v5741_v12 = vsel %vm4977_vm11, %v16277_v53, %v13434_v34  ;;  %v8744_v20 = vld [vmem:[%s15775_s3 + $0x1b0] sm:$0xf]  ;;  %v16316_v34 = vld [vmem:[#allocation86_spill] sm:$0xff]  ;;  %v8779_v36 = vld [vmem:[%s15775_s3 + $0x218] sm:$0xff] }
 0x294   :  { %v5288_v1 = vsel %vm4988_vm0, %v14152_v10, %v5287_v45  ;;  %v5295_v55 = vsel %vm4988_vm0, %v14232_v41, %v5294_v19  ;;  %10806 = vmatprep.subr.bf16.mxu0 %v10805_v61  ;;  %10826 = vmatprep.subr.bf16.mxu1 %v10825_v29  ;;  %v5299_v56 = vsel %vm2061_vm8, %v14158_v57, %v5298_v51  ;;  %v16322_v25 = vld [vmem:[#allocation32_spill] sm:$0xff]  ;;  %v8800_v19 = vld [vmem:[%s15775_s3 + $0x268] sm:$0xff] }
 0x295   :  { %10143 = vmatmul.mubr.msk.f32.gmra.mrb[34].mxu0 %vm5053_vm1, %v5288_v1  ;;  %10217 = vmatmul.mubr.msk.f32.gmra.mrb[38].mxu1 %vm5053_vm1, %v5288_v1  ;;  %v5742_v6 = vsel %vm4979_vm12, %v16278_v35, %v5741_v12  ;;  %v5300_v41 = vsel %vm4984_vm14, %v16316_v34, %v5299_v56  ;;  %v5750_v27 = vsel %vm4981_vm13, %v16319_v31, %v16318_v9  ;;  %v8801_v51 = vld [vmem:[%s15775_s3 + $0x270] sm:$0xff]  ;;  %v16324_v56 = vld [vmem:[#allocation6_spill] sm:$0xff] }
 0x296   :  { %10145 = vmatprep.mubr.msk.f32.mxu0 %vm5053_vm1, %v5295_v55  ;;  %10219 = vmatprep.mubr.msk.f32.mxu1 %vm5053_vm1, %v5295_v55  ;;  %v5743_v21 = vsel %vm4981_vm13, %v16317_v24, %v5742_v6  ;;  %v5301_v45 = vsel %vm4986_vm15, %v16320_v48, %v5300_v41  ;;  %v5751_v30 = vsel %vm2061_vm8, %v16322_v25, %v5750_v27  ;;  %v16323_v12 = vld [vmem:[#allocation88_spill] sm:$0xff]  ;;  %v16325_v6 = vld [vmem:[#allocation66_spill] sm:$0xff]  ;;  %v16329_v25 = vld [vmem:[#allocation21_spill] sm:$0xff] }
 0x297   :  { %10808 = vmatpush3.bf16.msra.mxu0 %v10805_v61  ;;  %10828 = vmatpush3.bf16.msra.mxu1 %v10825_v29  ;;  %v5744_v1 = vsel %vm2061_vm8, %v16321_v11, %v5743_v21  ;;  %v5302_v55 = vsel %vm4988_vm0, %v16323_v12, %v5301_v45  ;;  %v5752_v29 = vsel %vm4984_vm14, %v16297_v2, %v5751_v30  ;;  %v8598_v41 = vrot.slane %v16325_v6, 9  ;;  %v16326_v21 = vld [vmem:[#allocation14_spill] sm:$0xff]  ;;  %v16327_v27 = vld [vmem:[#allocation20_spill] sm:$0xff]  ;;  %v8781_v30 = vld [vmem:[%s15775_s3 + $0x228] sm:$0xff] }
 0x298   :  { %v5745_v61 = vsel %vm4984_vm14, %v16324_v56, %v5744_v1  ;;  %10242 = vmatprep.subr.msk.mxu0 %vm5074_vm10, %v8744_v20  ;;  %10279 = vmatprep.subr.msk.mxu1 %vm5074_vm10, %v8766_v59  ;;  %v5753_v45 = vsel %vm4986_vm15, %v16327_v27, %v5752_v29  ;;  %v10829_v1 = vpack.c.bf16 %v8779_v36, %v8778_v16  ;;  %v8780_v56 = vld [vmem:[%s15775_s3 + $0x220] sm:$0xff]  ;;  %v16328_v2 = vld [vmem:[#allocation12_spill] sm:$0xff]  ;;  %v8802_v16 = vld [vmem:[%s15775_s3 + $0x278] sm:$0xff] }
 0x299   :  { %10146 = vmatmul.mubr.msk.f32.gmra.mrb[36].mxu0 %vm5053_vm1, %v5302_v55  ;;  %10220 = vmatmul.mubr.msk.f32.gmra.mrb[40].mxu1 %vm5053_vm1, %v5302_v55  ;;  %v5746_v9 = vsel %vm4986_vm15, %v16326_v21, %v5745_v61  ;;  %v5754_v55 = vsel %vm4988_vm0, %v16329_v25, %v5753_v45  ;;  %v10849_v24 = vpack.c.bf16 %v8801_v51, %v8800_v19  ;;  %v16330_v61 = vld [vmem:[#allocation30_spill] sm:$0xff]  ;;  %v16331_v21 = vld [vmem:[#allocation31_spill] sm:$0xff]  ;;  %v16333_v19 = vld [vmem:[#allocation56_spill] sm:$0xff] }
 0x29a   :  { %v5747_v11 = vsel %vm4988_vm0, %v16328_v2, %v5746_v9  ;;  %v5755_v29 = vsel %vm4977_vm11, %v16331_v21, %v16330_v61  ;;  %v8803_v36 = vld [vmem:[%s15775_s3 + $0x280] sm:$0xff]  ;;  %v14592_v51 = vrot.slane %v16333_v19, %v13346_v3  ;;  %v5762_v21 = vsel %vm4977_vm11, %v16305_v63, %v16304_v38  ;;  %v16334_v61 = vld [vmem:[#allocation53_spill] sm:$0xff]  ;;  %v16342_v38 = vld [vmem:[#allocation71_spill] sm:$0xff] }
 0x29b   :  { %10244 = vmatprep.mubr.msk.f32.mxu0 %vm5053_vm1, %v5747_v11  ;;  %10281 = vmatprep.mubr.msk.f32.mxu1 %vm5053_vm1, %v5747_v11  ;;  %v16332_v9 = vld [vmem:[#allocation50_spill] sm:$0xff]  ;;  %v5763_v11 = vsel %vm4979_vm12, %v16307_v0, %v5762_v21  ;;  %v10833_v25 = vpack.c.bf16 %v8781_v30, %v8780_v56  ;;  %v4483_v56 = vmax.f32 %v16325_v6, %v8598_v41  ;;  %v16336_v30 = vld [vmem:[#allocation59_spill] sm:$0xff]  ;;  %v8783_v6 = vld [vmem:[%s15775_s3 + $0x238] sm:$0xff] }
 0x29c   :  { %v5756_v45 = vsel %vm4979_vm12, %v16332_v9, %v5755_v29  ;;  %10243 = vmatpush3.msk.msra.mxu0 %vm5074_vm10, %v8744_v20  ;;  %10280 = vmatpush3.msk.msra.mxu1 %vm5074_vm10, %v8766_v59  ;;  %v5764_v19 = vsel %vm4981_vm13, %v16308_v8, %v5763_v11  ;;  %v10853_v20 = vpack.c.bf16 %v8803_v36, %v8802_v16  ;;  %v8782_v16 = vld [vmem:[%s15775_s3 + $0x230] sm:$0xff] }
 0x29d   :  { %v5757_v2 = vsel %vm4981_vm13, %v16334_v61, %v5756_v45  ;;  %10245 = vmatmul.mubr.msk.f32.vlgmr.msra.gmra.mrb[28].mxu0 %vm5053_vm1, %v5754_v55  ;;  %10282 = vmatmul.mubr.msk.f32.vlgmr.msra.gmra.mrb[32].mxu1 %vm5053_vm1, %v5754_v55  ;;  %v16335_v45 = vld [vmem:[#allocation58_spill] sm:$0xff]  ;;  %v16337_v41 = vld [vmem:[#allocation60_spill] sm:$0xff]  ;;  %v14632_v11 = vrot.slane %v4483_v56, %v13346_v3  ;;  %v5776_v56 = vsel %vm4977_vm11, %v13848_v23, %v13807_v22 }
 0x29e   :  { %v5758_v29 = vsel %vm2061_vm8, %v16298_v43, %v5757_v2  ;;  %10830 = vmatprep.subr.bf16.mxu0 %v10829_v1  ;;  %10850 = vmatprep.subr.bf16.mxu1 %v10849_v24  ;;  %v5765_v21 = vsel %vm2061_vm8, %v16335_v45, %v5764_v19  ;;  %v5769_v43 = vsel %vm4977_vm11, %v13708_v4, %v13675_v32  ;;  %v8805_v19 = vld [vmem:[%s15775_s3 + $0x290] sm:$0xff] }
 0x29f   :  { %v5759_v59 = vsel %vm4984_vm14, %v16300_v62, %v5758_v29  ;;  %10832 = vmatpush3.bf16.msra.mxu0 %v10829_v1  ;;  %10852 = vmatpush3.bf16.msra.mxu1 %v10849_v24  ;;  %v5766_v2 = vsel %vm4984_vm14, %v14592_v51, %v5765_v21  ;;  %v16338_v1 = vld [vmem:[#allocation9_spill] sm:$0xff]  ;;  %16339 = vst [vmem:[#allocation39_spill] sm:$0xff] %v14632_v11  ;;  %v8804_v29 = vld [vmem:[%s15775_s3 + $0x288] sm:$0xff] }
 0x2a0   :  { %v5760_v55 = vsel %vm4986_vm15, %v16336_v30, %v5759_v59  ;;  %v5767_v24 = vsel %vm4986_vm15, %v16338_v1, %v5766_v2  ;;  %10834 = vmatprep.subr.bf16.mxu0 %v10833_v25  ;;  %10854 = vmatprep.subr.bf16.mxu1 %v10853_v20  ;;  %v16340_v59 = vld [vmem:[#allocation64_spill] sm:$0xff]  ;;  %v10837_v32 = vpack.c.bf16 %v8783_v6, %v8782_v16 }
 0x2a1   :  { %v5761_v36 = vsel %vm4988_vm0, %v16337_v41, %v5760_v55  ;;  %v5768_v21 = vsel %vm4988_vm0, %v16340_v59, %v5767_v24  ;;  %v5770_v55 = vsel %vm4979_vm12, %v13759_v14, %v5769_v43  ;;  %v16341_v1 = vld [vmem:[#allocation72_spill] sm:$0xff]  ;;  %v10857_v22 = vpack.c.bf16 %v8805_v19, %v8804_v29 }
 0x2a2   :  { %10247 = vmatprep.mubr.msk.f32.mxu0 %vm5053_vm1, %v5761_v36  ;;  %10284 = vmatprep.mubr.msk.f32.mxu1 %vm5053_vm1, %v5761_v36  ;;  %v5771_v2 = vsel %vm4981_vm13, %v13762_v17, %v5770_v55  ;;  %v5777_v36 = vsel %vm4979_vm12, %v16341_v1, %v5776_v56  ;;  %v16343_v55 = vld [vmem:[#allocation7_spill] sm:$0xff]  ;;  %v16344_v17 = vld [vmem:[#allocation48_spill] sm:$0xff] }
 0x2a3   :  { %10248 = vmatmul.mubr.msk.f32.gmra.mrb[30].mxu0 %vm5053_vm1, %v5768_v21  ;;  %10285 = vmatmul.mubr.msk.f32.gmra.mrb[34].mxu1 %vm5053_vm1, %v5768_v21  ;;  %v5772_v24 = vsel %vm2061_vm8, %v16342_v38, %v5771_v2  ;;  %v5778_v43 = vsel %vm4981_vm13, %v13789_v44, %v5777_v36  ;;  %v5783_v16 = vsel %vm4977_vm11, %v16344_v17, %v16343_v55  ;;  %v16346_v56 = vld [vmem:[#allocation44_spill] sm:$0xff]  ;;  %v8784_v36 = vld [vmem:[%s15775_s3 + $0x240] sm:$0xff] }
 0x2a4   :  { %10836 = vmatpush3.bf16.msra.mxu0 %v10833_v25  ;;  %10856 = vmatpush3.bf16.msra.mxu1 %v10853_v20  ;;  %v5773_v23 = vsel %vm4984_vm14, %v16310_v26, %v5772_v24  ;;  %v5779_v21 = vsel %vm2061_vm8, %v13797_v52, %v5778_v43  ;;  %v5790_v25 = vsel %vm4977_vm11, %v13922_v47, %v13919_v54  ;;  %v16345_v20 = vld [vmem:[#allocation46_spill] sm:$0xff]  ;;  %v8785_v24 = vld [vmem:[%s15775_s3 + $0x248] sm:$0xff]  ;;  %v8806_v54 = vld [vmem:[%s15775_s3 + $0x298] sm:$0xff] }
 0x2a5   :  { %10838 = vmatprep.subr.bf16.mxu0 %v10837_v32  ;;  %v5774_v6 = vsel %vm4986_vm15, %v16345_v20, %v5773_v23  ;;  %v5780_v29 = vsel %vm4984_vm14, %v13800_v40, %v5779_v21  ;;  %10858 = vmatprep.subr.bf16.mxu1 %v10857_v22  ;;  %v5784_v19 = vsel %vm4979_vm12, %v13942_v18, %v5783_v16  ;;  %v16347_v43 = vld [vmem:[#allocation34_spill] sm:$0xff]  ;;  %v16348_v16 = vld [vmem:[#allocation76_spill] sm:$0xff] }
 0x2a6   :  { %v5791_v2 = vsel %vm4979_vm12, %v16346_v56, %v5790_v25  ;;  %v5775_v23 = vsel %vm4988_vm0, %v14632_v11, %v5774_v6  ;;  %v5781_v21 = vsel %vm4986_vm15, %v16347_v43, %v5780_v29  ;;  %v5785_v18 = vsel %vm4981_vm13, %v13952_v42, %v5784_v19  ;;  %v8807_v55 = vld [vmem:[%s15775_s3 + $0x2a0] sm:$0xff]  ;;  %v16349_v56 = vld [vmem:[#allocation79_spill] sm:$0xff]  ;;  %v16350_v6 = vld [vmem:[#allocation17_spill] sm:$0xff] }
 0x2a7   :  { %v5792_v25 = vsel %vm4981_vm13, %v16348_v16, %v5791_v2  ;;  %v8654_v47 = vrot.slane %v16349_v56, 9  ;;  %10250 = vmatprep.mubr.msk.f32.mxu0 %vm5053_vm1, %v5775_v23  ;;  %10287 = vmatprep.mubr.msk.f32.mxu1 %vm5053_vm1, %v5775_v23  ;;  %v5782_v29 = vsel %vm4988_vm0, %v16350_v6, %v5781_v21  ;;  %v5786_v19 = vsel %vm2061_vm8, %v13955_v37, %v5785_v18 }
 0x2a8   :  { %v5793_v2 = vsel %vm2061_vm8, %v14148_v58, %v5792_v25  ;;  %10251 = vmatmul.mubr.msk.f32.gmra.mrb[32].mxu0 %vm5053_vm1, %v5782_v29  ;;  %10288 = vmatmul.mubr.msk.f32.gmra.mrb[36].mxu1 %vm5053_vm1, %v5782_v29  ;;  %v5787_v16 = vsel %vm4984_vm14, %v13966_v39, %v5786_v19  ;;  %v10841_v23 = vpack.c.bf16 %v8785_v24, %v8784_v36  ;;  %v8786_v25 = vld [vmem:[%s15775_s3 + $0x250] sm:$0xff]  ;;  %v8787_v29 = vld [vmem:[%s15775_s3 + $0x258] sm:$0xff]  ;;  %v8808_v19 = vld [vmem:[%s15775_s3 + $0x2a8] sm:$0xff] }
 0x2a9   :  { %v5794_v42 = vsel %vm4984_vm14, %v14152_v10, %v5793_v2  ;;  %v5788_v21 = vsel %vm4986_vm15, %v13909_v7, %v5787_v16  ;;  %10840 = vmatpush3.bf16.msra.mxu0 %v10837_v32  ;;  %10860 = vmatpush3.bf16.msra.mxu1 %v10857_v22  ;;  %v10861_v58 = vpack.c.bf16 %v8807_v55, %v8806_v54  ;;  %v16351_v32 = vld [vmem:[#allocation49_spill] sm:$0xff]  ;;  %v8809_v2 = vld [vmem:[%s15775_s3 + $0x2b0] sm:$0xff] }
 0x2aa   :  { %v5795_v18 = vsel %vm4986_vm15, %v14031_v46, %v5794_v42  ;;  %v5789_v36 = vsel %vm4988_vm0, %v13916_v13, %v5788_v21  ;;  %10842 = vmatprep.subr.bf16.mxu0 %v10841_v23  ;;  %v14728_v22 = vrot.slane %v16351_v32, %v13346_v3  ;;  %v5797_v54 = vsel %vm4977_vm11, %v14063_v60, %v14059_v49 }
 0x2ab   :  { %v5796_v24 = vsel %vm4988_vm0, %v14055_v5, %v5795_v18  ;;  %10253 = vmatprep.mubr.msk.f32.mxu0 %vm5053_vm1, %v5789_v36  ;;  %10290 = vmatprep.mubr.msk.f32.mxu1 %vm5053_vm1, %v5789_v36  ;;  %v5798_v42 = vsel %vm4979_vm12, %v14028_v33, %v5797_v54  ;;  %v4539_v55 = vmax.f32 %v16349_v56, %v8654_v47  ;;  %v16352_v18 = vld [vmem:[#allocation51_spill] sm:$0xff] }
 0x2ac   :  { %v5804_v16 = vsel %vm4977_vm11, %v14105_v15, %v14090_v28  ;;  %10254 = vmatmul.mubr.msk.f32.gmra.mrb[34].mxu0 %vm5053_vm1, %v5796_v24  ;;  %10291 = vmatmul.mubr.msk.f32.gmra.mrb[38].mxu1 %vm5053_vm1, %v5796_v24  ;;  %v5799_v21 = vsel %vm4981_vm13, %v14044_v50, %v5798_v42  ;;  %v10845_v56 = vpack.c.bf16 %v8787_v29, %v8786_v25  ;;  %v16354_v29 = vld [vmem:[#allocation89_spill] sm:$0xff]  ;;  %v16364_v28 = vld [vmem:[#allocation14_spill] sm:$0xff] }
 0x2ad   :  { %v5805_v47 = vsel %vm4979_vm12, %v14158_v57, %v5804_v16  ;;  %10862 = vmatprep.subr.bf16.mxu1 %v10861_v58  ;;  %v5800_v36 = vsel %vm2061_vm8, %v16352_v18, %v5799_v21  ;;  %10844 = vmatpush3.bf16.msra.mxu0 %v10841_v23  ;;  %v14756_v32 = vrot.slane %v4539_v55, %v13346_v3  ;;  %v16355_v21 = vld [vmem:[#allocation24_spill] sm:$0xff] }
 0x2ae   :  { %v5806_v54 = vsel %vm4981_vm13, %v16316_v34, %v5805_v47  ;;  %v5801_v24 = vsel %vm4984_vm14, %v14728_v22, %v5800_v36  ;;  %10864 = vmatpush3.bf16.msra.mxu1 %v10861_v58  ;;  %10846 = vmatprep.subr.bf16.mxu0 %v10845_v56  ;;  %v10865_v25 = vpack.c.bf16 %v8809_v2, %v8808_v19  ;;  %v8822_v58 = vld [vmem:[%s15775_s3 + $0x2c0] sm:$0xff]  ;;  %v8823_v19 = vld [vmem:[%s15775_s3 + $0x2c8] sm:$0xff]  ;;  %v16356_v2 = vld [vmem:[#allocation80_spill] sm:$0xff] }
 0x2af   :  { %16353 = vst [vmem:[#allocation8_spill] sm:$0xff] %v14756_v32  ;;  %v5807_v42 = vsel %vm2061_vm8, %v16320_v48, %v5806_v54  ;;  %v5802_v16 = vsel %vm4986_vm15, %v16354_v29, %v5801_v24  ;;  %v6151_v55 = vsel %vm4977_vm11, %v16278_v35, %v16277_v53  ;;  %v6159_v47 = vsel %vm4979_vm12, %v16319_v31, %v16355_v21  ;;  %v16357_v54 = vld [vmem:[#allocation90_spill] sm:$0xff]  ;;  %v16358_v53 = vld [vmem:[#allocation37_spill] sm:$0xff]  ;;  %v16359_v29 = vld [vmem:[#allocation32_spill] sm:$0xff] }
 0x2b0   :  { %v5808_v23 = vsel %vm4984_vm14, %v16323_v12, %v5807_v42  ;;  %v5803_v36 = vsel %vm4988_vm0, %v16356_v2, %v5802_v16  ;;  %10866 = vmatprep.subr.bf16.mxu1 %v10865_v25  ;;  %v6152_v42 = vsel %vm4979_vm12, %v16358_v53, %v6151_v55  ;;  %v6160_v31 = vsel %vm4981_vm13, %v16359_v29, %v6159_v47  ;;  %v8844_v21 = vld [vmem:[%s15775_s3 + $0x318] sm:$0xff]  ;;  %v8845_v35 = vld [vmem:[%s15775_s3 + $0x320] sm:$0xff]  ;;  %v16361_v29 = vld [vmem:[#allocation43_spill] sm:$0xff] }
 0x2b1   :  { %v5809_v24 = vsel %vm4986_vm15, %v16357_v54, %v5808_v23  ;;  %10256 = vmatprep.mubr.msk.f32.mxu0 %vm5053_vm1, %v5803_v36  ;;  %10293 = vmatprep.mubr.msk.f32.mxu1 %vm5053_vm1, %v5803_v36  ;;  %v16360_v23 = vld [vmem:[#allocation33_spill] sm:$0xff]  ;;  %v8788_v47 = vld [vmem:[%s15775_s3 + $0x260] sm:$0xf]  ;;  %v6161_v53 = vsel %vm2061_vm8, %v16361_v29, %v6160_v31 }
 0x2b2   :  { %v5810_v16 = vsel %vm4988_vm0, %v14756_v32, %v5809_v24  ;;  %v6153_v55 = vsel %vm4981_vm13, %v16360_v23, %v6152_v42  ;;  %v8810_v54 = vld [vmem:[%s15775_s3 + $0x2b8] sm:$0xf]  ;;  %v16362_v36 = vld [vmem:[#allocation6_spill] sm:$0xff]  ;;  %v6162_v42 = vsel %vm4984_vm14, %v16327_v27, %v6161_v53  ;;  %v10869_v32 = vpack.c.bf16 %v8823_v19, %v8822_v58  ;;  %v8824_v23 = vld [vmem:[%s15775_s3 + $0x2d0] sm:$0xff]  ;;  %10848 = vmatpush3.bf16.msra.mxu0 %v10845_v56 }
 0x2b3   :  { %10257 = vmatmul.mubr.msk.f32.gmra.mrb[36].mxu0 %vm5053_vm1, %v5810_v16  ;;  %10294 = vmatmul.mubr.msk.f32.gmra.mrb[40].mxu1 %vm5053_vm1, %v5810_v16  ;;  %v6154_v24 = vsel %vm2061_vm8, %v16362_v36, %v6153_v55  ;;  %v8825_v12 = vld [vmem:[%s15775_s3 + $0x2d8] sm:$0xff]  ;;  %v10889_v53 = vpack.c.bf16 %v8845_v35, %v8844_v21  ;;  %v8846_v58 = vld [vmem:[%s15775_s3 + $0x328] sm:$0xff]  ;;  %v8847_v19 = vld [vmem:[%s15775_s3 + $0x330] sm:$0xff] }
 0x2b4   :  { %v16363_v31 = vld [vmem:[#allocation65_spill] sm:$0xff]  ;;  %v6155_v16 = vsel %vm4984_vm14, %v16364_v28, %v6154_v24  ;;  %10868 = vmatpush3.bf16.msra.mxu1 %v10865_v25  ;;  %v16366_v27 = vld [vmem:[#allocation12_spill] sm:$0xff]  ;;  %10316 = vmatprep.subr.msk.mxu0 %vm5074_vm10, %v8788_v47  ;;  %v16367_v56 = vld [vmem:[#allocation30_spill] sm:$0xff]  ;;  %v10893_v28 = vpack.c.bf16 %v8847_v19, %v8846_v58 }
 0x2b5   :  { %v8599_v29 = vrot.slane %v16363_v31, 9  ;;  %v16365_v55 = vld [vmem:[#allocation21_spill] sm:$0xff]  ;;  %v6156_v48 = vsel %vm4986_vm15, %v16366_v27, %v6155_v16  ;;  %10353 = vmatprep.subr.msk.mxu1 %vm5074_vm10, %v8810_v54  ;;  %v16368_v24 = vld [vmem:[#allocation31_spill] sm:$0xff]  ;;  %v16369_v21 = vld [vmem:[#allocation26_spill] sm:$0xff]  ;;  %v6172_v16 = vsel %vm4977_vm11, %v16307_v0, %v16305_v63  ;;  %v10873_v27 = vpack.c.bf16 %v8825_v12, %v8824_v23 }
 0x2b6   :  { %v6163_v36 = vsel %vm4986_vm15, %v16365_v55, %v6162_v42  ;;  %v6165_v35 = vsel %vm4977_vm11, %v16332_v9, %v16368_v24  ;;  %v6157_v42 = vsel %vm4988_vm0, %v16369_v21, %v6156_v48  ;;  %v6173_v24 = vsel %vm4979_vm12, %v16308_v8, %v6172_v16  ;;  %10317 = vmatpush3.msk.msra.mxu0 %vm5074_vm10, %v8788_v47  ;;  %v8826_v19 = vld [vmem:[%s15775_s3 + $0x2e0] sm:$0xff] }
 0x2b7   :  { %v6164_v25 = vsel %vm4988_vm0, %v16367_v56, %v6163_v36  ;;  %v6166_v55 = vsel %vm4979_vm12, %v16334_v61, %v6165_v35  ;;  %10318 = vmatprep.mubr.msk.f32.mxu0 %vm5053_vm1, %v6157_v42  ;;  %10355 = vmatprep.mubr.msk.f32.mxu1 %vm5053_vm1, %v6157_v42  ;;  %v16370_v36 = vld [vmem:[#allocation54_spill] sm:$0xff]  ;;  %v6174_v12 = vsel %vm4981_vm13, %v16335_v45, %v6173_v24 }
 0x2b8   :  { %v6167_v56 = vsel %vm4981_vm13, %v16370_v36, %v6166_v55  ;;  %10354 = vmatpush3.msk.msra.mxu1 %vm5074_vm10, %v8810_v54  ;;  %v4484_v23 = vmax.f32 %v16363_v31, %v8599_v29  ;;  %10319 = vmatmul.mubr.msk.f32.vlgmr.msra.gmra.mrb[28].mxu0 %vm5053_vm1, %v6164_v25  ;;  %v6175_v47 = vsel %vm2061_vm8, %v14592_v51, %v6174_v12  ;;  %v16371_v29 = vld [vmem:[#allocation69_spill] sm:$0xff]  ;;  %v16374_v42 = vld [vmem:[#allocation70_spill] sm:$0xff] }
 0x2b9   :  { %v6168_v48 = vsel %vm2061_vm8, %v16300_v62, %v6167_v56  ;;  %10356 = vmatmul.mubr.msk.f32.vlgmr.msra.gmra.mrb[32].mxu1 %vm5053_vm1, %v6164_v25  ;;  %v6179_v54 = vsel %vm4977_vm11, %v13759_v14, %v13708_v4  ;;  %10870 = vmatprep.subr.bf16.mxu0 %v10869_v32  ;;  %v6176_v31 = vsel %vm4984_vm14, %v16371_v29, %v6175_v47  ;;  %v8827_v56 = vld [vmem:[%s15775_s3 + $0x2e8] sm:$0xff]  ;;  %v16373_v25 = vld [vmem:[#allocation61_spill] sm:$0xff]  ;;  %v8849_v12 = vld [vmem:[%s15775_s3 + $0x340] sm:$0xff] }
 0x2ba   :  { %v6169_v55 = vsel %vm4984_vm14, %v16336_v30, %v6168_v48  ;;  %10890 = vmatprep.subr.bf16.mxu1 %v10889_v53  ;;  %v14874_v58 = vrot.slane %v4484_v23, %v13346_v3  ;;  %10872 = vmatpush3.bf16.msra.mxu0 %v10869_v32  ;;  %v6177_v35 = vsel %vm4986_vm15, %v16340_v59, %v6176_v31  ;;  %v8848_v48 = vld [vmem:[%s15775_s3 + $0x338] sm:$0xff]  ;;  %v16375_v32 = vld [vmem:[#allocation62_spill] sm:$0xff] }
 0x2bb   :  { %v6170_v62 = vsel %vm4986_vm15, %v16337_v41, %v6169_v55  ;;  %10892 = vmatpush3.bf16.msra.mxu1 %v10889_v53  ;;  %v6180_v16 = vsel %vm4979_vm12, %v16374_v42, %v6179_v54  ;;  %v6178_v53 = vsel %vm4988_vm0, %v16375_v32, %v6177_v35  ;;  %v16376_v23 = vld [vmem:[#allocation10_spill] sm:$0xff]  ;;  %10874 = vmatprep.subr.bf16.mxu0 %v10873_v27 }
 0x2bc   :  { %16372 = vst [vmem:[#allocation5_spill] sm:$0xff] %v14874_v58  ;;  %v6171_v24 = vsel %vm4988_vm0, %v16373_v25, %v6170_v62  ;;  %v6181_v59 = vsel %vm4981_vm13, %v16342_v38, %v6180_v16  ;;  %v6186_v55 = vsel %vm4977_vm11, %v16341_v1, %v16376_v23  ;;  %v10877_v62 = vpack.c.bf16 %v8827_v56, %v8826_v19  ;;  %v8828_v56 = vld [vmem:[%s15775_s3 + $0x2f0] sm:$0xff] }
 0x2bd   :  { %10321 = vmatprep.mubr.msk.f32.mxu0 %vm5053_vm1, %v6171_v24  ;;  %10358 = vmatprep.mubr.msk.f32.mxu1 %vm5053_vm1, %v6171_v24  ;;  %v6182_v47 = vsel %vm2061_vm8, %v16310_v26, %v6181_v59  ;;  %v6187_v54 = vsel %vm4979_vm12, %v13789_v44, %v6186_v55  ;;  %v10897_v35 = vpack.c.bf16 %v8849_v12, %v8848_v48  ;;  %v16377_v59 = vld [vmem:[#allocation16_spill] sm:$0xff]  ;;  %v8829_v48 = vld [vmem:[%s15775_s3 + $0x2f8] sm:$0xff]  ;;  %v8850_v55 = vld [vmem:[%s15775_s3 + $0x348] sm:$0xff] }
 0x2be   :  { %10322 = vmatmul.mubr.msk.f32.gmra.mrb[30].mxu0 %vm5053_vm1, %v6178_v53  ;;  %10359 = vmatmul.mubr.msk.f32.gmra.mrb[34].mxu1 %vm5053_vm1, %v6178_v53  ;;  %v6183_v31 = vsel %vm4984_vm14, %v16345_v20, %v6182_v47  ;;  %v6188_v24 = vsel %vm4981_vm13, %v13797_v52, %v6187_v54  ;;  %v6193_v19 = vsel %vm4977_vm11, %v16377_v59, %v16344_v17  ;;  %v8851_v47 = vld [vmem:[%s15775_s3 + $0x350] sm:$0xff]  ;;  %v16379_v54 = vld [vmem:[#allocation78_spill] sm:$0xff] }
 0x2bf   :  { %10894 = vmatprep.subr.bf16.mxu1 %v10893_v28  ;;  %v6184_v16 = vsel %vm4986_vm15, %v14632_v11, %v6183_v31  ;;  %10876 = vmatpush3.bf16.msra.mxu0 %v10873_v27  ;;  %v6189_v53 = vsel %vm2061_vm8, %v13800_v40, %v6188_v24  ;;  %v16378_v27 = vld [vmem:[#allocation75_spill] sm:$0xff]  ;;  %v8655_v31 = vrot.slane %v16379_v54, 9  ;;  %v16381_v59 = vld [vmem:[#allocation44_spill] sm:$0xff] }
 0x2c0   :  { %10896 = vmatpush3.bf16.msra.mxu1 %v10893_v28  ;;  %v6185_v12 = vsel %vm4988_vm0, %v14874_v58, %v6184_v16  ;;  %v6190_v28 = vsel %vm4984_vm14, %v16347_v43, %v6189_v53  ;;  %10878 = vmatprep.subr.bf16.mxu0 %v10877_v62  ;;  %v6194_v23 = vsel %vm4979_vm12, %v16378_v27, %v6193_v19  ;;  %v16380_v53 = vld [vmem:[#allocation13_spill] sm:$0xff]  ;;  %v16382_v27 = vld [vmem:[#allocation7_spill] sm:$0xff]  ;;  %v16383_v43 = vld [vmem:[#allocation76_spill] sm:$0xff] }
 0x2c1   :  { %10898 = vmatprep.subr.bf16.mxu1 %v10897_v35  ;;  %10324 = vmatprep.mubr.msk.f32.mxu0 %vm5053_vm1, %v6185_v12  ;;  %v6191_v24 = vsel %vm4986_vm15, %v16350_v6, %v6190_v28  ;;  %v6195_v16 = vsel %vm4981_vm13, %v13955_v37, %v6194_v23  ;;  %v6200_v19 = vsel %vm4977_vm11, %v16381_v59, %v16380_v53  ;;  %v16384_v23 = vld [vmem:[#allocation45_spill] sm:$0xff] }
 0x2c2   :  { %10361 = vmatprep.mubr.msk.f32.mxu1 %vm5053_vm1, %v6185_v12  ;;  %v6192_v17 = vsel %vm4988_vm0, %v16382_v27, %v6191_v24  ;;  %v6196_v58 = vsel %vm2061_vm8, %v13966_v39, %v6195_v16  ;;  %v6201_v11 = vsel %vm4979_vm12, %v16383_v43, %v6200_v19  ;;  %v10881_v12 = vpack.c.bf16 %v8829_v48, %v8828_v56  ;;  %v8853_v19 = vld [vmem:[%s15775_s3 + $0x360] sm:$0xff] }
 0x2c3   :  { %10325 = vmatmul.mubr.msk.f32.gmra.mrb[32].mxu0 %vm5053_vm1, %v6192_v17  ;;  %10362 = vmatmul.mubr.msk.f32.gmra.mrb[36].mxu1 %vm5053_vm1, %v6192_v17  ;;  %v6197_v28 = vsel %vm4984_vm14, %v13909_v7, %v6196_v58  ;;  %v6202_v53 = vsel %vm4981_vm13, %v16384_v23, %v6201_v11  ;;  %v10901_v59 = vpack.c.bf16 %v8851_v47, %v8850_v55  ;;  %v8830_v17 = vld [vmem:[%s15775_s3 + $0x300] sm:$0xff]  ;;  %v8831_v11 = vld [vmem:[%s15775_s3 + $0x308] sm:$0xff]  ;;  %v16385_v58 = vld [vmem:[#allocation36_spill] sm:$0xff] }
 0x2c4   :  { %v6198_v24 = vsel %vm4986_vm15, %v13916_v13, %v6197_v28  ;;  %10880 = vmatpush3.bf16.msra.mxu0 %v10877_v62  ;;  %10900 = vmatpush3.bf16.msra.mxu1 %v10897_v35  ;;  %v6203_v16 = vsel %vm2061_vm8, %v14152_v10, %v6202_v53  ;;  %v6207_v56 = vsel %vm4977_vm11, %v14028_v33, %v14063_v60  ;;  %v8852_v53 = vld [vmem:[%s15775_s3 + $0x358] sm:$0xff]  ;;  %v16392_v60 = vld [vmem:[#allocation3_spill] sm:$0xff] }
 0x2c5   :  { %v6199_v48 = vsel %vm4988_vm0, %v16385_v58, %v6198_v24  ;;  %v6204_v62 = vsel %vm4984_vm14, %v14031_v46, %v6203_v16  ;;  %10882 = vmatprep.subr.bf16.mxu0 %v10881_v12  ;;  %10902 = vmatprep.subr.bf16.mxu1 %v10901_v59  ;;  %v6208_v10 = vsel %vm4979_vm12, %v14044_v50, %v6207_v56 }
 0x2c6   :  { %10327 = vmatprep.mubr.msk.f32.mxu0 %vm5053_vm1, %v6199_v48  ;;  %10364 = vmatprep.mubr.msk.f32.mxu1 %vm5053_vm1, %v6199_v48  ;;  %v6205_v35 = vsel %vm4986_vm15, %v14055_v5, %v6204_v62  ;;  %v6209_v55 = vsel %vm4981_vm13, %v16352_v18, %v6208_v10  ;;  %v4540_v47 = vmax.f32 %v16379_v54, %v8655_v31  ;;  %v16386_v54 = vld [vmem:[#allocation85_spill] sm:$0xff] }
 0x2c7   :  { %v6206_v28 = vsel %vm4988_vm0, %v14059_v49, %v6205_v35  ;;  %v6210_v24 = vsel %vm2061_vm8, %v14728_v22, %v6209_v55  ;;  %v6214_v16 = vsel %vm4977_vm11, %v14158_v57, %v14105_v15  ;;  %v10885_v56 = vpack.c.bf16 %v8831_v11, %v8830_v17  ;;  %v16387_v35 = vld [vmem:[#allocation87_spill] sm:$0xff]  ;;  %v16388_v55 = vld [vmem:[#allocation81_spill] sm:$0xff]  ;;  %v16389_v15 = vld [vmem:[#allocation88_spill] sm:$0xff] }
 0x2c8   :  { %10328 = vmatmul.mubr.msk.f32.gmra.mrb[34].mxu0 %vm5053_vm1, %v6206_v28  ;;  %10365 = vmatmul.mubr.msk.f32.gmra.mrb[38].mxu1 %vm5053_vm1, %v6206_v28  ;;  %v6211_v31 = vsel %vm4984_vm14, %v16386_v54, %v6210_v24  ;;  %v15004_v48 = vrot.slane %v4540_v47, %v13346_v3  ;;  %v6215_v62 = vsel %vm4979_vm12, %v16316_v34, %v6214_v16  ;;  %v16390_v47 = vld [vmem:[#allocation38_spill] sm:$0xff]  ;;  %v16391_v54 = vld [vmem:[#allocation37_spill] sm:$0xff]  ;;  %v16393_v34 = vld [vmem:[#allocation32_spill] sm:$0xff] }
 0x2c9   :  { %v6212_v10 = vsel %vm4986_vm15, %v16356_v2, %v6211_v31  ;;  %10884 = vmatpush3.bf16.msra.mxu0 %v10881_v12  ;;  %10904 = vmatpush3.bf16.msra.mxu1 %v10901_v59  ;;  %v6216_v17 = vsel %vm4981_vm13, %v16387_v35, %v6215_v62  ;;  %v10905_v11 = vpack.c.bf16 %v8853_v19, %v8852_v53  ;;  %v16394_v59 = vld [vmem:[#allocation90_spill] sm:$0xff]  ;;  %v16395_v53 = vld [vmem:[#allocation33_spill] sm:$0xff]  ;;  %v16396_v31 = vld [vmem:[#allocation43_spill] sm:$0xff] }
 0x2ca   :  { %v6213_v28 = vsel %vm4988_vm0, %v16388_v55, %v6212_v10  ;;  %v6217_v24 = vsel %vm2061_vm8, %v16389_v15, %v6216_v17  ;;  %10886 = vmatprep.subr.bf16.mxu0 %v10885_v56  ;;  %v6561_v16 = vsel %vm4977_vm11, %v16391_v54, %v16390_v47  ;;  %v6569_v2 = vsel %vm4979_vm12, %v16393_v34, %v16392_v60  ;;  %v16397_v10 = vld [vmem:[#allocation8_spill] sm:$0xff]  ;;  %v16398_v17 = vld [vmem:[#allocation6_spill] sm:$0xff] }
 0x2cb   :  { %10330 = vmatprep.mubr.msk.f32.mxu0 %vm5053_vm1, %v6213_v28  ;;  %10367 = vmatprep.mubr.msk.f32.mxu1 %vm5053_vm1, %v6213_v28  ;;  %v6218_v12 = vsel %vm4984_vm14, %v16394_v59, %v6217_v24  ;;  %v6562_v19 = vsel %vm4979_vm12, %v16395_v53, %v6561_v16  ;;  %v6570_v62 = vsel %vm4981_vm13, %v16396_v31, %v6569_v2  ;;  %v8832_v34 = vld [vmem:[%s15775_s3 + $0x310] sm:$0xf]  ;;  %v8854_v28 = vld [vmem:[%s15775_s3 + $0x368] sm:$0xf] }
 0x2cc   :  { %v6219_v54 = vsel %vm4986_vm15, %v16397_v10, %v6218_v12  ;;  %10906 = vmatprep.subr.bf16.mxu1 %v10905_v11  ;;  %v6563_v60 = vsel %vm4981_vm13, %v16398_v17, %v6562_v19  ;;  %v16399_v24 = vld [vmem:[#allocation20_spill] sm:$0xff]  ;;  %v6575_v16 = vsel %vm4977_vm11, %v16334_v61, %v16332_v9  ;;  %v16400_v12 = vld [vmem:[#allocation14_spill] sm:$0xff]  ;;  %v16401_v19 = vld [vmem:[#allocation21_spill] sm:$0xff] }
 0x2cd   :  { %v6571_v47 = vsel %vm2061_vm8, %v16399_v24, %v6570_v62  ;;  %v6220_v2 = vsel %vm4988_vm0, %v15004_v48, %v6219_v54  ;;  %10888 = vmatpush3.bf16.msra.mxu0 %v10885_v56  ;;  %v6564_v53 = vsel %vm2061_vm8, %v16400_v12, %v6563_v60  ;;  %10908 = vmatpush3.bf16.msra.mxu1 %v10905_v11  ;;  %v16402_v17 = vld [vmem:[#allocation67_spill] sm:$0xff]  ;;  %v16403_v62 = vld [vmem:[#allocation12_spill] sm:$0xff]  ;;  %v16404_v9 = vld [vmem:[#allocation30_spill] sm:$0xff] }
 0x2ce   :  { %v6572_v31 = vsel %vm4984_vm14, %v16401_v19, %v6571_v47  ;;  %v8600_v10 = vrot.slane %v16402_v17, 9  ;;  %10331 = vmatmul.mubr.msk.f32.gmra.mrb[36].mxu0 %vm5053_vm1, %v6220_v2  ;;  %10368 = vmatmul.mubr.msk.f32.gmra.mrb[40].mxu1 %vm5053_vm1, %v6220_v2  ;;  %v6565_v61 = vsel %vm4984_vm14, %v16403_v62, %v6564_v53  ;;  %v6576_v56 = vsel %vm4979_vm12, %v16370_v36, %v6575_v16  ;;  %v16405_v60 = vld [vmem:[#allocation31_spill] sm:$0xff]  ;;  %v16406_v47 = vld [vmem:[#allocation52_spill] sm:$0xff] }
 0x2cf   :  { %v6573_v54 = vsel %vm4986_vm15, %v16404_v9, %v6572_v31  ;;  %v6566_v11 = vsel %vm4986_vm15, %v16369_v21, %v6565_v61  ;;  %10390 = vmatprep.subr.msk.mxu0 %vm5074_vm10, %v8832_v34  ;;  %10427 = vmatprep.subr.msk.mxu1 %vm5074_vm10, %v8854_v28  ;;  %v16407_v2 = vrot.slane %v16406_v47, %v13346_v3  ;;  %v16408_v53 = vld [vmem:[#allocation23_spill] sm:$0xff] }
 0x2d0   :  { %v6574_v24 = vsel %vm4988_vm0, %v16405_v60, %v6573_v54  ;;  %v6567_v19 = vsel %vm4988_vm0, %v16408_v53, %v6566_v11  ;;  %v16409_v21 = vld [vmem:[#allocation27_spill] sm:$0xff]  ;;  %v6582_v31 = vsel %vm4977_vm11, %v16308_v8, %v16307_v0  ;;  %v4485_v9 = vmax.f32 %v16402_v17, %v8600_v10  ;;  %v16415_v60 = vld [vmem:[#allocation44_spill] sm:$0xff]  ;;  %v16417_v53 = vld [vmem:[#allocation13_spill] sm:$0xff] }
 0x2d1   :  { %v6577_v12 = vsel %vm4981_vm13, %v16407_v2, %v6576_v56  ;;  %v6540_v16 = vrot.slane %v16409_v21, %v13346_v3  ;;  %10392 = vmatprep.mubr.msk.f32.mxu0 %vm5053_vm1, %v6567_v19  ;;  %10429 = vmatprep.mubr.msk.f32.mxu1 %vm5053_vm1, %v6567_v19  ;;  %v6583_v61 = vsel %vm4979_vm12, %v16335_v45, %v6582_v31  ;;  %v16414_v56 = vld [vmem:[#allocation5_spill] sm:$0xff]  ;;  %v16418_v19 = vld [vmem:[#allocation42_spill] sm:$0xff] }
 0x2d2   :  { %v6578_v36 = vsel %vm2061_vm8, %v16336_v30, %v6577_v12  ;;  %10391 = vmatpush3.msk.msra.mxu0 %vm5074_vm10, %v8832_v34  ;;  %10428 = vmatpush3.msk.msra.mxu1 %vm5074_vm10, %v8854_v28  ;;  %v6584_v0 = vsel %vm4981_vm13, %v14592_v51, %v6583_v61  ;;  %v6589_v8 = vsel %vm4977_vm11, %v16374_v42, %v13759_v14  ;;  %v16410_v34 = vld [vmem:[#allocation19_spill] sm:$0xff] }
 0x2d3   :  { %v6579_v62 = vsel %vm4984_vm14, %v16337_v41, %v6578_v36  ;;  %10393 = vmatmul.mubr.msk.f32.vlgmr.msra.gmra.mrb[28].mxu0 %vm5053_vm1, %v6574_v24  ;;  %10430 = vmatmul.mubr.msk.f32.vlgmr.msra.gmra.mrb[32].mxu1 %vm5053_vm1, %v6574_v24  ;;  %v6585_v41 = vsel %vm2061_vm8, %v16371_v29, %v6584_v0  ;;  %v6544_v10 = vrot.slane %v4485_v9, %v13346_v3 }
 0x2d4   :  { %v6580_v30 = vsel %vm4986_vm15, %v16373_v25, %v6579_v62  ;;  %v6586_v51 = vsel %vm4984_vm14, %v6540_v16, %v6585_v41  ;;  %v6590_v14 = vsel %vm4979_vm12, %v16342_v38, %v6589_v8  ;;  %v6596_v25 = vsel %vm4977_vm11, %v13789_v44, %v16341_v1  ;;  %v16423_v8 = vld [vmem:[#allocation85_spill] sm:$0xff]  ;;  %v16424_v41 = vld [vmem:[#allocation84_spill] sm:$0xff] }
 0x2d5   :  { %v6581_v45 = vsel %vm4988_vm0, %v16305_v63, %v6580_v30  ;;  %v6587_v63 = vsel %vm4986_vm15, %v16375_v32, %v6586_v51  ;;  %v6591_v29 = vsel %vm4981_vm13, %v16310_v26, %v6590_v14  ;;  %v6597_v42 = vsel %vm4979_vm12, %v13797_v52, %v6596_v25  ;;  %v16411_v52 = vld [vmem:[#allocation39_spill] sm:$0xff]  ;;  %v16422_v30 = vld [vmem:[#allocation77_spill] sm:$0xff]  ;;  %v16425_v51 = vld [vmem:[#allocation8_spill] sm:$0xff] }
 0x2d6   :  { %10395 = vmatprep.mubr.msk.f32.mxu0 %vm5053_vm1, %v6581_v45  ;;  %10432 = vmatprep.mubr.msk.f32.mxu1 %vm5053_vm1, %v6581_v45  ;;  %v6604_v28 = vsel %vm4979_vm12, %v13955_v37, %v16410_v34  ;;  %v6588_v38 = vsel %vm4988_vm0, %v13708_v4, %v6587_v63  ;;  %v6592_v17 = vsel %vm2061_vm8, %v16345_v20, %v6591_v29  ;;  %v16412_v37 = vld [vmem:[#allocation34_spill] sm:$0xff]  ;;  %v16413_v20 = vld [vmem:[#allocation83_spill] sm:$0xff]  ;;  %v8907_v25 = vld [vmem:[%s15777_s5 + $0x50] sm:$0xff] }
 0x2d7   :  { %v6598_v44 = vsel %vm4981_vm13, %v13800_v40, %v6597_v42  ;;  %v6605_v1 = vsel %vm4981_vm13, %v13966_v39, %v6604_v28  ;;  %10396 = vmatmul.mubr.msk.f32.gmra.mrb[30].mxu0 %vm5053_vm1, %v6588_v38  ;;  %10433 = vmatmul.mubr.msk.f32.gmra.mrb[34].mxu1 %vm5053_vm1, %v6588_v38  ;;  %v6593_v26 = vsel %vm4984_vm14, %v16411_v52, %v6592_v17  ;;  %v8656_v54 = vrot.slane %v16413_v20, 9  ;;  %v8908_v63 = vld [vmem:[%s15777_s5 + $0x58] sm:$0xff]  ;;  %v8909_v29 = vld [vmem:[%s15777_s5 + $0x60] sm:$0xff]  ;;  %v8910_v42 = vld [vmem:[%s15777_s5 + $0x68] sm:$0xff] }
 0x2d8   :  { %v6599_v32 = vsel %vm2061_vm8, %v16412_v37, %v6598_v44  ;;  %v6606_v4 = vsel %vm2061_vm8, %v13909_v7, %v6605_v1  ;;  %v6594_v40 = vsel %vm4986_vm15, %v16414_v56, %v6593_v26  ;;  %v6610_v24 = vsel %vm4977_vm11, %v16383_v43, %v16415_v60  ;;  %v7346_v34 = vld [vmem:[%s15777_s5] sm:$0xff]  ;;  %v7347_v38 = vld [vmem:[%s15777_s5 + $0x8] sm:$0xff]  ;;  %v8911_v17 = vld [vmem:[%s15777_s5 + $0x70] sm:$0xff] }
 0x2d9   :  { %v6600_v39 = vsel %vm4984_vm14, %v16350_v6, %v6599_v32  ;;  %v6607_v11 = vsel %vm4984_vm14, %v13916_v13, %v6606_v4  ;;  %v6595_v47 = vsel %vm4988_vm0, %v6544_v10, %v6594_v40  ;;  %v6611_v12 = vsel %vm4979_vm12, %v16384_v23, %v6610_v24  ;;  %v16416_v13 = vld [vmem:[#allocation48_spill] sm:$0xff]  ;;  %v8912_v44 = vld [vmem:[%s15777_s5 + $0x78] sm:$0xff]  ;;  %v7350_v56 = vld [vmem:[%s15777_s5 + $0x20] sm:$0xff] }
 0x2da   :  { %v6601_v7 = vsel %vm4986_vm15, %v16382_v27, %v6600_v39  ;;  %v6608_v2 = vsel %vm4986_vm15, %v16385_v58, %v6607_v11  ;;  %10398 = vmatprep.mubr.msk.f32.mxu0 %vm5053_vm1, %v6595_v47  ;;  %10435 = vmatprep.mubr.msk.f32.mxu1 %vm5053_vm1, %v6595_v47  ;;  %v16419_v36 = vrot.slane %v16418_v19, %v13346_v3  ;;  %v16420_v58 = vld [vmem:[#allocation82_spill] sm:$0xff]  ;;  %v11420_v1 = vmov 0.0   ;;  %v7348_v26 = vld [vmem:[%s15777_s5 + $0x10] sm:$0xff]  ;;  %v7349_v37 = vld [vmem:[%s15777_s5 + $0x18] sm:$0xff] }
 0x2db   :  { %v6602_v6 = vsel %vm4988_vm0, %v16416_v13, %v6601_v7  ;;  %v6609_v43 = vsel %vm4988_vm0, %v16417_v53, %v6608_v2  ;;  %v6556_v21 = vrot.slane %v16420_v58, %v13346_v3  ;;  %v6617_v16 = vsel %vm4977_vm11, %v14044_v50, %v14028_v33  ;;  %v16421_v33 = vld [vmem:[#allocation86_spill] sm:$0xff]  ;;  %v7351_v40 = vld [vmem:[%s15777_s5 + $0x28] sm:$0xff]  ;;  %v8915_v60 = vld [vmem:[%s15777_s5 + $0x90] sm:$0xff] }
 0x2dc   :  { %v6612_v27 = vsel %vm4981_vm13, %v16419_v36, %v6611_v12  ;;  %10399 = vmatmul.mubr.msk.f32.gmra.mrb[32].mxu0 %vm5053_vm1, %v6602_v6  ;;  %10436 = vmatmul.mubr.msk.f32.gmra.mrb[36].mxu1 %vm5053_vm1, %v6602_v6  ;;  %v6618_v62 = vsel %vm4979_vm12, %v16352_v18, %v6617_v16  ;;  %v4541_v9 = vmax.f32 %v16413_v20, %v8656_v54  ;;  %v8913_v20 = vld [vmem:[%s15777_s5 + $0x80] sm:$0xff]  ;;  %v8914_v54 = vld [vmem:[%s15777_s5 + $0x88] sm:$0xff]  ;;  %v8916_v24 = vld [vmem:[%s15777_s5 + $0x98] sm:$0xff] }
 0x2dd   :  { %v6613_v23 = vsel %vm2061_vm8, %v14031_v46, %v6612_v27  ;;  %10401 = vmatprep.mubr.msk.f32.mxu0 %vm5053_vm1, %v6609_v43  ;;  %10438 = vmatprep.mubr.msk.f32.mxu1 %vm5053_vm1, %v6609_v43  ;;  %v6619_v61 = vsel %vm4981_vm13, %v14728_v22, %v6618_v62  ;;  %v6624_v50 = vsel %vm4977_vm11, %v16421_v33, %v14158_v57  ;;  %v7352_v47 = vld [vmem:[%s15777_s5 + $0x30] sm:$0xff]  ;;  %v7353_v7 = vld [vmem:[%s15777_s5 + $0x38] sm:$0xff]  ;;  %v7354_v13 = vld [vmem:[%s15777_s5 + $0x40] sm:$0xff] }
 0x2de   :  { %v6614_v31 = vsel %vm4984_vm14, %v14055_v5, %v6613_v23  ;;  %v6620_v5 = vsel %vm2061_vm8, %v16423_v8, %v6619_v61  ;;  %v6625_v18 = vsel %vm4979_vm12, %v16387_v35, %v6624_v50  ;;  %v6560_v35 = vrot.slane %v4541_v9, %v13346_v3  ;;  %v7355_v6 = vld [vmem:[%s15777_s5 + $0x48] sm:$0xff]  ;;  %v15291_v43 = vld [vmem:[%s15778_s4] ss:$0 sm:$0xff] }
 0x2df   :  { %v6615_v46 = vsel %vm4986_vm15, %v14059_v49, %v6614_v31  ;;  %v6621_v49 = vsel %vm4984_vm14, %v6556_v21, %v6620_v5  ;;  %v6626_v22 = vsel %vm4981_vm13, %v16389_v15, %v6625_v18  ;;  %v10913_v28 = vpack.c.bf16 %v8910_v42, %v8909_v29 }
 0x2e0   :  { %v6616_v0 = vsel %vm4988_vm0, %v16422_v30, %v6615_v46  ;;  %v6622_v57 = vsel %vm4986_vm15, %v16388_v55, %v6621_v49  ;;  %v6627_v45 = vsel %vm2061_vm8, %v16394_v59, %v6626_v22  ;;  %v11418_v59 = vmov 0.0|0.0   ;;  %v15304_v22 = vld [vmem:[%s15777_s5 + $0xa0] sm:$0xff] }
 0x2e1   :  { %10402 = vmatmul.mubr.msk.f32.gmra.mrb[34].mxu0 %vm5053_vm1, %v6616_v0  ;;  %10439 = vmatmul.mubr.msk.f32.gmra.mrb[38].mxu1 %vm5053_vm1, %v6616_v0  ;;  %v6623_v10 = vsel %vm4988_vm0, %v16424_v41, %v6622_v57  ;;  %v6628_v14 = vsel %vm4984_vm14, %v16425_v51, %v6627_v45  ;;  %v10925_v52 = vpack.c.bf16 %v7347_v38, %v7346_v34  ;;  %v15309_v57 = vld [vmem:[%s15777_s5 + $0xa8] sm:$0xff] }
 0x2e2   :  { %10404 = vmatprep.mubr.msk.f32.mxu0 %vm5053_vm1, %v6623_v10  ;;  %10441 = vmatprep.mubr.msk.f32.mxu1 %vm5053_vm1, %v6623_v10  ;;  %v6629_v15 = vsel %vm4986_vm15, %v15004_v48, %v6628_v14  ;;  %v10910_v48 = vpack.c.bf16 %v8908_v63, %v8907_v25  ;;  %v10916_v32 = vpack.c.bf16 %v8912_v44, %v8911_v17  ;;  %v16426_v41 = vld [vmem:[#allocation35_spill] sm:$0xff] }
 0x2e3   :  { %v6630_v55 = vsel %vm4988_vm0, %v6560_v35, %v6629_v15  ;;  %10909 = vmatprep.subr.bf16.mxu0 %v11418_v59  ;;  %10924 = vmatprep.subr.bf16.mxu1 %v11418_v59  ;;  %v10928_v4 = vpack.c.bf16 %v7349_v37, %v7348_v26  ;;  %v10919_v39 = vpack.c.bf16 %v8914_v54, %v8913_v20 }
 0x2e4   :  { %10911 = vmatpush3.bf16.msra.mxu0 %v10910_v48  ;;  %10926 = vmatpush3.bf16.msra.mxu1 %v10925_v52  ;;  %v10931_v11 = vpack.c.bf16 %v7351_v40, %v7350_v56  ;;  %v10922_v2 = vpack.c.bf16 %v8916_v24, %v8915_v60  ;;  %v10934_v12 = vpack.c.bf16 %v7353_v7, %v7352_v47 }
 0x2e5   :  { %10405 = vmatmul.mubr.msk.f32.gmra.mrb[36].mxu0 %vm5053_vm1, %v6630_v55  ;;  %10442 = vmatmul.mubr.msk.f32.gmra.mrb[40].mxu1 %vm5053_vm1, %v6630_v55  ;;  %v10937_v53 = vpack.c.bf16 %v7355_v6, %v7354_v13  ;;  %v10940_v34 = vpack.c.bf16 %v15309_v57, %v15304_v22  ;;  %v8923_v22 = vld [vmem:[%s15777_s5 + $0xc0] sm:$0xff]  ;;  %v8924_v57 = vld [vmem:[%s15777_s5 + $0xc8] sm:$0xff] }
 0x2e6   :  { %10912 = vmatprep.subr.bf16.mxu0 %v11418_v59  ;;  %10464 = vmatprep.mubr.msk.f32.mxu0 %vm11419_vm2, %v11420_v1 }
 0x2e7   :  { %10487 = vmatprep.mubr.msk.f32.mxu1 %vm11419_vm2, %v11420_v1  ;;  %10927 = vmatprep.subr.bf16.mxu1 %v11418_v59 }
 0x2e8   :  { %10914 = vmatpush3.bf16.msra.mxu0 %v10913_v28  ;;  %10929 = vmatpush3.bf16.msra.mxu1 %v10928_v4 }
 0x2e9   :  { %10915 = vmatprep.subr.bf16.mxu0 %v11418_v59  ;;  %10930 = vmatprep.subr.bf16.mxu1 %v11418_v59 }
 0x2ec   :  { %10917 = vmatpush3.bf16.msra.mxu0 %v10916_v32  ;;  %10932 = vmatpush3.bf16.msra.mxu1 %v10931_v11 }
 0x2ed   :  { %10918 = vmatprep.subr.bf16.mxu0 %v11418_v59  ;;  %10933 = vmatprep.subr.bf16.mxu1 %v11418_v59 }
 0x2f0   :  { %10920 = vmatpush3.bf16.msra.mxu0 %v10919_v39  ;;  %10935 = vmatpush3.bf16.msra.mxu1 %v10934_v12 }
 0x2f1   :  { %10921 = vmatprep.subr.bf16.mxu0 %v11418_v59  ;;  %10936 = vmatprep.subr.bf16.mxu1 %v11418_v59 }
 0x2f4   :  { %10923 = vmatpush3.bf16.msra.mxu0 %v10922_v2  ;;  %10938 = vmatpush3.bf16.msra.mxu1 %v10937_v53 }
 0x2f5   :  { %10939 = vmatprep.subr.bf16.mxu0 %v11418_v59  ;;  %10954 = vmatprep.subr.bf16.mxu1 %v11418_v59 }
 0x3a6   :  { %v10394_v19 = vpop.f32.mrb[28].mxu0  ;;  %v10431_v36 = vpop.f32.mrb[32].mxu1 }
 0x3a7   :  { %v6927_v27 = vadd.f32 %v10394_v19, %v15291_v43  ;;  %v6937_v23 = vadd.f32 %v10431_v36, %v15291_v43  ;;  %v6720_v58 = vpop.f32.mrb[29].mxu0  ;;  %v6860_v21 = vpop.f32.mrb[33].mxu1 }
 0x3a8   :  { %v6926_v16 = vadd.f32 %v15291_v43, %v6720_v58  ;;  %v6936_v31 = vadd.f32 %v15291_v43, %v6860_v21 }
 0x3a9   :  { %v6947_v62 = vmax.f32 %v6927_v27, %v6937_v23 }
 0x3aa   :  { %v6946_v46 = vmax.f32 %v6926_v16, %v6936_v31  ;;  %v10397_v61 = vpop.f32.mrb[30].mxu0  ;;  %v10434_v9 = vpop.f32.mrb[34].mxu1 }
 0x3ab   :  { %v6957_v33 = vmax.f32 %v6947_v62, 0.0  ;;  %v6929_v50 = vadd.f32 %v10397_v61, %v15291_v43  ;;  %v6939_v30 = vadd.f32 %v10434_v9, %v15291_v43  ;;  %v6730_v0 = vpop.f32.mrb[31].mxu0  ;;  %v6870_v8 = vpop.f32.mrb[35].mxu1 }
 0x3ac   :  { %v6956_v5 = vmax.f32 %v6946_v46, 0.0  ;;  %v6928_v18 = vadd.f32 %v15291_v43, %v6730_v0  ;;  %v6938_v49 = vadd.f32 %v15291_v43, %v6870_v8  ;;  %v15354_v0 = vld [vmem:[%s15777_s5 + $0xb8] sm:$0xff] }
 0x3ad   :  { %v6993_v45 = vcombine.high %v6957_v33, %v6957_v33  ;;  %v7000_v10 = vrot.slane %v6957_v33, %v16426_v41  ;;  %v6949_v35 = vmax.f32 %v6929_v50, %v6939_v30  ;;  %v15349_v30 = vld [vmem:[%s15777_s5 + $0xb0] sm:$0xff] }
 0x3ae   :  { %v6976_v51 = vcombine.high %v6956_v5, %v6956_v5  ;;  %v6983_v14 = vrot.slane %v6956_v5, %v16426_v41  ;;  %v6948_v15 = vmax.f32 %v6928_v18, %v6938_v49 }
 0x3af   :  { %v15313_v55 = vpop.f32.mrb[32].mxu0  ;;  %v15315_v25 = vpop.f32.mrb[36].mxu1  ;;  %v7007_v63 = vrot.slane %v6993_v45, %v16426_v41  ;;  %v7008_v48 = vcombine.high %v7000_v10, %v7000_v10  ;;  %v8871_v28 = vrot.slane %v7000_v10, 9  ;;  %v6959_v32 = vmax.f32 %v6949_v35, 0.0 }
 0x3b0   :  { %v15318_v29 = vpop.f32.mrb[33].mxu0  ;;  %v15320_v42 = vpop.f32.mrb[37].mxu1  ;;  %v6990_v38 = vrot.slane %v6976_v51, %v16426_v41  ;;  %v6991_v17 = vcombine.high %v6983_v14, %v6983_v14  ;;  %v8867_v44 = vrot.slane %v6983_v14, 9  ;;  %v6958_v47 = vmax.f32 %v6948_v15, 0.0 }
 0x3b1   :  { %v7009_v52 = vcombine.high %v7007_v63, %v7007_v63  ;;  %v8872_v26 = vrot.slane %v7008_v48, 9  ;;  %v8873_v37 = vrot.slane %v7007_v63, 9  ;;  %v7027_v23 = vcombine.high %v6959_v32, %v6959_v32 }
 0x3b2   :  { %v6992_v4 = vcombine.high %v6990_v38, %v6990_v38  ;;  %v8868_v20 = vrot.slane %v6991_v17, 9  ;;  %v8869_v54 = vrot.slane %v6990_v38, 9  ;;  %v7306_v56 = vmax.f32 %v6983_v14, %v8867_v44 }
 0x3b3   :  { %v8874_v11 = vrot.slane %v7009_v52, 9  ;;  %v7311_v60 = vmax.f32 %v7008_v48, %v8872_v26  ;;  %v7312_v24 = vmax.f32 %v7007_v63, %v8873_v37  ;;  %v7310_v58 = vmax.f32 %v7000_v10, %v8871_v28 }
 0x3b4   :  { %v15325_v40 = vpop.f32.mrb[34].mxu0  ;;  %v15327_v39 = vpop.f32.mrb[38].mxu1  ;;  %v8870_v12 = vrot.slane %v6992_v4, 9  ;;  %v7307_v13 = vmax.f32 %v6991_v17, %v8868_v20  ;;  %v7308_v6 = vmax.f32 %v6990_v38, %v8869_v54  ;;  %v7498_v53 = vrot.slane %v7306_v56, %v13346_v3 }
 0x3b5   :  { %v15329_v7 = vpop.f32.mrb[35].mxu0  ;;  %v15331_v2 = vpop.f32.mrb[39].mxu1  ;;  %v7313_v19 = vmax.f32 %v7009_v52, %v8874_v11  ;;  %v7382_v36 = vrot.slane %v7312_v24, %v13346_v3  ;;  %v7502_v27 = vrot.slane %v7311_v60, %v13346_v3  ;;  %v7034_v31 = vrot.slane %v6959_v32, %v16426_v41 }
 0x3b6   :  { %v7378_v21 = vrot.slane %v7307_v13, %v13346_v3  ;;  %v7628_v16 = vrot.slane %v7308_v6, %v13346_v3  ;;  %v7041_v61 = vrot.slane %v7027_v23, %v16426_v41  ;;  %v7010_v9 = vcombine.high %v6958_v47, %v6958_v47 }
 0x3b7   :  { %v7632_v62 = vrot.slane %v7313_v19, %v13346_v3  ;;  %v7527_v46 = vsel %vm4977_vm11, %v7502_v27, %v7498_v53  ;;  %v7309_v8 = vmax.f32 %v6992_v4, %v8870_v12  ;;  %v7042_v18 = vcombine.high %v7034_v31, %v7034_v31 }
 0x3b8   :  { %v15342_v33 = vpop.f32.mrb[36].mxu0  ;;  %v15344_v50 = vpop.f32.mrb[40].mxu1  ;;  %v7407_v5 = vsel %vm4977_vm11, %v7382_v36, %v7378_v21  ;;  %v8879_v49 = vrot.slane %v7034_v31, 9  ;;  %v7043_v51 = vcombine.high %v7041_v61, %v7041_v61  ;;  %v8881_v14 = vrot.slane %v7041_v61, 9 }
 0x3b9   :  { %v15357_v45 = vpop.f32.mrb[37].mxu0  ;;  %v15359_v10 = vpop.f32.mrb[41].mxu1  ;;  %v7657_v35 = vsel %vm4977_vm11, %v7632_v62, %v7628_v16  ;;  %v7017_v15 = vrot.slane %v6958_v47, %v16426_v41  ;;  %v8880_v63 = vrot.slane %v7042_v18, 9  ;;  %v7024_v28 = vrot.slane %v7010_v9, %v16426_v41 }
 0x3ba   :  { %v7318_v48 = vmax.f32 %v7034_v31, %v8879_v49  ;;  %v10943_v38 = vpack.c.bf16 %v15354_v0, %v15349_v30  ;;  %v7890_v17 = vrot.slane %v7310_v58, %v13346_v3  ;;  %v8882_v44 = vrot.slane %v7043_v51, 9  ;;  %v8925_v30 = vld [vmem:[%s15777_s5 + $0xd0] sm:$0xff]  ;;  %v8926_v0 = vld [vmem:[%s15777_s5 + $0xd8] sm:$0xff] }
 0x3bb   :  { %v7025_v52 = vcombine.high %v7017_v15, %v7017_v15  ;;  %v8875_v26 = vrot.slane %v7017_v15, 9  ;;  %v7759_v37 = vrot.slane %v7309_v8, %v13346_v3  ;;  %v7026_v4 = vcombine.high %v7024_v28, %v7024_v28 }
 0x3bc   :  { %v7636_v32 = vrot.slane %v7318_v48, %v13346_v3  ;;  %v8877_v20 = vrot.slane %v7024_v28, 9  ;;  %v15369_v54 = vmax.f32 %v7041_v61, %v8881_v14  ;;  %v6931_v60 = vadd.f32 %v15313_v55, %v15291_v43 }
 0x3bd   :  { %v8876_v56 = vrot.slane %v7025_v52, 9  ;;  %v7314_v11 = vmax.f32 %v7017_v15, %v8875_v26  ;;  %v15373_v24 = vmax.f32 %v7042_v18, %v8880_v63  ;;  %v8878_v12 = vrot.slane %v7026_v4, 9 }
 0x3be   :  { %v15376_v47 = vsel %vm4979_vm12, %v7636_v32, %v7657_v35  ;;  %v7316_v13 = vmax.f32 %v7024_v28, %v8877_v20  ;;  %v15378_v6 = vmax.f32 %v7043_v51, %v8882_v44  ;;  %v6941_v36 = vadd.f32 %v15315_v25, %v15291_v43 }
 0x3bf   :  { %v7315_v53 = vmax.f32 %v7025_v52, %v8876_v56  ;;  %v7763_v19 = vrot.slane %v7314_v11, %v13346_v3  ;;  %v7317_v27 = vmax.f32 %v7026_v4, %v8878_v12  ;;  %v6930_v55 = vadd.f32 %v15291_v43, %v15318_v29 }
 0x3c0   :  { %v7506_v23 = vrot.slane %v7316_v13, %v13346_v3  ;;  %v6940_v58 = vadd.f32 %v15291_v43, %v15320_v42  ;;  %v6951_v31 = vmax.f32 %v6931_v60, %v6941_v36  ;;  %v6933_v62 = vadd.f32 %v15325_v40, %v15291_v43 }
 0x3c1   :  { %v15389_v21 = vsel %vm4977_vm11, %v7763_v19, %v7759_v37  ;;  %v7894_v16 = vrot.slane %v7315_v53, %v13346_v3  ;;  %v7386_v25 = vrot.slane %v7317_v27, %v13346_v3  ;;  %v6943_v29 = vadd.f32 %v15327_v39, %v15291_v43 }
 0x3c2   :  { %v15396_v61 = vsel %vm4979_vm12, %v7506_v23, %v7527_v46  ;;  %v6950_v9 = vmax.f32 %v6930_v55, %v6940_v58  ;;  %v6961_v8 = vmax.f32 %v6951_v31, 0.0  ;;  %v6932_v18 = vadd.f32 %v15291_v43, %v15329_v7 }
 0x3c3   :  { %v15401_v42 = vsel %vm4977_vm11, %v7894_v16, %v7890_v17  ;;  %v6942_v49 = vadd.f32 %v15291_v43, %v15331_v2  ;;  %v7898_v40 = vrot.slane %v15369_v54, %v13346_v3  ;;  %v7408_v46 = vsel %vm4979_vm12, %v7386_v25, %v7407_v5 }
 0x3c4   :  { %v6960_v35 = vmax.f32 %v6950_v9, 0.0  ;;  %v6953_v51 = vmax.f32 %v6933_v62, %v6943_v29  ;;  %v7767_v39 = vrot.slane %v15373_v24, %v13346_v3  ;;  %v7061_v14 = vcombine.high %v6961_v8, %v6961_v8 }
 0x3c5   :  { %v7068_v15 = vrot.slane %v6961_v8, %v16426_v41  ;;  %v6952_v63 = vmax.f32 %v6932_v18, %v6942_v49  ;;  %v7510_v7 = vrot.slane %v15378_v6, %v13346_v3  ;;  %v6935_v28 = vadd.f32 %v15342_v33, %v15291_v43 }
 0x3c6   :  { %v7044_v48 = vcombine.high %v6960_v35, %v6960_v35  ;;  %v7051_v2 = vrot.slane %v6960_v35, %v16426_v41  ;;  %v7075_v17 = vrot.slane %v7061_v14, %v16426_v41  ;;  %v6963_v52 = vmax.f32 %v6953_v51, 0.0 }
 0x3c7   :  { %v7076_v5 = vcombine.high %v7068_v15, %v7068_v15  ;;  %v8887_v44 = vrot.slane %v7068_v15, 9  ;;  %v6945_v4 = vadd.f32 %v15344_v50, %v15291_v43  ;;  %v6962_v50 = vmax.f32 %v6952_v63, 0.0 }
 0x3c8   :  { %v7058_v26 = vrot.slane %v7044_v48, %v16426_v41  ;;  %v7059_v37 = vcombine.high %v7051_v2, %v7051_v2  ;;  %v8883_v32 = vrot.slane %v7051_v2, 9  ;;  %v7077_v20 = vcombine.high %v7075_v17, %v7075_v17 }
 0x3c9   :  { %v8888_v56 = vrot.slane %v7076_v5, 9  ;;  %v8889_v11 = vrot.slane %v7075_v17, 9  ;;  %v15422_v60 = vmax.f32 %v7068_v15, %v8887_v44  ;;  %v7095_v23 = vcombine.high %v6963_v52, %v6963_v52 }
 0x3ca   :  { %v7060_v12 = vcombine.high %v7058_v26, %v7058_v26  ;;  %v8884_v13 = vrot.slane %v7059_v37, 9  ;;  %v8885_v33 = vrot.slane %v7058_v26, 9  ;;  %v7322_v53 = vmax.f32 %v7051_v2, %v8883_v32 }
 0x3cb   :  { %v8890_v19 = vrot.slane %v7077_v20, 9  ;;  %v7327_v36 = vmax.f32 %v7076_v5, %v8888_v56  ;;  %v15424_v27 = vmax.f32 %v7075_v17, %v8889_v11  ;;  %v7514_v31 = vrot.slane %v15422_v60, %v13346_v3 }
 0x3cc   :  { %v8886_v55 = vrot.slane %v7060_v12, 9  ;;  %v15426_v58 = vmax.f32 %v7059_v37, %v8884_v13  ;;  %v7390_v16 = vrot.slane %v7322_v53, %v13346_v3  ;;  %v15431_v62 = vmax.f32 %v7058_v26, %v8885_v33 }
 0x3cd   :  { %v7102_v25 = vrot.slane %v6963_v52, %v16426_v41  ;;  %v6934_v9 = vadd.f32 %v15291_v43, %v15357_v45  ;;  %v15436_v29 = vmax.f32 %v7077_v20, %v8890_v19  ;;  %v7394_v8 = vrot.slane %v7327_v36, %v13346_v3 }
 0x3ce   :  { %v7644_v18 = vrot.slane %v15424_v27, %v13346_v3  ;;  %v7409_v49 = vsel %vm4981_vm13, %v7390_v16, %v7408_v46  ;;  %v15442_v35 = vmax.f32 %v7060_v12, %v8886_v55  ;;  %v7109_v51 = vrot.slane %v7095_v23, %v16426_v41 }
 0x3cf   :  { %v7110_v14 = vcombine.high %v7102_v25, %v7102_v25  ;;  %v8895_v15 = vrot.slane %v7102_v25, 9  ;;  %v7640_v63 = vrot.slane %v15426_v58, %v13346_v3  ;;  %v7078_v48 = vcombine.high %v6962_v50, %v6962_v50 }
 0x3d0   :  { %v7085_v45 = vrot.slane %v6962_v50, %v16426_v41  ;;  %v6955_v2 = vmax.f32 %v6935_v28, %v6945_v4  ;;  %v7111_v17 = vcombine.high %v7109_v51, %v7109_v51  ;;  %v8897_v44 = vrot.slane %v7109_v51, 9 }
 0x3d1   :  { %v8896_v5 = vrot.slane %v7110_v14, 9  ;;  %v15448_v52 = vmax.f32 %v7102_v25, %v8895_v15  ;;  %v7092_v46 = vrot.slane %v7078_v48, %v16426_v41  ;;  %v7775_v20 = vrot.slane %v15436_v29, %v13346_v3 }
 0x3d2   :  { %v7093_v26 = vcombine.high %v7085_v45, %v7085_v45  ;;  %v8891_v37 = vrot.slane %v7085_v45, 9  ;;  %v6965_v32 = vmax.f32 %v6955_v2, 0.0  ;;  %v7771_v56 = vrot.slane %v15431_v62, %v13346_v3 }
 0x3d3   :  { %v8898_v11 = vrot.slane %v7111_v17, 9  ;;  %v7336_v12 = vmax.f32 %v7109_v51, %v8897_v44  ;;  %v7902_v28 = vrot.slane %v15442_v35, %v13346_v3  ;;  %v7094_v4 = vcombine.high %v7092_v46, %v7092_v46 }
 0x3d4   :  { %v8892_v13 = vrot.slane %v7093_v26, 9  ;;  %v8893_v33 = vrot.slane %v7092_v46, 9  ;;  %v15457_v53 = vmax.f32 %v7110_v14, %v8896_v5  ;;  %v7779_v36 = vrot.slane %v15448_v52, %v13346_v3  ;;  %v8930_v52 = vld [vmem:[%s15777_s5 + $0xf0] sm:$0xff] }
 0x3d5   :  { %v7337_v19 = vmax.f32 %v7111_v17, %v8898_v11  ;;  %v7129_v23 = vcombine.high %v6965_v32, %v6965_v32  ;;  %v8894_v55 = vrot.slane %v7094_v4, 9  ;;  %v15461_v58 = vmax.f32 %v7085_v45, %v8891_v37 }
 0x3d6   :  { %v7331_v16 = vmax.f32 %v7093_v26, %v8892_v13  ;;  %v7332_v50 = vmax.f32 %v7092_v46, %v8893_v33  ;;  %v7522_v62 = vrot.slane %v7336_v12, %v13346_v3  ;;  %v7136_v25 = vrot.slane %v6965_v32, %v16426_v41 }
 0x3d7   :  { %v7143_v29 = vrot.slane %v7129_v23, %v16426_v41  ;;  %v6944_v51 = vadd.f32 %v15291_v43, %v15359_v10  ;;  %v7333_v14 = vmax.f32 %v7094_v4, %v8894_v55  ;;  %v7402_v48 = vrot.slane %v7337_v19, %v13346_v3 }
 0x3d8   :  { %v7398_v15 = vrot.slane %v7332_v50, %v13346_v3  ;;  %v7410_v2 = vsel %vm2061_vm8, %v7394_v8, %v7409_v49  ;;  %v7518_v45 = vrot.slane %v7331_v16, %v13346_v3  ;;  %v7144_v17 = vcombine.high %v7136_v25, %v7136_v25 }
 0x3d9   :  { %v7145_v5 = vcombine.high %v7143_v29, %v7143_v29  ;;  %v8903_v44 = vrot.slane %v7136_v25, 9  ;;  %v6954_v46 = vmax.f32 %v6934_v9, %v6944_v51  ;;  %v7529_v43 = vsel %vm4981_vm13, %v7510_v7, %v15396_v61 }
 0x3da   :  { %v7411_v26 = vsel %vm4984_vm14, %v7398_v15, %v7410_v2  ;;  %v7648_v10 = vrot.slane %v7333_v14, %v13346_v3  ;;  %v7910_v37 = vrot.slane %v15457_v53, %v13346_v3  ;;  %v7906_v8 = vrot.slane %v15461_v58, %v13346_v3 }
 0x3db   :  { %v8904_v49 = vrot.slane %v7144_v17, 9  ;;  %v7342_v32 = vmax.f32 %v7136_v25, %v8903_v44  ;;  %v6964_v11 = vmax.f32 %v6954_v46, 0.0  ;;  %v7412_v9 = vsel %vm4986_vm15, %v7402_v48, %v7411_v26 }
 0x3dc   :  { %v7530_v6 = vsel %vm2061_vm8, %v7514_v31, %v7529_v43  ;;  %v7659_v61 = vsel %vm4981_vm13, %v7640_v63, %v15376_v47  ;;  %v8906_v7 = vrot.slane %v7145_v5, 9  ;;  %v8905_v19 = vrot.slane %v7143_v29, 9  ;;  %v8932_v43 = vld [vmem:[%s15777_s5 + $0x100] sm:$0xff] }
 0x3dd   :  { %v7406_v12 = vrot.slane %v7342_v32, %v13346_v3  ;;  %v7531_v4 = vsel %vm4984_vm14, %v7518_v45, %v7530_v6  ;;  %v7660_v13 = vsel %vm2061_vm8, %v7644_v18, %v7659_v61  ;;  %v7112_v33 = vcombine.high %v6964_v11, %v6964_v11  ;;  %v8927_v32 = vld [vmem:[%s15777_s5 + $0xe0] sm:$0xff]  ;;  %v8934_v6 = vld [vmem:[%s15777_s5 + $0x110] sm:$0xff]  ;;  %v8935_v61 = vld [vmem:[%s15777_s5 + $0x118] sm:$0xff] }
 0x3de   :  { %v7119_v53 = vrot.slane %v6964_v11, %v16426_v41  ;;  %v7532_v60 = vsel %vm4986_vm15, %v7522_v62, %v7531_v4  ;;  %v7661_v31 = vsel %vm4984_vm14, %v7648_v10, %v7660_v13  ;;  %v7343_v23 = vmax.f32 %v7144_v17, %v8904_v49  ;;  %v8933_v10 = vld [vmem:[%s15777_s5 + $0x108] sm:$0xff] }
 0x3df   :  { %v7413_v47 = vsel %vm4988_vm0, %v7406_v12, %v7412_v9  ;;  %v7789_v63 = vsel %vm4979_vm12, %v7767_v39, %v15389_v21  ;;  %v7126_v27 = vrot.slane %v7112_v33, %v16426_v41  ;;  %v7345_v24 = vmax.f32 %v7145_v5, %v8906_v7  ;;  %v8928_v11 = vld [vmem:[%s15777_s5 + $0xe8] sm:$0xff]  ;;  %v8941_v12 = vld [vmem:[%s15777_s5 + $0x140] sm:$0xff] }
 0x3e0   :  { %v7127_v18 = vcombine.high %v7119_v53, %v7119_v53  ;;  %v8899_v55 = vrot.slane %v7119_v53, 9  ;;  %10465 = vmatmul.mubr.msk.f32.vlgmr.msra.gmra.mrb[38].mxu0 %vm7414_vm3, %v7413_v47  ;;  %v7790_v58 = vsel %vm4981_vm13, %v7771_v56, %v7789_v63  ;;  %v7920_v41 = vsel %vm4979_vm12, %v7898_v40, %v15401_v42  ;;  %v8942_v4 = vld [vmem:[%s15777_s5 + $0x148] sm:$0xff]  ;;  %v8936_v33 = vld [vmem:[%s15777_s5 + $0x120] sm:$0xff]  ;;  %v8938_v47 = vld [vmem:[%s15777_s5 + $0x130] sm:$0xff] }
 0x3e1   :  { %10941 = vmatpush3.bf16.msra.mxu0 %v10940_v34  ;;  %10510 = vmatprep.mubr.msk.f32.mxu0 %vm11419_vm2, %v11420_v1  ;;  %v7791_v16 = vsel %vm2061_vm8, %v7775_v20, %v7790_v58  ;;  %v7128_v21 = vcombine.high %v7126_v27, %v7126_v27  ;;  %v8901_v50 = vrot.slane %v7126_v27, 9  ;;  %v7344_v34 = vmax.f32 %v7143_v29, %v8905_v19  ;;  %v8944_v19 = vld [vmem:[%s15777_s5 + $0x158] sm:$0xff] }
 0x3e2   :  { %v8900_v39 = vrot.slane %v7127_v18, 9  ;;  %v7338_v56 = vmax.f32 %v7119_v53, %v8899_v55  ;;  %10942 = vmatprep.subr.bf16.mxu0 %v11418_v59  ;;  %v7656_v20 = vrot.slane %v7343_v23, %v13346_v3  ;;  %v7792_v54 = vsel %vm4984_vm14, %v7779_v36, %v7791_v16  ;;  %v8931_v36 = vld [vmem:[%s15777_s5 + $0xf8] sm:$0xff]  ;;  %v8937_v53 = vld [vmem:[%s15777_s5 + $0x128] sm:$0xff] }
 0x3e3   :  { %v7921_v42 = vsel %vm4981_vm13, %v7902_v28, %v7920_v41  ;;  %v8902_v40 = vrot.slane %v7128_v21, 9  ;;  %v7340_v25 = vmax.f32 %v7126_v27, %v8901_v50  ;;  %v10946_v35 = vpack.c.bf16 %v8924_v57, %v8923_v22  ;;  %v8939_v63 = vld [vmem:[%s15777_s5 + $0x138] sm:$0xff]  ;;  %v8946_v55 = vld [vmem:[%s15777_s5 + $0x168] sm:$0xff]  ;;  %v8008_v22 = vld [vmem:[%s15779_s7] sm:$0xff] }
 0x3e4   :  { %v7339_v62 = vmax.f32 %v7127_v18, %v8900_v39  ;;  %v7652_v51 = vrot.slane %v7338_v56, %v13346_v3  ;;  %v7918_v28 = vrot.slane %v7345_v24, %v13346_v3  ;;  %v7922_v29 = vsel %vm2061_vm8, %v7906_v8, %v7921_v42  ;;  %v8945_v18 = vld [vmem:[%s15777_s5 + $0x160] sm:$0xff]  ;;  %v8947_v24 = vld [vmem:[%s15777_s5 + $0x170] sm:$0xff]  ;;  %v8948_v41 = vld [vmem:[%s15777_s5 + $0x178] sm:$0xff] }
 0x3e5   :  { %10944 = vmatpush3.bf16.msra.mxu0 %v10943_v38  ;;  %v7341_v14 = vmax.f32 %v7128_v21, %v8902_v40  ;;  %v7914_v48 = vrot.slane %v7340_v25, %v13346_v3  ;;  %v7787_v45 = vrot.slane %v7344_v34, %v13346_v3  ;;  %v7923_v17 = vsel %vm4984_vm14, %v7910_v37, %v7922_v29  ;;  %v8949_v39 = vld [vmem:[%s15777_s5 + $0x180] sm:$0xff]  ;;  %v8950_v50 = vld [vmem:[%s15777_s5 + $0x188] sm:$0xff]  ;;  %v8018_v29 = vld [vmem:[%s15779_s7 + $0x50] sm:$0xff] }
 0x3e6   :  { %10945 = vmatprep.subr.bf16.mxu0 %v11418_v59  ;;  %v7662_v38 = vsel %vm4986_vm15, %v7652_v51, %v7661_v31  ;;  %v7783_v15 = vrot.slane %v7339_v62, %v13346_v3  ;;  %v10955_v44 = vpack.c.bf16 %v8931_v36, %v8930_v52  ;;  %v10949_v8 = vpack.c.bf16 %v8926_v0, %v8925_v30  ;;  %v8943_v31 = vld [vmem:[%s15777_s5 + $0x150] sm:$0xff]  ;;  %v8009_v57 = vld [vmem:[%s15779_s7 + $0x8] sm:$0xff]  ;;  %v8012_v42 = vld [vmem:[%s15779_s7 + $0x20] sm:$0xff] }
 0x3e7   :  { %v7663_v2 = vsel %vm4988_vm0, %v7656_v20, %v7662_v38  ;;  %v7526_v5 = vrot.slane %v7341_v14, %v13346_v3  ;;  %v7924_v26 = vsel %vm4986_vm15, %v7914_v48, %v7923_v17  ;;  %v10958_v9 = vpack.c.bf16 %v8933_v10, %v8932_v43  ;;  %v8010_v20 = vld [vmem:[%s15779_s7 + $0x10] sm:$0xff]  ;;  %v8013_v40 = vld [vmem:[%s15779_s7 + $0x28] sm:$0xff]  ;;  %v8015_v51 = vld [vmem:[%s15779_s7 + $0x38] sm:$0xff] }
 0x3e8   :  { %v7793_v46 = vsel %vm4986_vm15, %v7783_v15, %v7792_v54  ;;  %v7925_v37 = vsel %vm4988_vm0, %v7918_v28, %v7924_v26  ;;  %v10952_v7 = vpack.c.bf16 %v8928_v11, %v8927_v32  ;;  %v10961_v13 = vpack.c.bf16 %v8935_v61, %v8934_v6  ;;  %v8014_v62 = vld [vmem:[%s15779_s7 + $0x30] sm:$0xff]  ;;  %v8016_v36 = vld [vmem:[%s15779_s7 + $0x40] sm:$0xff]  ;;  %v8019_v14 = vld [vmem:[%s15779_s7 + $0x58] sm:$0xff] }
 0x3e9   :  { %10947 = vmatpush3.bf16.msra.mxu0 %v10946_v35  ;;  %v7794_v49 = vsel %vm4988_vm0, %v7787_v45, %v7793_v46  ;;  %v7533_v3 = vsel %vm4988_vm0, %v7526_v5, %v7532_v60  ;;  %v10970_v60 = vpack.c.bf16 %v8942_v4, %v8941_v12  ;;  %v10964_v23 = vpack.c.bf16 %v8937_v53, %v8936_v33  ;;  %v8017_v35 = vld [vmem:[%s15779_s7 + $0x48] sm:$0xff]  ;;  %v8020_v0 = vld [vmem:[%s15779_s7 + $0x60] sm:$0xff]  ;;  %v8022_v48 = vld [vmem:[%s15779_s7 + $0x70] sm:$0xff] }
 0x3ea   :  { %10948 = vmatprep.subr.bf16.mxu0 %v11418_v59  ;;  %10488 = vmatmul.mubr.msk.f32.vlgmr.msra.gmra.mrb[42].mxu1 %vm7414_vm3, %v7533_v3  ;;  %v10973_v27 = vpack.c.bf16 %v8944_v19, %v8943_v31  ;;  %v10967_v58 = vpack.c.bf16 %v8939_v63, %v8938_v47  ;;  %v10976_v16 = vpack.c.bf16 %v8946_v55, %v8945_v18  ;;  %v8021_v38 = vld [vmem:[%s15779_s7 + $0x68] sm:$0xff]  ;;  %v8102_v45 = vld [vmem:[%s15780_s9] sm:$0xff]  ;;  %v8104_v5 = vld [vmem:[%s15780_s9 + $0x10] sm:$0xff] }
 0x3eb   :  { %10956 = vmatpush3.bf16.msra.mxu1 %v10955_v44  ;;  %10533 = vmatprep.mubr.msk.f32.mxu1 %vm11419_vm2, %v11420_v1  ;;  %v10979_v21 = vpack.c.bf16 %v8948_v41, %v8947_v24  ;;  %v10982_v56 = vpack.c.bf16 %v8950_v50, %v8949_v39  ;;  %v10985_v34 = vpack.c.bf16 %v8009_v57, %v8008_v22  ;;  %v8103_v17 = vld [vmem:[%s15780_s9 + $0x8] sm:$0xff]  ;;  %v8105_v46 = vld [vmem:[%s15780_s9 + $0x18] sm:$0xff]  ;;  %v8106_v10 = vld [vmem:[%s15780_s9 + $0x20] sm:$0xff] }
 0x3ec   :  { %10957 = vmatprep.subr.bf16.mxu1 %v11418_v59  ;;  %v10991_v25 = vpack.c.bf16 %v8013_v40, %v8012_v42  ;;  %v10994_v52 = vpack.c.bf16 %v8015_v51, %v8014_v62  ;;  %v10997_v28 = vpack.c.bf16 %v8017_v35, %v8016_v36  ;;  %v11000_v30 = vpack.c.bf16 %v8019_v14, %v8018_v29  ;;  %v8109_v3 = vld [vmem:[%s15780_s9 + $0x38] sm:$0xff]  ;;  %v8110_v11 = vld [vmem:[%s15780_s9 + $0x40] sm:$0xff]  ;;  %v8112_v61 = vld [vmem:[%s15780_s9 + $0x50] sm:$0xff] }
 0x3ed   :  { %10950 = vmatpush3.bf16.msra.mxu0 %v10949_v8  ;;  %v11003_v15 = vpack.c.bf16 %v8021_v38, %v8020_v0  ;;  %v11009_v44 = vpack.c.bf16 %v8103_v17, %v8102_v45  ;;  %v11012_v43 = vpack.c.bf16 %v8105_v46, %v8104_v5  ;;  %v8107_v8 = vld [vmem:[%s15780_s9 + $0x28] sm:$0xff]  ;;  %v8114_v4 = vld [vmem:[%s15780_s9 + $0x60] sm:$0xff]  ;;  %v8116_v50 = vld [vmem:[%s15780_s9 + $0x70] sm:$0xff] }
 0x3ee   :  { %10951 = vmatprep.subr.bf16.mxu0 %v11418_v59  ;;  %v8952_v24 = vld [vmem:[%s15781_s6] ss:$0 sm:$0xff] }
 0x3ef   :  { %10959 = vmatpush3.bf16.msra.mxu1 %v10958_v9  ;;  %v8111_v9 = vld [vmem:[%s15780_s9 + $0x48] sm:$0xff]  ;;  %v8953_v57 = vld [vmem:[%s15782_s8] ss:$0 sm:$0xff] }
 0x3f0   :  { %10960 = vmatprep.subr.bf16.mxu1 %v11418_v59  ;;  %v11021_v6 = vpack.c.bf16 %v8111_v9, %v8110_v11  ;;  %v8954_v42 = vld [vmem:[%s15783_s10] ss:$0 sm:$0xff] }
 0x3f1   :  { %10953 = vmatpush3.bf16.msra.mxu0 %v10952_v7  ;;  %v8113_v7 = vld [vmem:[%s15780_s9 + $0x58] sm:$0xff] }
 0x3f2   :  { %10969 = vmatprep.subr.bf16.mxu0 %v11418_v59  ;;  %v11024_v12 = vpack.c.bf16 %v8113_v7, %v8112_v61 }
 0x3f3   :  { %10962 = vmatpush3.bf16.msra.mxu1 %v10961_v13  ;;  %v8115_v13 = vld [vmem:[%s15780_s9 + $0x68] sm:$0xff] }
 0x3f4   :  { %10511 = vmatmul.mubr.msk.f32.vlgmr.msra.gmra.mrb[40].mxu0 %vm7414_vm3, %v7663_v2  ;;  %10963 = vmatprep.subr.bf16.mxu1 %v11418_v59  ;;  %v8023_v2 = vld [vmem:[%s15779_s7 + $0x78] sm:$0xff]  ;;  %v11027_v33 = vpack.c.bf16 %v8115_v13, %v8114_v4 }
 0x3f5   :  { %10971 = vmatpush3.bf16.msra.mxu0 %v10970_v60  ;;  %10556 = vmatprep.mubr.msk.f32.mxu0 %vm11419_vm2, %v11420_v1  ;;  %v11006_v26 = vpack.c.bf16 %v8023_v2, %v8022_v48 }
 0x3f6   :  { %10972 = vmatprep.subr.bf16.mxu0 %v11418_v59 }
 0x3f7   :  { %10965 = vmatpush3.bf16.msra.mxu1 %v10964_v23 }
 0x3f8   :  { %10966 = vmatprep.subr.bf16.mxu1 %v11418_v59 }
 0x3f9   :  { %10974 = vmatpush3.bf16.msra.mxu0 %v10973_v27 }
 0x3fa   :  { %10975 = vmatprep.subr.bf16.mxu0 %v11418_v59 }
 0x3fb   :  { %10968 = vmatpush3.bf16.msra.mxu1 %v10967_v58 }
 0x3fc   :  { %10984 = vmatprep.subr.bf16.mxu1 %v11418_v59 }
 0x3fd   :  { %10977 = vmatpush3.bf16.msra.mxu0 %v10976_v16 }
 0x3fe   :  { %10978 = vmatprep.subr.bf16.mxu0 %v11418_v59  ;;  %10534 = vmatmul.mubr.msk.f32.vlgmr.msra.gmra.mrb[44].mxu1 %vm7414_vm3, %v7794_v49  ;;  %v11015_v49 = vpack.c.bf16 %v8107_v8, %v8106_v10 }
 0x3ff   :  { %10591 = vmatprep.mubr.msk.f32.mxu1 %vm11419_vm2, %v11420_v1  ;;  %10986 = vmatpush3.bf16.msra.mxu1 %v10985_v34 }
 0x400   :  { %10987 = vmatprep.subr.bf16.mxu1 %v11418_v59 }
 0x401   :  { %10980 = vmatpush3.bf16.msra.mxu0 %v10979_v21 }
 0x402   :  { %10981 = vmatprep.subr.bf16.mxu0 %v11418_v59 }
 0x405   :  { %10983 = vmatpush3.bf16.msra.mxu0 %v10982_v56  ;;  %v8117_v56 = vld [vmem:[%s15780_s9 + $0x78] sm:$0xff] }
 0x406   :  { %11008 = vmatprep.subr.bf16.mxu0 %v11418_v59  ;;  %v11030_v22 = vpack.c.bf16 %v8117_v56, %v8116_v50 }
 0x408   :  { %10557 = vmatmul.mubr.msk.f32.vlgmr.msra.gmra.mrb[42].mxu0 %vm7414_vm3, %v7925_v37  ;;  %v8108_v37 = vld [vmem:[%s15780_s9 + $0x30] sm:$0xff] }
 0x409   :  { %10626 = vmatprep.mubr.msk.f32.mxu0 %vm11419_vm2, %v11420_v1  ;;  %v8011_v1 = vld [vmem:[%s15779_s7 + $0x18] sm:$0xff]  ;;  %11010 = vmatpush3.bf16.msra.mxu0 %v11009_v44  ;;  %v11018_v32 = vpack.c.bf16 %v8109_v3, %v8108_v37 }
 0x40a   :  { %v10988_v54 = vpack.c.bf16 %v8011_v1, %v8010_v20  ;;  %11011 = vmatprep.subr.bf16.mxu0 %v11418_v59 }
 0x40c   :  { %10989 = vmatpush3.bf16.msra.mxu1 %v10988_v54 }
 0x40d   :  { %10990 = vmatprep.subr.bf16.mxu1 %v11418_v59  ;;  %11013 = vmatpush3.bf16.msra.mxu0 %v11012_v43 }
 0x40e   :  { %11014 = vmatprep.subr.bf16.mxu0 %v11418_v59 }
 0x410   :  { %10992 = vmatpush3.bf16.msra.mxu1 %v10991_v25 }
 0x411   :  { %10993 = vmatprep.subr.bf16.mxu1 %v11418_v59  ;;  %11016 = vmatpush3.bf16.msra.mxu0 %v11015_v49 }
 0x412   :  { %11017 = vmatprep.subr.bf16.mxu0 %v11418_v59 }
 0x414   :  { %10995 = vmatpush3.bf16.msra.mxu1 %v10994_v52 }
 0x415   :  { %10996 = vmatprep.subr.bf16.mxu1 %v11418_v59  ;;  %11019 = vmatpush3.bf16.msra.mxu0 %v11018_v32 }
 0x416   :  { %11020 = vmatprep.subr.bf16.mxu0 %v11418_v59 }
 0x418   :  { %10998 = vmatpush3.bf16.msra.mxu1 %v10997_v28 }
 0x419   :  { %10999 = vmatprep.subr.bf16.mxu1 %v11418_v59  ;;  %11022 = vmatpush3.bf16.msra.mxu0 %v11021_v6 }
 0x41a   :  { %11023 = vmatprep.subr.bf16.mxu0 %v11418_v59 }
 0x41c   :  { %11001 = vmatpush3.bf16.msra.mxu1 %v11000_v30 }
 0x41d   :  { %11002 = vmatprep.subr.bf16.mxu1 %v11418_v59  ;;  %11025 = vmatpush3.bf16.msra.mxu0 %v11024_v12 }
 0x41e   :  { %11026 = vmatprep.subr.bf16.mxu0 %v11418_v59 }
 0x420   :  { %11004 = vmatpush3.bf16.msra.mxu1 %v11003_v15 }
 0x421   :  { %11005 = vmatprep.subr.bf16.mxu1 %v11418_v59  ;;  %11028 = vmatpush3.bf16.msra.mxu0 %v11027_v33 }
 0x422   :  { %11029 = vmatprep.subr.bf16.mxu0 %v11418_v59 }
 0x424   :  { %11007 = vmatpush3.bf16.msra.mxu1 %v11006_v26 }
 0x425   :  { %11031 = vmatpush3.bf16.msra.mxu0 %v11030_v22 }
 0x4b3   :  { %v7483_v53 = vpop.f32.mrb[38].mxu0 }
 0x4b4   :  { %v10466_v60 = vpop.f32.mrb[39].mxu0 }
 0x4bd   :  { %v7602_v31 = vpop.f32.mrb[42].mxu1 }
 0x4be   :  { %v7603_v19 = vadd.f32 %v7602_v31, %v7483_v53  ;;  %v10489_v23 = vpop.f32.mrb[43].mxu1 }
 0x4c7   :  { %v7732_v47 = vpop.f32.mrb[40].mxu0 }
 0x4c8   :  { %v7736_v63 = vadd.f32 %v7732_v47, %v7603_v19  ;;  %v10512_v27 = vpop.f32.mrb[41].mxu0 }
 0x4d1   :  { %v7863_v18 = vpop.f32.mrb[44].mxu1 }
 0x4d2   :  { %v7867_v55 = vadd.f32 %v7863_v18, %v7736_v63  ;;  %v10535_v58 = vpop.f32.mrb[45].mxu1 }
 0x4db   :  { %v7994_v16 = vpop.f32.mrb[42].mxu0 }
 0x4dc   :  { %v7998_v41 = vadd.f32 %v7994_v16, %v7867_v55  ;;  %v10558_v21 = vpop.f32.mrb[43].mxu0 }
 0x4de   :  { %v8006_v39 = vadd.f32 %v8952_v24, %v7998_v41 }
 0x4e0   :  { %v8007_v59 = vmax.f32 %v8006_v39, 0.0 }
 0x4e2   :  { %10592 = vmatmul.mubr.f32.vlgmr.msra.gmra.mrb[46].mxu1 %v8007_v59 }
 0x5b5   :  { %v8097_v34 = vpop.f32.mrb[46].mxu1 }
 0x5b6   :  { %v8098_v20 = vadd.f32 %v8953_v57, %v8097_v34  ;;  %v10593_v1 = vpop.f32.mrb[47].mxu1 }
 0x5b8   :  { %v8101_v54 = vmax.f32 %v8098_v20, 0.0 }
 0x5ba   :  { %10627 = vmatmul.mubr.f32.vlgmr.msra.gmra.mrb[44].mxu0 %v8101_v54 }
 0x68d   :  { %v8191_v40 = vpop.f32.mrb[44].mxu0 }
 0x68e   :  { %v8192_v62 = vadd.f32 %v8954_v42, %v8191_v40  ;;  %v10628_v25 = vpop.f32.mrb[45].mxu0 }
 0x690   :  { %8195 = vst [vmem:[%s15784_s11] sm:$0xff] %v8192_v62 }

</bundles_post_ra>
